<compile_context>
chip_gen: v7x
topology: tpu7x:2x2x1
jax: 0.10.0
libtpu: 0.0.40
codegen_flags: <defaults>
</compile_context>

<pallas_src>
import jax
import jax.numpy as jnp
from jax.experimental import pallas as pl
from jax.experimental.pallas import tpu as pltpu

RECURRENT = 256
N_FLATTEN = 256                       # 32 channels * 8 positions
LD_PAD = 64                           # padded width of the fused mu|logvar head
SMALL_W = RECURRENT + LD_PAD          # 320: [h_enc | mu | logvar | z | pad]
DEC_L1 = (N_FLATTEN - 1) * 2 + 1      # 511
OUT_LEN = (DEC_L1 - 1) * 4 + 1        # 2041
PAD_LEN = 8 * N_FLATTEN               # 2048 (lane-dense padded length)

# Single bias slab layout (all 128-aligned lane offsets except the trailing
# 64-wide mu|logvar bias).
_BIAS_LAYOUT = (
    ("b1", 128), ("b2", 256),
    ("ebih", 768), ("ebhh", 768),
    ("bfc", 256),
    ("dbih", 768), ("dbhh", 768),
    ("bmlv", LD_PAD),
)
_BIAS_OFF = {}
_off = 0
for _name, _sz in _BIAS_LAYOUT:
    _BIAS_OFF[_name] = (_off, _off + _sz)
    _off += _sz
_BIAS_TOTAL = _off                    # 3776


# ---------------------------------------------------------------------------
# Single fused Pallas kernel: whole VAE forward for one timestep, everything
# VMEM-resident.  Runs under a grid over T independent timesteps.
# ---------------------------------------------------------------------------
def _vae_fused_kernel(x_ref, eps_ref, h0_ref,
                      wconv_ref, wgru_ref, wmlv_ref, wfc_ref, wdec_ref,
                      fill_ref, bias_ref,
                      out_ref, small_ref):
    f32 = jnp.float32

    def mm(a, bm):
        return jnp.dot(a, bm, preferred_element_type=f32)

    def bias(name):
        lo, hi = _BIAS_OFF[name]
        return bias_ref[:, lo:hi]

    # ---- Encoder "conv" stack (kernel_size=1 convs as Kronecker-expanded
    # matmuls; the stride-8 input pick is folded into wconv[:, :128]).
    x = x_ref[...]                                                       # (B, C*L)
    y1 = jnp.maximum(mm(x, wconv_ref[:, 0:128]) + bias("b1"), 0.0)       # (B, 128)
    feat = jnp.maximum(mm(y1, wconv_ref[:, 128:384]) + bias("b2"), 0.0)  # (B, 256)

    def gru_cell(xv, hv, row0, bih, bhh):
        # PyTorch GRU, gate order (r, z, n); single time step.
        gi = mm(xv, wgru_ref[row0:row0 + 256, :]) + bih
        gh = mm(hv, wgru_ref[row0 + 256:row0 + 512, :]) + bhh
        H = hv.shape[1]
        r = jax.nn.sigmoid(gi[:, :H] + gh[:, :H])
        u = jax.nn.sigmoid(gi[:, H:2 * H] + gh[:, H:2 * H])
        n = jnp.tanh(gi[:, 2 * H:] + r * gh[:, 2 * H:])
        return (1.0 - u) * n + u * hv

    # ---- Encoder GRU (seq-len 1).
    h_enc = gru_cell(feat, h0_ref[...], 0, bias("ebih"), bias("ebhh"))   # (B, 256)

    # ---- Fused fc_mu | fc_logvar head (zero-padded to 64 lanes) + reparam.
    Ld = eps_ref.shape[-1]
    mlv = mm(h_enc, wmlv_ref[...]) + bias("bmlv")                        # (B, 64)
    mu = mlv[:, :Ld]
    lv = mlv[:, Ld:2 * Ld]
    z = mu + jnp.exp(0.5 * lv) * eps_ref[...]

    # ---- Fused small-output slab: [ h_enc | mu | logvar | z | 0-pad ].
    small_ref[:, 0:RECURRENT] = h_enc
    small_ref[:, RECURRENT:RECURRENT + LD_PAD] = mlv
    small_ref[:, RECURRENT + 2 * Ld:RECURRENT + 3 * Ld] = z

    # ---- Decoder: fc + GRU (hidden state = encoder recurrent state).
    d = mm(z, wfc_ref[...]) + bias("bfc")                                # (B, 256)
    h_dec = gru_cell(d, h_enc, 512, bias("dbih"), bias("dbhh"))          # (B, 256)

    # ---- Decoder deconvs (kernel_size=1), transposed formulation.  PyTorch
    # interprets the 2-D (B=32, 256) GRU output as an UNBATCHED (32, 256).
    y1t = jnp.maximum(mm(wdec_ref[:, 0:32], h_dec) + wdec_ref[:, 48:49], 0.0)  # (16,256)
    ev = jax.nn.sigmoid(mm(wdec_ref[:, 32:48], y1t) + wdec_ref[:, 49:50])      # (16,256)

    # ---- Phase-major output slab (out[c, phase, i] == final position 8*i+phase):
    # weight-only constants come from the precomputed filler; only phase 0
    # depends on the data.
    C = out_ref.shape[0]
    out_ref[...] = fill_ref[...]
    out_ref[:, 0, :] = ev[:C, :]


# ---------------------------------------------------------------------------
# Wrapper: one pallas_call over T independent timesteps, minimal glue.
# ---------------------------------------------------------------------------
def vae_forward_seq(packed, x, h0, eps):
    """Run T independent VAE forward passes in one pallas_call.

    x:   (T, B, C, L)  observations (NCL per step)
    h0:  (T, B, 256)   per-step initial recurrent state (zeros == torch's
                       time_sequence=None default)
    eps: (T, B, Ld)    reparametrization noise
    """
    T, B, Cin, L = x.shape
    assert B == 32, "RayDecoder ConvTranspose1d semantics require batch == 32"
    Ld = eps.shape[-1]
    w_conv, w_gru, w_mlv, w_fc, w_dec, filler, biases = packed

    # Contiguous reshape only (free); the ::8 gather lives inside w_conv.
    x_flat = x.reshape(T, B, Cin * L)

    const2 = lambda t: (0, 0)
    const3 = lambda t: (0, 0, 0)
    in_specs = [
        pl.BlockSpec((None, B, Cin * L), lambda t: (t, 0, 0)),    # x_flat
        pl.BlockSpec((None, B, Ld), lambda t: (t, 0, 0)),         # eps
        pl.BlockSpec((None, B, RECURRENT), lambda t: (t, 0, 0)),  # h0
        pl.BlockSpec(w_conv.shape, const2),                       # weights: fetched
        pl.BlockSpec(w_gru.shape, const2),                        # once, VMEM-resident
        pl.BlockSpec(w_mlv.shape, const2),                        # across the grid
        pl.BlockSpec(w_fc.shape, const2),
        pl.BlockSpec(w_dec.shape, const2),
        pl.BlockSpec(filler.shape, const3),
        pl.BlockSpec(biases.shape, const2),
    ]
    out_specs = (
        pl.BlockSpec((None, Cin, 8, N_FLATTEN), lambda t: (t, 0, 0, 0)),
        pl.BlockSpec((None, B, SMALL_W), lambda t: (t, 0, 0)),
    )
    out_shape = (
        jax.ShapeDtypeStruct((T, Cin, 8, N_FLATTEN), jnp.float32),  # deconv, phase-major
        jax.ShapeDtypeStruct((T, B, SMALL_W), jnp.float32),         # h_enc|mu|lv|z
    )

    out_slab, small = pl.pallas_call(
        _vae_fused_kernel,
        grid=(T,),
        in_specs=in_specs,
        out_specs=out_specs,
        out_shape=out_shape,
        compiler_params=pltpu.CompilerParams(
            dimension_semantics=("parallel",)),   # steps independent -> v7x megacore
    )(x_flat, eps, h0, *packed)

    # Reassemble the padded phase-major slab into the (T, C, 2041) output.
    out = (jnp.transpose(out_slab, (0, 1, 3, 2))
           .reshape(T, Cin, PAD_LEN)[:, :, :OUT_LEN])
    h_enc = small[:, :, :RECURRENT]
    mu = small[:, :, RECURRENT:RECURRENT + Ld]
    lv = small[:, :, RECURRENT + Ld:RECURRENT + 2 * Ld]
    z = small[:, :, RECURRENT + 2 * Ld:RECURRENT + 3 * Ld]
    rec = h_enc[:, None]                          # (T, 1, B, 256), torch layout/step
    return out, z, rec, mu, lv


# ---------------------------------------------------------------------------
# Parameter packing (one-time, outside jit): Kronecker-expand conv weights
# (with the ::8 gather folded into layer 1), coalesce everything into 7 slabs,
# fuse the mu|logvar head, precompute the weight-only decoder constants.
# ---------------------------------------------------------------------------
def pack_params(p, in_ch, L, latent_dim):
    f32 = jnp.float32
    assert in_ch * L == 128, "packing assumes C*L == 128 (ray config)"
    eye8 = jnp.eye(8, dtype=f32)

    # Encoder convs.
    a1 = jnp.kron(p["enc_w1"], eye8)                        # (in_ch*8, 128)
    rows = (jnp.arange(in_ch)[:, None] * L
            + jnp.arange(8)[None, :] * 8).reshape(-1)       # surviving inputs c*L + 8*q
    a1p = jnp.zeros((in_ch * L, 128), f32).at[rows].set(a1)
    a2 = jnp.kron(p["enc_w2"], eye8)                        # (128, 256)
    w_conv = jnp.concatenate([a1p, a2], axis=1)             # (128, 384)

    # All four GRU weight matrices in one slab.
    w_gru = jnp.concatenate([p["enc_gru_wih"], p["enc_gru_whh"],
                             p["dec_gru_wih"], p["dec_gru_whh"]], axis=0)  # (1024,768)

    # fc_mu | fc_logvar fused head, zero-padded to 64 output lanes.
    w_mlv = (jnp.zeros((RECURRENT, LD_PAD), f32)
             .at[:, :latent_dim].set(p["w_mu"])
             .at[:, latent_dim:2 * latent_dim].set(p["w_lv"]))
    b_mlv = (jnp.zeros((LD_PAD,), f32)
             .at[:latent_dim].set(p["b_mu"])
             .at[latent_dim:2 * latent_dim].set(p["b_lv"]))

    w_fc = p["dec_fc_w"]                                    # (latent, 256)

    # Decoder deconv weights/biases in one tiny slab.
    w_dec = jnp.zeros((16, 64), f32)
    w_dec = w_dec.at[:, 0:32].set(p["dec_dc_w1"].T)         # W1^T (16,32)
    w_dec = w_dec.at[:in_ch, 32:48].set(p["dec_dc_w2"].T)   # W2^T padded to 16 rows
    w_dec = w_dec.at[:, 48].set(p["dec_dc_b1"])             # b1
    w_dec = w_dec.at[:in_ch, 49].set(p["dec_dc_b2"])        # b2 padded

    # Precomputed weight-only decoder constants (phase-major filler):
    # phase 4 -> sigmoid(W2^T @ relu(b1) + b2); other phases -> sigmoid(b2).
    odd = jax.nn.sigmoid(p["dec_dc_w2"].T @ jnp.maximum(p["dec_dc_b1"], 0.0)
                         + p["dec_dc_b2"])                  # (in_ch,)
    fillv = jax.nn.sigmoid(p["dec_dc_b2"])                  # (in_ch,)
    phase4 = (jnp.arange(8) == 4)[None, :, None]
    filler = jnp.where(phase4, odd[:, None, None], fillv[:, None, None])
    filler = jnp.broadcast_to(filler, (in_ch, 8, N_FLATTEN)).astype(f32)

    # Single bias slab.
    biases = jnp.concatenate([
        jnp.repeat(p["enc_b1"], 8), jnp.repeat(p["enc_b2"], 8),
        p["enc_gru_bih"], p["enc_gru_bhh"],
        p["dec_fc_b"],
        p["dec_gru_bih"], p["dec_gru_bhh"],
        b_mlv,
    ])[None, :]
    assert biases.shape[1] == _BIAS_TOTAL
    return (w_conv, w_gru, w_mlv, w_fc, w_dec, filler, biases)


# ---------------------------------------------------------------------------
# Pure-JAX reference mirroring the PyTorch semantics (for correctness check).
# ---------------------------------------------------------------------------
def _deconv_scatter(vals, fill, stride):
    C, Lin = vals.shape
    fill_b = jnp.broadcast_to(fill[:, None, None], (C, Lin, stride - 1))
    stacked = jnp.concatenate([vals[:, :, None], fill_b], axis=2)
    return stacked.reshape(C, Lin * stride)[:, : (Lin - 1) * stride + 1]


def _gru_ref(xv, hv, wih, whh, bih, bhh):
    gi = xv @ wih + bih
    gh = hv @ whh + bhh
    H = hv.shape[1]
    r = jax.nn.sigmoid(gi[:, :H] + gh[:, :H])
    z = jax.nn.sigmoid(gi[:, H:2 * H] + gh[:, H:2 * H])
    n = jnp.tanh(gi[:, 2 * H:] + r * gh[:, 2 * H:])
    return (1.0 - z) * n + z * hv


def vae_forward_ref(params, x, h0, eps):
    B, Cin, L = x.shape
    xs = jnp.transpose(x[:, :, ::4], (0, 2, 1))
    y1 = jax.nn.relu(xs @ params["enc_w1"] + params["enc_b1"])[:, ::2, :]
    y2 = jax.nn.relu(y1 @ params["enc_w2"] + params["enc_b2"])
    feat = jnp.transpose(y2, (0, 2, 1)).reshape(B, -1)
    h_enc = _gru_ref(feat, h0[0], params["enc_gru_wih"], params["enc_gru_whh"],
                     params["enc_gru_bih"], params["enc_gru_bhh"])
    mu = h_enc @ params["w_mu"] + params["b_mu"]
    lv = h_enc @ params["w_lv"] + params["b_lv"]
    z = mu + jnp.exp(0.5 * lv) * eps
    d = z @ params["dec_fc_w"] + params["dec_fc_b"]
    h_dec = _gru_ref(d, h_enc, params["dec_gru_wih"], params["dec_gru_whh"],
                     params["dec_gru_bih"], params["dec_gru_bhh"])
    y_dc1 = jax.nn.relu(h_dec.T @ params["dec_dc_w1"] + params["dec_dc_b1"])
    out1 = _deconv_scatter(y_dc1.T, jnp.maximum(params["dec_dc_b1"], 0.0), 2)
    y_dc2 = jax.nn.sigmoid(out1.T @ params["dec_dc_w2"] + params["dec_dc_b2"])
    out = _deconv_scatter(y_dc2.T, jax.nn.sigmoid(params["dec_dc_b2"]), 4)
    return out, z, h_enc[None], mu, lv


# ---------------------------------------------------------------------------
# Deterministic synthetic parameters (PyTorch shapes, stored in (in, out)
# matmul layout).
# ---------------------------------------------------------------------------
def init_params(key, in_ch, latent_dim):
    ks = iter(jax.random.split(key, 24))

    def w(shape, fan_in):
        return jax.random.normal(next(ks), shape, jnp.float32) / jnp.sqrt(fan_in)

    def b(n):
        return 0.05 * jax.random.normal(next(ks), (n,), jnp.float32)

    p = {}
    p["enc_w1"], p["enc_b1"] = w((in_ch, 16), in_ch), b(16)
    p["enc_w2"], p["enc_b2"] = w((16, 32), 16), b(32)
    p["enc_gru_wih"] = w((N_FLATTEN, 3 * RECURRENT), N_FLATTEN)
    p["enc_gru_whh"] = w((RECURRENT, 3 * RECURRENT), RECURRENT)
    p["enc_gru_bih"] = jnp.zeros((3 * RECURRENT,), jnp.float32)
    p["enc_gru_bhh"] = jnp.zeros((3 * RECURRENT,), jnp.float32)
    p["w_mu"], p["b_mu"] = w((RECURRENT, latent_dim), RECURRENT), b(latent_dim)
    p["w_lv"], p["b_lv"] = w((RECURRENT, latent_dim), RECURRENT), b(latent_dim)
    p["dec_fc_w"], p["dec_fc_b"] = w((latent_dim, RECURRENT), latent_dim), b(RECURRENT)
    p["dec_gru_wih"] = w((RECURRENT, 3 * N_FLATTEN), RECURRENT)
    p["dec_gru_whh"] = w((N_FLATTEN, 3 * N_FLATTEN), N_FLATTEN)
    p["dec_gru_bih"] = b(3 * N_FLATTEN)
    p["dec_gru_bhh"] = b(3 * N_FLATTEN)
    p["dec_dc_w1"], p["dec_dc_b1"] = w((32, 16), 32), b(16)
    p["dec_dc_w2"], p["dec_dc_b2"] = w((16, in_ch), 16), b(in_ch)
    return p


# ---------------------------------------------------------------------------
if __name__ == "__main__":
    # modal="ray", observation_space=(C, L)=(2, 64) -> n_flatten = 32*8 = 256.
    # Batch MUST be 32 (see NOTE above).  T independent timesteps per call.
    T, B, C, L, LATENT = 2, 32, 2, 64, 16

    key = jax.random.PRNGKey(0)
    k_p, k_x, k_eps = jax.random.split(key, 3)
    params = init_params(k_p, C, LATENT)
    packed = pack_params(params, in_ch=C, L=L, latent_dim=LATENT)

    x = jax.random.normal(k_x, (T, B, C, L), jnp.float32)
    h0 = jnp.zeros((T, B, RECURRENT), jnp.float32)      # time_sequence=None -> zeros
    eps = jax.random.normal(k_eps, (T, B, LATENT), jnp.float32)

    fwd = jax.jit(vae_forward_seq)
    out, z, rec, mu, logvar = fwd(packed, x, h0, eps)
    jax.block_until_ready((out, z, rec, mu, logvar))

    assert out.shape == (T, C, OUT_LEN), out.shape
    assert z.shape == (T, B, LATENT) and mu.shape == (T, B, LATENT)
    assert logvar.shape == (T, B, LATENT)
    assert rec.shape == (T, 1, B, RECURRENT)

    # Correctness: per-step pure-JAX reference of the same (PyTorch) math.
    for t in range(T):
        ref = vae_forward_ref(params, x[t], h0[t][None], eps[t])
        got = (out[t], z[t], rec[t], mu[t], logvar[t])
        for g, want in zip(got, ref):
            assert jnp.allclose(g, want, atol=2e-3, rtol=2e-3), float(
                jnp.max(jnp.abs(g - want)))

    print("KERNEL_OK")
</pallas_src>

<mosaic_0001>
module attributes {stable_mosaic.version = 11 : i64} {
  func.func @_vae_fused_kernel(%arg0: i32, %arg1: memref<1x32x128xf32, #tpu.memory_space<vmem>>, %arg2: memref<1x32x16xf32, #tpu.memory_space<vmem>>, %arg3: memref<1x32x256xf32, #tpu.memory_space<vmem>>, %arg4: memref<128x384xf32, #tpu.memory_space<vmem>>, %arg5: memref<1024x768xf32, #tpu.memory_space<vmem>>, %arg6: memref<256x64xf32, #tpu.memory_space<vmem>>, %arg7: memref<16x256xf32, #tpu.memory_space<vmem>>, %arg8: memref<16x64xf32, #tpu.memory_space<vmem>>, %arg9: memref<2x8x256xf32, #tpu.memory_space<vmem>>, %arg10: memref<1x3776xf32, #tpu.memory_space<vmem>>, %arg11: memref<1x2x8x256xf32, #tpu.memory_space<vmem>>, %arg12: memref<1x32x320xf32, #tpu.memory_space<vmem>>) attributes {dimension_semantics = [#tpu.dimension_semantics<parallel>], iteration_bounds = array<i64: 2>, scalar_prefetch = 0 : i64, scratch_operands = 0 : i64, tpu.core_type = #tpu.core_type<tc>, window_params = [{transform_indices = @transform_0, window_bounds = array<i64: 1, 32, 128>}, {transform_indices = @transform_1, window_bounds = array<i64: 1, 32, 16>}, {transform_indices = @transform_2, window_bounds = array<i64: 1, 32, 256>}, {pipeline_mode = #tpu.pipeline_mode<synchronous>, transform_indices = @transform_3, window_bounds = array<i64: 128, 384>}, {pipeline_mode = #tpu.pipeline_mode<synchronous>, transform_indices = @transform_4, window_bounds = array<i64: 1024, 768>}, {pipeline_mode = #tpu.pipeline_mode<synchronous>, transform_indices = @transform_5, window_bounds = array<i64: 256, 64>}, {pipeline_mode = #tpu.pipeline_mode<synchronous>, transform_indices = @transform_6, window_bounds = array<i64: 16, 256>}, {pipeline_mode = #tpu.pipeline_mode<synchronous>, transform_indices = @transform_7, window_bounds = array<i64: 16, 64>}, {pipeline_mode = #tpu.pipeline_mode<synchronous>, transform_indices = @transform_8, window_bounds = array<i64: 2, 8, 256>}, {pipeline_mode = #tpu.pipeline_mode<synchronous>, transform_indices = @transform_9, window_bounds = array<i64: 1, 3776>}, {transform_indices = @transform_10, window_bounds = array<i64: 1, 2, 8, 256>}, {transform_indices = @transform_11, window_bounds = array<i64: 1, 32, 320>}]} {
    %c0 = arith.constant 0 : index
    %c0_0 = arith.constant 0 : index
    %c0_1 = arith.constant 0 : index
    %0 = vector.load %arg1[%c0, %c0_0, %c0_1] : memref<1x32x128xf32, #tpu.memory_space<vmem>>, vector<1x32x128xf32>
    %1 = vector.shape_cast %0 : vector<1x32x128xf32> to vector<32x128xf32>
    %c0_2 = arith.constant 0 : index
    %c0_3 = arith.constant 0 : index
    %2 = vector.load %arg4[%c0_2, %c0_3] : memref<128x384xf32, #tpu.memory_space<vmem>>, vector<128x128xf32>
    %cst = arith.constant dense<0.000000e+00> : vector<32x128xf32>
    %3 = tpu.matmul %1, %2, %cst {dimension_numbers = #tpu.dot_dimension_numbers<[1], [0], [0], [1], [0, 0, 1, 1], [], []>} : vector<32x128xf32>, vector<128x128xf32>, vector<32x128xf32> -> vector<32x128xf32>
    %c0_4 = arith.constant 0 : index
    %c0_5 = arith.constant 0 : index
    %4 = vector.load %arg10[%c0_4, %c0_5] : memref<1x3776xf32, #tpu.memory_space<vmem>>, vector<1x128xf32>
    %5 = vector.broadcast %4 : vector<1x128xf32> to vector<32x128xf32>
    %6 = arith.addf %3, %5 : vector<32x128xf32>
    %cst_6 = arith.constant 0.000000e+00 : f32
    %7 = vector.broadcast %cst_6 : f32 to vector<32x128xf32>
    %8 = arith.maximumf %6, %7 : vector<32x128xf32>
    %c0_7 = arith.constant 0 : index
    %c128 = arith.constant 128 : index
    %9 = vector.load %arg4[%c0_7, %c128] : memref<128x384xf32, #tpu.memory_space<vmem>>, vector<128x256xf32>
    %cst_8 = arith.constant dense<0.000000e+00> : vector<32x256xf32>
    %10 = tpu.matmul %8, %9, %cst_8 {dimension_numbers = #tpu.dot_dimension_numbers<[1], [0], [0], [1], [0, 0, 1, 1], [], []>} : vector<32x128xf32>, vector<128x256xf32>, vector<32x256xf32> -> vector<32x256xf32>
    %c0_9 = arith.constant 0 : index
    %c128_10 = arith.constant 128 : index
    %11 = vector.load %arg10[%c0_9, %c128_10] : memref<1x3776xf32, #tpu.memory_space<vmem>>, vector<1x256xf32>
    %12 = vector.broadcast %11 : vector<1x256xf32> to vector<32x256xf32>
    %13 = arith.addf %10, %12 : vector<32x256xf32>
    %cst_11 = arith.constant 0.000000e+00 : f32
    %14 = vector.broadcast %cst_11 : f32 to vector<32x256xf32>
    %15 = arith.maximumf %13, %14 : vector<32x256xf32>
    %c0_12 = arith.constant 0 : index
    %c0_13 = arith.constant 0 : index
    %c0_14 = arith.constant 0 : index
    %16 = vector.load %arg3[%c0_12, %c0_13, %c0_14] : memref<1x32x256xf32, #tpu.memory_space<vmem>>, vector<1x32x256xf32>
    %17 = vector.shape_cast %16 : vector<1x32x256xf32> to vector<32x256xf32>
    %c0_15 = arith.constant 0 : index
    %c384 = arith.constant 384 : index
    %18 = vector.load %arg10[%c0_15, %c384] : memref<1x3776xf32, #tpu.memory_space<vmem>>, vector<1x768xf32>
    %c0_16 = arith.constant 0 : index
    %c1152 = arith.constant 1152 : index
    %19 = vector.load %arg10[%c0_16, %c1152] : memref<1x3776xf32, #tpu.memory_space<vmem>>, vector<1x768xf32>
    %c0_17 = arith.constant 0 : index
    %c0_18 = arith.constant 0 : index
    %20 = vector.load %arg5[%c0_17, %c0_18] : memref<1024x768xf32, #tpu.memory_space<vmem>>, vector<256x768xf32>
    %cst_19 = arith.constant dense<0.000000e+00> : vector<32x768xf32>
    %21 = tpu.matmul %15, %20, %cst_19 {dimension_numbers = #tpu.dot_dimension_numbers<[1], [0], [0], [1], [0, 0, 1, 1], [], []>} : vector<32x256xf32>, vector<256x768xf32>, vector<32x768xf32> -> vector<32x768xf32>
    %22 = vector.broadcast %18 : vector<1x768xf32> to vector<32x768xf32>
    %23 = arith.addf %21, %22 : vector<32x768xf32>
    %c256 = arith.constant 256 : index
    %c0_20 = arith.constant 0 : index
    %24 = vector.load %arg5[%c256, %c0_20] : memref<1024x768xf32, #tpu.memory_space<vmem>>, vector<256x768xf32>
    %cst_21 = arith.constant dense<0.000000e+00> : vector<32x768xf32>
    %25 = tpu.matmul %17, %24, %cst_21 {dimension_numbers = #tpu.dot_dimension_numbers<[1], [0], [0], [1], [0, 0, 1, 1], [], []>} : vector<32x256xf32>, vector<256x768xf32>, vector<32x768xf32> -> vector<32x768xf32>
    %26 = vector.broadcast %19 : vector<1x768xf32> to vector<32x768xf32>
    %27 = arith.addf %25, %26 : vector<32x768xf32>
    %28 = vector.extract_strided_slice %23 {offsets = [0, 0], sizes = [32, 256], strides = [1, 1]} : vector<32x768xf32> to vector<32x256xf32>
    %29 = vector.extract_strided_slice %27 {offsets = [0, 0], sizes = [32, 256], strides = [1, 1]} : vector<32x768xf32> to vector<32x256xf32>
    %30 = arith.addf %28, %29 : vector<32x256xf32>
    %31 = arith.negf %30 : vector<32x256xf32>
    %32 = math.exp %31 : vector<32x256xf32>
    %cst_22 = arith.constant 1.000000e+00 : f32
    %33 = vector.broadcast %cst_22 : f32 to vector<32x256xf32>
    %34 = arith.addf %33, %32 : vector<32x256xf32>
    %35 = arith.divf %33, %34 : vector<32x256xf32>
    %36 = vector.extract_strided_slice %23 {offsets = [0, 256], sizes = [32, 256], strides = [1, 1]} : vector<32x768xf32> to vector<32x256xf32>
    %37 = vector.extract_strided_slice %27 {offsets = [0, 256], sizes = [32, 256], strides = [1, 1]} : vector<32x768xf32> to vector<32x256xf32>
    %38 = arith.addf %36, %37 : vector<32x256xf32>
    %39 = arith.negf %38 : vector<32x256xf32>
    %40 = math.exp %39 : vector<32x256xf32>
    %cst_23 = arith.constant 1.000000e+00 : f32
    %41 = vector.broadcast %cst_23 : f32 to vector<32x256xf32>
    %42 = arith.addf %41, %40 : vector<32x256xf32>
    %43 = arith.divf %41, %42 : vector<32x256xf32>
    %44 = vector.extract_strided_slice %23 {offsets = [0, 512], sizes = [32, 256], strides = [1, 1]} : vector<32x768xf32> to vector<32x256xf32>
    %45 = vector.extract_strided_slice %27 {offsets = [0, 512], sizes = [32, 256], strides = [1, 1]} : vector<32x768xf32> to vector<32x256xf32>
    %46 = arith.mulf %35, %45 : vector<32x256xf32>
    %47 = arith.addf %44, %46 : vector<32x256xf32>
    %48 = math.tanh %47 : vector<32x256xf32>
    %cst_24 = arith.constant 1.000000e+00 : f32
    %49 = vector.broadcast %cst_24 : f32 to vector<32x256xf32>
    %50 = arith.subf %49, %43 : vector<32x256xf32>
    %51 = arith.mulf %50, %48 : vector<32x256xf32>
    %52 = arith.mulf %43, %17 : vector<32x256xf32>
    %53 = arith.addf %51, %52 : vector<32x256xf32>
    %c0_25 = arith.constant 0 : index
    %c0_26 = arith.constant 0 : index
    %54 = vector.load %arg6[%c0_25, %c0_26] : memref<256x64xf32, #tpu.memory_space<vmem>>, vector<256x64xf32>
    %cst_27 = arith.constant dense<0.000000e+00> : vector<32x64xf32>
    %55 = tpu.matmul %53, %54, %cst_27 {dimension_numbers = #tpu.dot_dimension_numbers<[1], [0], [0], [1], [0, 0, 1, 1], [], []>} : vector<32x256xf32>, vector<256x64xf32>, vector<32x64xf32> -> vector<32x64xf32>
    %c0_28 = arith.constant 0 : index
    %c3712 = arith.constant 3712 : index
    %56 = vector.load %arg10[%c0_28, %c3712] : memref<1x3776xf32, #tpu.memory_space<vmem>>, vector<1x64xf32>
    %57 = vector.broadcast %56 : vector<1x64xf32> to vector<32x64xf32>
    %58 = arith.addf %55, %57 : vector<32x64xf32>
    %59 = vector.extract_strided_slice %58 {offsets = [0, 0], sizes = [32, 16], strides = [1, 1]} : vector<32x64xf32> to vector<32x16xf32>
    %60 = vector.extract_strided_slice %58 {offsets = [0, 16], sizes = [32, 16], strides = [1, 1]} : vector<32x64xf32> to vector<32x16xf32>
    %cst_29 = arith.constant 5.000000e-01 : f32
    %61 = vector.broadcast %cst_29 : f32 to vector<32x16xf32>
    %62 = arith.mulf %61, %60 : vector<32x16xf32>
    %63 = math.exp %62 : vector<32x16xf32>
    %c0_30 = arith.constant 0 : index
    %c0_31 = arith.constant 0 : index
    %c0_32 = arith.constant 0 : index
    %64 = vector.load %arg2[%c0_30, %c0_31, %c0_32] : memref<1x32x16xf32, #tpu.memory_space<vmem>>, vector<1x32x16xf32>
    %65 = vector.shape_cast %64 : vector<1x32x16xf32> to vector<32x16xf32>
    %66 = arith.mulf %63, %65 : vector<32x16xf32>
    %67 = arith.addf %59, %66 : vector<32x16xf32>
    %c0_33 = arith.constant 0 : index
    %c0_34 = arith.constant 0 : index
    %c0_35 = arith.constant 0 : index
    %68 = vector.load %arg12[%c0_33, %c0_34, %c0_35] : memref<1x32x320xf32, #tpu.memory_space<vmem>>, vector<1x32x256xf32>
    %69 = vector.shape_cast %68 : vector<1x32x256xf32> to vector<32x256xf32>
    %70 = vector.shape_cast %53 : vector<32x256xf32> to vector<1x32x256xf32>
    tpu.vector_store %arg12[%c0_33, %c0_34, %c0_35], %70 {strides = array<i32>} : memref<1x32x320xf32, #tpu.memory_space<vmem>>, vector<1x32x256xf32>,
    %c0_36 = arith.constant 0 : index
    %c0_37 = arith.constant 0 : index
    %c256_38 = arith.constant 256 : index
    %71 = vector.load %arg12[%c0_36, %c0_37, %c256_38] : memref<1x32x320xf32, #tpu.memory_space<vmem>>, vector<1x32x64xf32>
    %72 = vector.shape_cast %71 : vector<1x32x64xf32> to vector<32x64xf32>
    %73 = vector.shape_cast %58 : vector<32x64xf32> to vector<1x32x64xf32>
    tpu.vector_store %arg12[%c0_36, %c0_37, %c256_38], %73 {strides = array<i32>} : memref<1x32x320xf32, #tpu.memory_space<vmem>>, vector<1x32x64xf32>,
    %c0_39 = arith.constant 0 : index
    %c0_40 = arith.constant 0 : index
    %c288 = arith.constant 288 : index
    %74 = vector.load %arg12[%c0_39, %c0_40, %c288] : memref<1x32x320xf32, #tpu.memory_space<vmem>>, vector<1x32x16xf32>
    %75 = vector.shape_cast %74 : vector<1x32x16xf32> to vector<32x16xf32>
    %76 = vector.shape_cast %67 : vector<32x16xf32> to vector<1x32x16xf32>
    tpu.vector_store %arg12[%c0_39, %c0_40, %c288], %76 {strides = array<i32>} : memref<1x32x320xf32, #tpu.memory_space<vmem>>, vector<1x32x16xf32>,
    %c0_41 = arith.constant 0 : index
    %c0_42 = arith.constant 0 : index
    %77 = vector.load %arg7[%c0_41, %c0_42] : memref<16x256xf32, #tpu.memory_space<vmem>>, vector<16x256xf32>
    %cst_43 = arith.constant dense<0.000000e+00> : vector<32x256xf32>
    %78 = tpu.matmul %67, %77, %cst_43 {dimension_numbers = #tpu.dot_dimension_numbers<[1], [0], [0], [1], [0, 0, 1, 1], [], []>} : vector<32x16xf32>, vector<16x256xf32>, vector<32x256xf32> -> vector<32x256xf32>
    %c0_44 = arith.constant 0 : index
    %c1920 = arith.constant 1920 : index
    %79 = vector.load %arg10[%c0_44, %c1920] : memref<1x3776xf32, #tpu.memory_space<vmem>>, vector<1x256xf32>
    %80 = vector.broadcast %79 : vector<1x256xf32> to vector<32x256xf32>
    %81 = arith.addf %78, %80 : vector<32x256xf32>
    %c0_45 = arith.constant 0 : index
    %c2176 = arith.constant 2176 : index
    %82 = vector.load %arg10[%c0_45, %c2176] : memref<1x3776xf32, #tpu.memory_space<vmem>>, vector<1x768xf32>
    %c0_46 = arith.constant 0 : index
    %c2944 = arith.constant 2944 : index
    %83 = vector.load %arg10[%c0_46, %c2944] : memref<1x3776xf32, #tpu.memory_space<vmem>>, vector<1x768xf32>
    %c512 = arith.constant 512 : index
    %c0_47 = arith.constant 0 : index
    %84 = vector.load %arg5[%c512, %c0_47] : memref<1024x768xf32, #tpu.memory_space<vmem>>, vector<256x768xf32>
    %cst_48 = arith.constant dense<0.000000e+00> : vector<32x768xf32>
    %85 = tpu.matmul %81, %84, %cst_48 {dimension_numbers = #tpu.dot_dimension_numbers<[1], [0], [0], [1], [0, 0, 1, 1], [], []>} : vector<32x256xf32>, vector<256x768xf32>, vector<32x768xf32> -> vector<32x768xf32>
    %86 = vector.broadcast %82 : vector<1x768xf32> to vector<32x768xf32>
    %87 = arith.addf %85, %86 : vector<32x768xf32>
    %c768 = arith.constant 768 : index
    %c0_49 = arith.constant 0 : index
    %88 = vector.load %arg5[%c768, %c0_49] : memref<1024x768xf32, #tpu.memory_space<vmem>>, vector<256x768xf32>
    %cst_50 = arith.constant dense<0.000000e+00> : vector<32x768xf32>
    %89 = tpu.matmul %53, %88, %cst_50 {dimension_numbers = #tpu.dot_dimension_numbers<[1], [0], [0], [1], [0, 0, 1, 1], [], []>} : vector<32x256xf32>, vector<256x768xf32>, vector<32x768xf32> -> vector<32x768xf32>
    %90 = vector.broadcast %83 : vector<1x768xf32> to vector<32x768xf32>
    %91 = arith.addf %89, %90 : vector<32x768xf32>
    %92 = vector.extract_strided_slice %87 {offsets = [0, 0], sizes = [32, 256], strides = [1, 1]} : vector<32x768xf32> to vector<32x256xf32>
    %93 = vector.extract_strided_slice %91 {offsets = [0, 0], sizes = [32, 256], strides = [1, 1]} : vector<32x768xf32> to vector<32x256xf32>
    %94 = arith.addf %92, %93 : vector<32x256xf32>
    %95 = arith.negf %94 : vector<32x256xf32>
    %96 = math.exp %95 : vector<32x256xf32>
    %cst_51 = arith.constant 1.000000e+00 : f32
    %97 = vector.broadcast %cst_51 : f32 to vector<32x256xf32>
    %98 = arith.addf %97, %96 : vector<32x256xf32>
    %99 = arith.divf %97, %98 : vector<32x256xf32>
    %100 = vector.extract_strided_slice %87 {offsets = [0, 256], sizes = [32, 256], strides = [1, 1]} : vector<32x768xf32> to vector<32x256xf32>
    %101 = vector.extract_strided_slice %91 {offsets = [0, 256], sizes = [32, 256], strides = [1, 1]} : vector<32x768xf32> to vector<32x256xf32>
    %102 = arith.addf %100, %101 : vector<32x256xf32>
    %103 = arith.negf %102 : vector<32x256xf32>
    %104 = math.exp %103 : vector<32x256xf32>
    %cst_52 = arith.constant 1.000000e+00 : f32
    %105 = vector.broadcast %cst_52 : f32 to vector<32x256xf32>
    %106 = arith.addf %105, %104 : vector<32x256xf32>
    %107 = arith.divf %105, %106 : vector<32x256xf32>
    %108 = vector.extract_strided_slice %87 {offsets = [0, 512], sizes = [32, 256], strides = [1, 1]} : vector<32x768xf32> to vector<32x256xf32>
    %109 = vector.extract_strided_slice %91 {offsets = [0, 512], sizes = [32, 256], strides = [1, 1]} : vector<32x768xf32> to vector<32x256xf32>
    %110 = arith.mulf %99, %109 : vector<32x256xf32>
    %111 = arith.addf %108, %110 : vector<32x256xf32>
    %112 = math.tanh %111 : vector<32x256xf32>
    %cst_53 = arith.constant 1.000000e+00 : f32
    %113 = vector.broadcast %cst_53 : f32 to vector<32x256xf32>
    %114 = arith.subf %113, %107 : vector<32x256xf32>
    %115 = arith.mulf %114, %112 : vector<32x256xf32>
    %116 = arith.mulf %107, %53 : vector<32x256xf32>
    %117 = arith.addf %115, %116 : vector<32x256xf32>
    %c0_54 = arith.constant 0 : index
    %c0_55 = arith.constant 0 : index
    %118 = vector.load %arg8[%c0_54, %c0_55] : memref<16x64xf32, #tpu.memory_space<vmem>>, vector<16x32xf32>
    %cst_56 = arith.constant dense<0.000000e+00> : vector<16x256xf32>
    %119 = tpu.matmul %118, %117, %cst_56 {dimension_numbers = #tpu.dot_dimension_numbers<[1], [0], [0], [1], [0, 0, 1, 1], [], []>} : vector<16x32xf32>, vector<32x256xf32>, vector<16x256xf32> -> vector<16x256xf32>
    %c0_57 = arith.constant 0 : index
    %c48 = arith.constant 48 : index
    %120 = vector.load %arg8[%c0_57, %c48] : memref<16x64xf32, #tpu.memory_space<vmem>>, vector<16x1xf32>
    %121 = vector.broadcast %120 : vector<16x1xf32> to vector<16x256xf32>
    %122 = arith.addf %119, %121 : vector<16x256xf32>
    %cst_58 = arith.constant 0.000000e+00 : f32
    %123 = vector.broadcast %cst_58 : f32 to vector<16x256xf32>
    %124 = arith.maximumf %122, %123 : vector<16x256xf32>
    %c0_59 = arith.constant 0 : index
    %c32 = arith.constant 32 : index
    %125 = vector.load %arg8[%c0_59, %c32] : memref<16x64xf32, #tpu.memory_space<vmem>>, vector<16x16xf32>
    %cst_60 = arith.constant dense<0.000000e+00> : vector<16x256xf32>
    %126 = tpu.matmul %125, %124, %cst_60 {dimension_numbers = #tpu.dot_dimension_numbers<[1], [0], [0], [1], [0, 0, 1, 1], [], []>} : vector<16x16xf32>, vector<16x256xf32>, vector<16x256xf32> -> vector<16x256xf32>
    %c0_61 = arith.constant 0 : index
    %c49 = arith.constant 49 : index
    %127 = vector.load %arg8[%c0_61, %c49] : memref<16x64xf32, #tpu.memory_space<vmem>>, vector<16x1xf32>
    %128 = vector.broadcast %127 : vector<16x1xf32> to vector<16x256xf32>
    %129 = arith.addf %126, %128 : vector<16x256xf32>
    %130 = arith.negf %129 : vector<16x256xf32>
    %131 = math.exp %130 : vector<16x256xf32>
    %cst_62 = arith.constant 1.000000e+00 : f32
    %132 = vector.broadcast %cst_62 : f32 to vector<16x256xf32>
    %133 = arith.addf %132, %131 : vector<16x256xf32>
    %134 = arith.divf %132, %133 : vector<16x256xf32>
    %c0_63 = arith.constant 0 : index
    %c0_64 = arith.constant 0 : index
    %c0_65 = arith.constant 0 : index
    %135 = vector.load %arg9[%c0_63, %c0_64, %c0_65] : memref<2x8x256xf32, #tpu.memory_space<vmem>>, vector<2x8x256xf32>
    %c0_66 = arith.constant 0 : index
    %c0_67 = arith.constant 0 : index
    %c0_68 = arith.constant 0 : index
    %c0_69 = arith.constant 0 : index
    %136 = vector.load %arg11[%c0_66, %c0_67, %c0_68, %c0_69] : memref<1x2x8x256xf32, #tpu.memory_space<vmem>>, vector<1x2x8x256xf32>
    %137 = vector.shape_cast %136 : vector<1x2x8x256xf32> to vector<2x8x256xf32>
    %138 = vector.shape_cast %135 : vector<2x8x256xf32> to vector<1x2x8x256xf32>
    tpu.vector_store %arg11[%c0_66, %c0_67, %c0_68, %c0_69], %138 {strides = array<i32>} : memref<1x2x8x256xf32, #tpu.memory_space<vmem>>, vector<1x2x8x256xf32>,
    %139 = vector.extract_strided_slice %134 {offsets = [0, 0], sizes = [2, 256], strides = [1, 1]} : vector<16x256xf32> to vector<2x256xf32>
    %c0_70 = arith.constant 0 : index
    %c0_71 = arith.constant 0 : index
    %c0_72 = arith.constant 0 : index
    %c0_73 = arith.constant 0 : index
    %140 = vector.load %arg11[%c0_70, %c0_71, %c0_72, %c0_73] : memref<1x2x8x256xf32, #tpu.memory_space<vmem>>, vector<1x2x1x256xf32>
    %141 = vector.shape_cast %140 : vector<1x2x1x256xf32> to vector<2x256xf32>
    %142 = vector.shape_cast %139 : vector<2x256xf32> to vector<1x2x1x256xf32>
    tpu.vector_store %arg11[%c0_70, %c0_71, %c0_72, %c0_73], %142 {strides = array<i32>} : memref<1x2x8x256xf32, #tpu.memory_space<vmem>>, vector<1x2x1x256xf32>,
    return
  }
  func.func @transform_0(%arg0: i32) -> (i32, i32, i32) {
    %c0_i32 = arith.constant 0 : i32
    %c0_i32_0 = arith.constant 0 : i32
    %c0_i32_1 = arith.constant 0 : i32
    return %arg0, %c0_i32, %c0_i32_0 : i32, i32, i32
  }
  func.func @transform_1(%arg0: i32) -> (i32, i32, i32) {
    %c0_i32 = arith.constant 0 : i32
    %c0_i32_0 = arith.constant 0 : i32
    %c0_i32_1 = arith.constant 0 : i32
    return %arg0, %c0_i32, %c0_i32_0 : i32, i32, i32
  }
  func.func @transform_2(%arg0: i32) -> (i32, i32, i32) {
    %c0_i32 = arith.constant 0 : i32
    %c0_i32_0 = arith.constant 0 : i32
    %c0_i32_1 = arith.constant 0 : i32
    return %arg0, %c0_i32, %c0_i32_0 : i32, i32, i32
  }
  func.func @transform_3(%arg0: i32) -> (i32, i32) {
    %c0_i32 = arith.constant 0 : i32
    %c0_i32_0 = arith.constant 0 : i32
    %c0_i32_1 = arith.constant 0 : i32
    return %c0_i32, %c0_i32_0 : i32, i32
  }
  func.func @transform_4(%arg0: i32) -> (i32, i32) {
    %c0_i32 = arith.constant 0 : i32
    %c0_i32_0 = arith.constant 0 : i32
    %c0_i32_1 = arith.constant 0 : i32
    return %c0_i32, %c0_i32_0 : i32, i32
  }
  func.func @transform_5(%arg0: i32) -> (i32, i32) {
    %c0_i32 = arith.constant 0 : i32
    %c0_i32_0 = arith.constant 0 : i32
    %c0_i32_1 = arith.constant 0 : i32
    return %c0_i32, %c0_i32_0 : i32, i32
  }
  func.func @transform_6(%arg0: i32) -> (i32, i32) {
    %c0_i32 = arith.constant 0 : i32
    %c0_i32_0 = arith.constant 0 : i32
    %c0_i32_1 = arith.constant 0 : i32
    return %c0_i32, %c0_i32_0 : i32, i32
  }
  func.func @transform_7(%arg0: i32) -> (i32, i32) {
    %c0_i32 = arith.constant 0 : i32
    %c0_i32_0 = arith.constant 0 : i32
    %c0_i32_1 = arith.constant 0 : i32
    return %c0_i32, %c0_i32_0 : i32, i32
  }
  func.func @transform_8(%arg0: i32) -> (i32, i32, i32) {
    %c0_i32 = arith.constant 0 : i32
    %c0_i32_0 = arith.constant 0 : i32
    %c0_i32_1 = arith.constant 0 : i32
    %c0_i32_2 = arith.constant 0 : i32
    return %c0_i32, %c0_i32_0, %c0_i32_1 : i32, i32, i32
  }
  func.func @transform_9(%arg0: i32) -> (i32, i32) {
    %c0_i32 = arith.constant 0 : i32
    %c0_i32_0 = arith.constant 0 : i32
    %c0_i32_1 = arith.constant 0 : i32
    return %c0_i32, %c0_i32_0 : i32, i32
  }
  func.func @transform_10(%arg0: i32) -> (i32, i32, i32, i32) {
    %c0_i32 = arith.constant 0 : i32
    %c0_i32_0 = arith.constant 0 : i32
    %c0_i32_1 = arith.constant 0 : i32
    %c0_i32_2 = arith.constant 0 : i32
    return %arg0, %c0_i32, %c0_i32_0, %c0_i32_1 : i32, i32, i32, i32
  }
  func.func @transform_11(%arg0: i32) -> (i32, i32, i32) {
    %c0_i32 = arith.constant 0 : i32
    %c0_i32_0 = arith.constant 0 : i32
    %c0_i32_1 = arith.constant 0 : i32
    return %arg0, %c0_i32, %c0_i32_0 : i32, i32, i32
  }
}

</mosaic_0001>

<bundles_post_ra>
// kernel: vae_forward_seq.1
= control target key start
LH: loop header
LB: loop body
LE: loop exit
PB: predicated region body
PF: predicated region fallthrough
CT: control target
= control target key end

     0   :  { %s6609_s0 = inlined_call_operand.vmem [shape: f32[2,32,128], index: 0, kind: input, shape index: {}]   ;;  %s6610_s1 = inlined_call_operand.vmem [shape: f32[2,32,16], index: 1, kind: input, shape index: {}]   ;;  %s6611_s2 = inlined_call_operand.hbm [shape: f32[2,32,256], index: 2, kind: input, shape index: {}]   ;;  %s6612_s3 = inlined_call_operand.hbm [shape: f32[128,384], index: 3, kind: input, shape index: {}]   ;;  %s6613_s4 = inlined_call_operand.hbm [shape: f32[1024,768], index: 4, kind: input, shape index: {}]   ;;  %s6614_s5 = inlined_call_operand.vmem [shape: f32[256,64], index: 5, kind: input, shape index: {}]   ;;  %s6615_s6 = inlined_call_operand.hbm [shape: f32[16,256], index: 6, kind: input, shape index: {}]   ;;  %s6616_s7 = inlined_call_operand.hbm [shape: f32[16,64], index: 7, kind: input, shape index: {}]   ;;  %s6617_s8 = inlined_call_operand.hbm [shape: f32[2,8,256], index: 8, kind: input, shape index: {}]   ;;  %s6618_s9 = inlined_call_operand.hbm [shape: f32[1,3776], index: 9, kind: input, shape index: {}]   ;;  %s6619_s10 = inlined_call_operand.vmem [shape: f32[2,2,8,256], index: 10, kind: output, shape index: {0}]   ;;  %s6620_s11 = inlined_call_operand.vmem [shape: f32[2,32,320], index: 11, kind: output, shape index: {1}]  }
   0x1   :  { %6626 = sst [smem:[#allocation17_spill]] %s6610_s1 }
   0x2   :  { %6627 = sst [smem:[#allocation18_spill]] %s6614_s5 }
   0x3   :  { %6628 = sst [smem:[#allocation19_spill]] %s6620_s11 }
   0x4   :  { %17 = vsyncpa [#allocation3], 0 }
   0x5   :  { %19 = vsyncpa [#allocation3 + $0x1], 0 }
   0x6   :  { %20 = vsyncpa [#allocation5], 0 }
   0x7   :  { %21 = vsyncpa [#allocation8], 0 }
   0x8   :  { %22 = vsyncpa [#allocation11], 0  ;;  %s5664_s17 = smov 0   ;;  %s5666_s18 = smov 0  }
   0x9   :  { %s5668_s19 = smov 0   ;;  %s5670_s20 = smov 0  }
   0xa LB: > { %s5581_s21 = smov [#allocation4]   ;;  %s5685_s23 = sadd.s32 4294967295, %s5579_s20   ;;  %s5579_s20 = sphi %s5670_s20, %s6650_s20   ;;  %s5575_s19 = sphi %s5668_s19, %s6649_s19   ;;  %s5571_s18 = sphi %s5666_s18, %s6648_s18   ;;  %s5567_s17 = sphi %s5664_s17, %s6647_s17  }
   0xb   : > { %s322_s22 = sshll.u32 %s5581_s21, 4  ;;  %p3864_p0 = scmp.ge.s32.totalorder %s5579_s20, 1  ;;  %s5690_s22 = int_to_ptr.vmem [resolvable:$true] %s322_s22 }
   0xc   : > { %p6622_p1 = scmp.eq.s32.totalorder %s5685_s23, 0  ;;  %p310_p2 = scmp.lt.s32.totalorder %s5579_s20, 3 }
   0xd   : > { %s5582_s25 = smov [#allocation7]   ;;  %s5583_s28 = smov [#allocation10]  }
   0xe   : > { %p5692_p3 = pnand %p3864_p0, %p310_p2  ;;  %s351_s26 = sshll.u32 %s5582_s25, 4  ;;  %s5704_s26 = int_to_ptr.vmem [resolvable:$true] %s351_s26 }
   0xf   : > { %s5706_s29 = sshll.u32 %s5583_s28, 4  ;;  %s5335_s13 = scalar_lea.hbm %s6612_s3, 6144  ;;  %s378_s29 = int_to_ptr.vmem [resolvable:$true] %s5706_s29 }
  0x10   : > { %s6629_s24 = scalar_select %p5692_p3, 1, 0 }
  0x11   : > { %p5046_p4 = pneg %p5692_p3  ;;  %p5336_p6 = scmp.ne.s32.totalorder %s6612_s3, %s5335_s13 }
  0x12   : > { %p5342_p10 = scmp.lt.u32.totalorder %s5335_s13, %s6612_s3 }
  0x13   : > { %p5700_p5 = pnand %p5046_p4, %p6622_p1 }
  0x15   : > { %p5716_p7 = pneg %p5700_p5 }
  0x17   : > { %p5338_p8 = pnand %p5716_p7, %p5336_p6 }
  0x19   : > { %p5339_p9 = pneg %p5338_p8 }
  0x1b   : > { %p5344_p11 = pnand %p5342_p10, %p5339_p9 }
  0x1d   : > { %5347 = shalt.err (!%p5344_p11)
}
  0x1e   : > { %s5348_s28 = scalar_lea.vmem %s5690_s22, 6144  ;;  %p5356_p2 = scmp.lt.s32.totalorder %s5690_s22, %s5690_s22 }
  0x1f   : > { %p5349_p12 = scmp.ne.s32.totalorder %s5690_s22, %s5348_s28  ;;  %p5357_p4 = scmp.lt.s32.totalorder %s5348_s28, %s5348_s28 }
  0x21   : > { %p5351_p13 = pnand %p5349_p12, %p5716_p7  ;;  %p5358_p6 = por %p5357_p4, %p5356_p2 }
  0x23   : > { %p5352_p0 = pneg %p5351_p13 }
  0x25   : > { %p5359_p8 = pnand %p5358_p6, %p5352_p0 }
  0x27   : > { %5362 = shalt.err (!%p5359_p8)
}
  0x28   : > { %s5584_s30 = smov 384   ;;  %s5585_s12 = smov 24  }
  0x29   : > { %5049 = dma.hbm_to_vmem [thread:$0]  (!%p5700_p5), %s6612_s3, 6144, %s5690_s22, [#allocation5], %s5584_s30, %s5584_s30, %s5585_s12  }
  0x2a   : > { %s5363_s25 = scalar_lea.hbm %s6615_s6, 512 }
  0x2b   : > { %p5364_p9 = scmp.ne.s32.totalorder %s6615_s6, %s5363_s25  ;;  %p5370_p12 = scmp.lt.u32.totalorder %s5363_s25, %s6615_s6 }
  0x2d   : > { %p5366_p10 = pnand %p5364_p9, %p5716_p7 }
  0x2f   : > { %p5367_p11 = pneg %p5366_p10 }
  0x31   : > { %p5372_p13 = pnand %p5370_p12, %p5367_p11 }
  0x33   : > { %5375 = shalt.err (!%p5372_p13)
}
  0x34   : > { %s5376_s22 = scalar_lea.vmem %s5704_s26, 512  ;;  %p5384_p6 = scmp.lt.s32.totalorder %s5704_s26, %s5704_s26 }
  0x35   : > { %p5377_p0 = scmp.ne.s32.totalorder %s5704_s26, %s5376_s22  ;;  %p5385_p8 = scmp.lt.s32.totalorder %s5376_s22, %s5376_s22 }
  0x37   : > { %p5379_p2 = pnand %p5377_p0, %p5716_p7  ;;  %p5386_p9 = por %p5385_p8, %p5384_p6 }
  0x39   : > { %p5380_p4 = pneg %p5379_p2 }
  0x3b   : > { %p5387_p10 = pnand %p5386_p9, %p5380_p4 }
  0x3d   : > { %5390 = shalt.err (!%p5387_p10)
}
  0x3e   : > { %s6624_s1 = smov 256   ;;  %s6625_s5 = smov 16  }
  0x3f   : > { %5055 = dma.hbm_to_vmem [thread:$0]  (!%p5700_p5), %s6615_s6, 512, %s5704_s26, [#allocation8], %s6624_s1, %s6624_s1, %s6625_s5  }
  0x40   : > { %s5391_s14 = scalar_lea.hbm %s6617_s8, 512 }
  0x41   : > { %p5392_p11 = scmp.ne.s32.totalorder %s6617_s8, %s5391_s14  ;;  %p5398_p0 = scmp.lt.u32.totalorder %s5391_s14, %s6617_s8 }
  0x43   : > { %p5394_p12 = pnand %p5392_p11, %p5716_p7 }
  0x45   : > { %p5395_p13 = pneg %p5394_p12 }
  0x47   : > { %p5400_p2 = pnand %p5398_p0, %p5395_p13 }
  0x49   : > { %5403 = shalt.err (!%p5400_p2)
}
  0x4a   : > { %s5404_s22 = scalar_lea.vmem %s378_s29, 512  ;;  %p5412_p9 = scmp.lt.s32.totalorder %s378_s29, %s378_s29 }
  0x4b   : > { %p5405_p4 = scmp.ne.s32.totalorder %s378_s29, %s5404_s22  ;;  %p5413_p10 = scmp.lt.s32.totalorder %s5404_s22, %s5404_s22 }
  0x4d   : > { %p5407_p6 = pnand %p5405_p4, %p5716_p7  ;;  %p5414_p1 = por %p5413_p10, %p5412_p9 }
  0x4f   : > { %p5408_p8 = pneg %p5407_p6 }
  0x51   : > { %p5415_p3 = pnand %p5414_p1, %p5408_p8 }
  0x53   : > { %5418 = shalt.err (!%p5415_p3)
}
  0x54   : > { %5061 = dma.hbm_to_vmem [thread:$0]  (!%p5700_p5), %s6617_s8, 512, %s378_s29, [#allocation11], %s6624_s1, %s6624_s1, %s6625_s5  }
  0x55   : > { %s5588_s30 = smov [#allocation6]   ;;  %s5419_s15 = scalar_lea.hbm %s6613_s4, 98304 }
  0x56   : > { %s335_s12 = sshll.u32 %s5588_s30, 4  ;;  %p5420_p1 = scmp.ne.s32.totalorder %s6613_s4, %s5419_s15  ;;  %s336_s12 = int_to_ptr.vmem [resolvable:$true] %s335_s12 }
  0x57   : > { %p5426_p12 = scmp.lt.u32.totalorder %s5419_s15, %s6613_s4 }
  0x58   : > { %p5422_p3 = pnand %p5420_p1, %p5716_p7 }
  0x5a   : > { %p5423_p11 = pneg %p5422_p3 }
  0x5c   : > { %p5428_p13 = pnand %p5426_p12, %p5423_p11 }
  0x5e   : > { %5431 = shalt.err (!%p5428_p13)
}
  0x5f   : > { %s5432_s29 = scalar_lea.vmem %s336_s12, 98304  ;;  %p5440_p6 = scmp.lt.s32.totalorder %s336_s12, %s336_s12 }
  0x60   : > { %p5433_p0 = scmp.ne.s32.totalorder %s336_s12, %s5432_s29  ;;  %p5441_p8 = scmp.lt.s32.totalorder %s5432_s29, %s5432_s29 }
  0x62   : > { %p5435_p2 = pnand %p5433_p0, %p5716_p7  ;;  %p5442_p9 = por %p5441_p8, %p5440_p6 }
  0x64   : > { %p5436_p4 = pneg %p5435_p2 }
  0x66   : > { %p5443_p10 = pnand %p5442_p9, %p5436_p4 }
  0x68   : > { %5446 = shalt.err (!%p5443_p10)
}
  0x69   : > { %s5589_s26 = smov 768   ;;  %s5590_s11 = smov 48  }
  0x6a   : > { %5052 = dma.hbm_to_vmem [thread:$0]  (!%p5700_p5), %s6613_s4, 98304, %s336_s12, [#allocation5], %s5589_s26, %s5589_s26, %s5590_s11  }
  0x6b   : > { %s5591_s14 = smov [#allocation9]   ;;  %s5447_s28 = scalar_lea.hbm %s6616_s7, 256 }
  0x6c   : > { %s364_s15 = sshll.u32 %s5591_s14, 4  ;;  %p5448_p1 = scmp.ne.s32.totalorder %s6616_s7, %s5447_s28  ;;  %s365_s15 = int_to_ptr.vmem [resolvable:$true] %s364_s15 }
  0x6d   : > { %p5454_p12 = scmp.lt.u32.totalorder %s5447_s28, %s6616_s7 }
  0x6e   : > { %p5450_p3 = pnand %p5448_p1, %p5716_p7 }
  0x70   : > { %p5451_p11 = pneg %p5450_p3 }
  0x72   : > { %p5456_p13 = pnand %p5454_p12, %p5451_p11 }
  0x74   : > { %5459 = shalt.err (!%p5456_p13)
}
  0x75   : > { %s5460_s12 = scalar_lea.vmem %s365_s15, 256  ;;  %p5468_p6 = scmp.lt.s32.totalorder %s365_s15, %s365_s15 }
  0x76   : > { %p5461_p0 = scmp.ne.s32.totalorder %s365_s15, %s5460_s12  ;;  %p5469_p8 = scmp.lt.s32.totalorder %s5460_s12, %s5460_s12 }
  0x78   : > { %p5463_p2 = pnand %p5461_p0, %p5716_p7  ;;  %p5470_p9 = por %p5469_p8, %p5468_p6 }
  0x7a   : > { %p5464_p4 = pneg %p5463_p2 }
  0x7c   : > { %p5471_p10 = pnand %p5470_p9, %p5464_p4 }
  0x7e   : > { %5474 = shalt.err (!%p5471_p10)
}
  0x7f   : > { %s5592_s26 = smov 128   ;;  %s5593_s11 = smov 8  }
  0x80   : > { %5058 = dma.hbm_to_vmem [thread:$0]  (!%p5700_p5), %s6616_s7, 256, %s365_s15, [#allocation8], %s5592_s26, %s5592_s26, %s5593_s11  }
  0x81   : > { %s5594_s30 = smov [#allocation12]   ;;  %s5475_s25 = scalar_lea.hbm %s6618_s9, 480 }
  0x82   : > { %s391_s13 = sshll.u32 %s5594_s30, 4  ;;  %p5476_p1 = scmp.ne.s32.totalorder %s6618_s9, %s5475_s25  ;;  %s392_s13 = int_to_ptr.vmem [resolvable:$true] %s391_s13 }
  0x83   : > { %p5482_p12 = scmp.lt.u32.totalorder %s5475_s25, %s6618_s9 }
  0x84   : > { %p5478_p3 = pnand %p5476_p1, %p5716_p7 }
  0x86   : > { %p5479_p11 = pneg %p5478_p3 }
  0x88   : > { %p5484_p13 = pnand %p5482_p12, %p5479_p11 }
  0x8a   : > { %5487 = shalt.err (!%p5484_p13)
}
  0x8b   : > { %s5488_s15 = scalar_lea.vmem %s392_s13, 480  ;;  %p5496_p6 = scmp.lt.s32.totalorder %s392_s13, %s392_s13 }
  0x8c   : > { %p5489_p0 = scmp.ne.s32.totalorder %s392_s13, %s5488_s15  ;;  %p5497_p8 = scmp.lt.s32.totalorder %s5488_s15, %s5488_s15 }
  0x8e   : > { %p5491_p2 = pnand %p5489_p0, %p5716_p7  ;;  %p5498_p9 = por %p5497_p8, %p5496_p6 }
  0x90   : > { %p5492_p4 = pneg %p5491_p2 }
  0x92   : > { %p5499_p10 = pnand %p5498_p9, %p5492_p4 }
  0x94   : > { %5502 = shalt.err (!%p5499_p10)
}
  0x95   : > { %5064 = dma.hbm_to_vmem [thread:$0]  (!%p5700_p5), %s6618_s9, 480, %s392_s13, [#allocation11]  }
  0x96   : > { %s5840_s16 = sadd.s32 1, %s5579_s20   ;;  %s87_s27 = sadd.s32 1, %s5575_s19 }
  0x97   : > { %s84_s1 = ssub.s32 %s5579_s20, %s5840_s16  ;;  %p94_p7 = scmp.ne.s32.totalorder %s5575_s19, %s5571_s18 }
  0x98   : > { %p85_p1 = scmp.eq.s32.totalorder %s84_s1, 0  ;;  %p95_p3 = scmp.eq.s32.totalorder %s5579_s20, 0 }
  0x99   : > { %p100_p11 = scmp.ne.s32.totalorder %s5571_s18, %s5567_s17  ;;  %p5075_p12 = scmp.lt.s32.totalorder %s5579_s20, 2 }
  0x9a   : > { %s5852_s5 = scalar_select %p85_p1, %s5575_s19, %s87_s27  }
  0x9b   : > { %p96_p13 = por %p95_p3, %p94_p7  ;;  %p6632_p0 = scmp.eq.s32.totalorder %s5685_s23, 0 }
  0x9c   : > { %s418_s14 = sand.u32 1, %s5575_s19   ;;  %s3937_s13 = sshll.u32 %s5579_s20, 10 }
  0x9d   : > { %p5856_p2 = por %p6632_p0, %p100_p11  ;;  %s3872_s21 = sshll.u32 %s418_s14, 6 }
  0x9e   : > { %s5865_s22 = scalar_lea.hbm %s6611_s2, %s3937_s13  ;;  %s422_s17 = scalar_lea.vmem [#allocation2], %s3872_s21 }
  0x9f   : > { %s429_s29 = sshll.u32 %s422_s17, 4  ;;  %p5867_p5 = pnand %p5075_p12, %p96_p13  ;;  %s5871_s29 = int_to_ptr.vmem [resolvable:$true] %s429_s29 }
  0xa0   : > { %s5873_s20 = scalar_lea.sflag [#allocation3], %s418_s14  ;;  %s5503_s15 = scalar_lea.hbm %s5865_s22, 1024 }
  0xa1   : > { %p5504_p4 = scmp.ne.s32.totalorder %s5865_s22, %s5503_s15  ;;  %p5505_p6 = pneg %p5867_p5 }
  0xa2   : > { %s5508_s27 = scalar_lea.hbm %s6611_s2, 2048  ;;  %p5509_p10 = scmp.lt.u32.totalorder %s5865_s22, %s6611_s2 }
  0xa3   : > { %p5506_p8 = pnand %p5505_p6, %p5504_p4  ;;  %p5510_p7 = scmp.lt.u32.totalorder %s5508_s27, %s5503_s15 }
  0xa4   : > { %p5512_p3 = scmp.lt.u32.totalorder %s5503_s15, %s5865_s22 }
  0xa5   : > { %p5507_p9 = pneg %p5506_p8  ;;  %p5511_p1 = por %p5510_p7, %p5509_p10 }
  0xa7   : > { %p5513_p11 = por %p5512_p3, %p5511_p1 }
  0xa9   : > { %p5514_p12 = pnand %p5513_p11, %p5507_p9 }
  0xab   : > { %5517 = shalt.err (!%p5514_p12)
}
  0xac   : > { %s5518_s14 = scalar_lea.vmem %s5871_s29, 1024  ;;  %s5595_s21 = smov [#allocation2]  }
  0xad   : > { %p5519_p13 = scmp.ne.s32.totalorder %s5871_s29, %s5518_s14  ;;  %s5523_s25 = sshll.u32 %s5595_s21, 4  ;;  %s5524_s25 = int_to_ptr.vmem [resolvable:$false] %s5523_s25 }
  0xae   : > { %s5525_s28 = scalar_lea.vmem %s5524_s25, 2048  ;;  %p5526_p8 = scmp.lt.s32.totalorder %s5871_s29, %s5524_s25 }
  0xaf   : > { %p5521_p0 = pnand %p5519_p13, %p5505_p6  ;;  %p5527_p10 = scmp.lt.s32.totalorder %s5525_s28, %s5518_s14 }
  0xb1   : > { %p5522_p4 = pneg %p5521_p0  ;;  %p5528_p7 = por %p5527_p10, %p5526_p8 }
  0xb3   : > { %p5529_p1 = pnand %p5528_p7, %p5522_p4 }
  0xb5   : > { %5532 = shalt.err (!%p5529_p1)
}
  0xb6   : > { %s6635_s17 = smov 16   ;;  %s6636_s15 = smov 256  }
  0xb7   : > { %5068 = dma.hbm_to_vmem [thread:$0]  (!%p5867_p5), %s5865_s22, 1024, %s5871_s29, %s5873_s20, %s6636_s15, %s6636_s15, %s6635_s17  }
  0xb8   : > { %p6637_p6 = scmp.ne.s32.totalorder %s6629_s24, 0 }
  0xb9   : > { %s443_s26 = sand.u32 (!%p6637_p6), 1, %s5571_s18  }
  0xba   : > { %441 = sbr.rel (%p6637_p6) target bundleno = 2519 (0x9d7), region = 60  ;;  %s3876_s11 = sshll.u32 (!%p6637_p6), %s443_s26, 6 }
  0xbb   : > { %s444_s27 = scalar_lea.sflag (!%p6637_p6), [#allocation3], %s443_s26  ;;  %s5907_s1 = scalar_lea.vmem (!%p6637_p6), [#allocation2], %s3876_s11 }
  0xc1   : > { %5550 = dma.done.wait (%p5856_p2), %s444_s27, 1024  }
  0xc2   : > { %5552 = vsyncadd (%p5856_p2), %s444_s27, 4294966272  ;;  %p6638_p9 = scmp.eq.s32.totalorder %s5685_s23, 0 }
  0xc4   : > { %5554 = dma.done.wait (%p6638_p9), [#allocation5], 104448   ;;  %p6639_p5 = pmov %p6638_p9 }
  0xc6   : > { %5556 = vsyncadd (%p6639_p5), [#allocation5], 4294862848  ;;  %p6640_p3 = pmov %p6639_p5 }
  0xc8   : > { %5558 = dma.done.wait (%p6640_p3), [#allocation8], 768   ;;  %p6641_p11 = pmov %p6640_p3 }
  0xc9   : > { %p6642_p12 = pmov %p6640_p3 }
  0xca   : > { %5560 = vsyncadd (%p6641_p11), [#allocation8], 4294966528 }
  0xcb   : > { %5562 = dma.done.wait (%p6642_p12), [#allocation11], 992   ;;  %p6643_p13 = pmov %p6640_p3 }
  0xcc   : > { %p525_p2 = scmp.lt.s32.totalorder %s5685_s23, 1  ;;  %v549_v0 = vld [vmem:[#allocation4] sm:$0xff]  ;;  %v550_v1 = vld [vmem:[#allocation4 + $0x18] sm:$0xff]  ;;  %v551_v2 = vld [vmem:[#allocation4 + $0x30] sm:$0xff]  ;;  %s6644_s25 = sld [smem:[#allocation18_spill]]  ;;  %vm2148_vm0 = vcmask 523264  }
  0xcd   : > { %5564 = vsyncadd (%p6643_p13), [#allocation11], 4294966304  ;;  %v4043_v3 = vpack.c.bf16 %v550_v1, %v549_v0  ;;  %v552_v4 = vld [vmem:[#allocation4 + $0x48] sm:$0xff]  ;;  %v553_v6 = vld [vmem:[#allocation4 + $0x60] sm:$0xff]  ;;  %s6645_s21 = sld [smem:[#allocation17_spill]]  ;;  %s5597_s17 = smov 16  }
  0xce   : > { %s6652_s23 = smov (!%p525_p2, %s5685_s23), 1  ;;  %v4047_v5 = vpack.c.bf16 %v552_v4, %v551_v2  ;;  %v554_v7 = vld [vmem:[#allocation4 + $0x78] sm:$0xff]  ;;  %v555_v8 = vld [vmem:[#allocation4 + $0x90] sm:$0xff]  ;;  %v556_v10 = vld [vmem:[#allocation4 + $0xa8] sm:$0xff]  ;;  %s6646_s26 = sld [smem:[#allocation19_spill]]  ;;  %vm2190_vm1 = vcmask 130048  }
  0xcf   : > { %s5930_s24 = sshll.u32 %s6652_s23, 5  ;;  %4044 = vmatprep.subr.bf16.mxu0 %v4043_v3  ;;  %v4051_v9 = vpack.c.bf16 %v554_v7, %v553_v6  ;;  %v3638_v12 = vld [vmem:[#allocation10] sm:$0xff]  ;;  %v3639_v13 = vld [vmem:[#allocation10 + $0x8] sm:$0xff]  ;;  %v3640_v14 = vld [vmem:[#allocation10 + $0x10] sm:$0xff]  ;;  %v4055_v21 = vpack.c.bf16 %v556_v10, %v555_v8  ;;  %s5600_s27 = smov 96   ;;  %vm2169_vm2 = vcmask 392448  }
  0xd0   : > { %s5936_s29 = scalar_lea.vmem %s6609_s0, %s5930_s24  ;;  %s5942_s13 = scalar_lea.vmem %s6619_s10, %s5930_s24  ;;  %4046 = vmatpush3.bf16.msra.mxu0 %v4043_v3  ;;  %v3641_v15 = vld [vmem:[#allocation10 + $0x18] sm:$0xff]  ;;  %v557_v16 = vld [vmem:[#allocation4 + $0xc0] sm:$0xff]  ;;  %v558_v17 = vld [vmem:[#allocation4 + $0xd8] sm:$0xff]  ;;  %vm3450_vm3 = vcmask 261120  }
  0xd1   : > { %4048 = vmatprep.subr.bf16.mxu0 %v4047_v5  ;;  %v545_v11 = vld [vmem:[%s5936_s29] sm:$0xff]  ;;  %3642 = vst [vmem:[%s5942_s13] sm:$0xff] %v3638_v12  ;;  %3643 = vst [vmem:[%s5942_s13 + $0x8] sm:$0xff] %v3639_v13  ;;  %v662_v18 = vld [vmem:[#allocation4 + $0x10] sm:$0xff]  ;;  %v4059_v33 = vpack.c.bf16 %v558_v17, %v557_v16  ;;  %v5596_v16 = vmov 0.0   ;;  %s5602_s30 = smov 32  }
  0xd2   : > { %4037 = vmatprep.mubr.f32.mxu0 %v545_v11  ;;  %3644 = vst [vmem:[%s5942_s13 + $0x10] sm:$0xff] %v3640_v14  ;;  %3645 = vst [vmem:[%s5942_s13 + $0x18] sm:$0xff] %v3641_v15  ;;  %v664_v19 = vld [vmem:[#allocation4 + $0x28] sm:$0xff]  ;;  %v663_v23 = vld [vmem:[#allocation4 + $0x20] sm:$0xff]  ;;  %769 = vmatprep.mubr.f32.mxu1 %v5596_v16 }
  0xd3   : > { %v661_v20 = vld [vmem:[#allocation4 + $0x8] sm:$0xff]  ;;  %v4075_v22 = vpack.c.bf16 %v664_v19, %v662_v18  ;;  %v666_v24 = vld [vmem:[#allocation4 + $0x40] sm:$0xff]  ;;  %v668_v25 = vld [vmem:[#allocation4 + $0x58] sm:$0xff]  ;;  %s534_s28 = scalar_lea.vmem %s6645_s21, %s5930_s24  ;;  %s5019_s24 = smul.u32 96, %s6652_s23 }
  0xd4   : > { %4050 = vmatpush3.bf16.msra.mxu0 %v4047_v5  ;;  %v4077_v26 = vpack.c.bf16 %v663_v23, %v661_v20  ;;  %v4079_v27 = vpack.c.bf16 %v668_v25, %v666_v24  ;;  %v665_v28 = vld [vmem:[#allocation4 + $0x38] sm:$0xff]  ;;  %v667_v29 = vld [vmem:[#allocation4 + $0x50] sm:$0xff]  ;;  %v672_v31 = vld [vmem:[#allocation4 + $0x88] sm:$0xff] }
  0xd5   : > { %4052 = vmatprep.subr.bf16.mxu0 %v4051_v9  ;;  %v670_v30 = vld [vmem:[#allocation4 + $0x70] sm:$0xff]  ;;  %4076 = vmatprep.subr.bf16.mxu1 %v4075_v22  ;;  %v4081_v32 = vpack.c.bf16 %v667_v29, %v665_v28  ;;  %v669_v36 = vld [vmem:[#allocation4 + $0x68] sm:$0xff]  ;;  %v671_v37 = vld [vmem:[#allocation4 + $0x80] sm:$0xff]  ;;  %s6294_s11 = scalar_lea.vmem %s6646_s26, %s5019_s24 }
  0xd6   : > { %4078 = vmatpush1.bf16.msra.mxu1 %v4077_v26  ;;  %v559_v34 = vld [vmem:[#allocation4 + $0xf0] sm:$0xff]  ;;  %v4083_v35 = vpack.c.bf16 %v672_v31, %v670_v30  ;;  %v560_v38 = vld [vmem:[#allocation4 + $0x108] sm:$0xff]  ;;  %v674_v39 = vld [vmem:[#allocation4 + $0xa0] sm:$0xff]  ;;  %v4085_v41 = vpack.c.bf16 %v671_v37, %v669_v36 }
  0xd7   : > { %4080 = vmatprep.subr.bf16.mxu1 %v4079_v27  ;;  %v676_v40 = vld [vmem:[#allocation4 + $0xb8] sm:$0xff]  ;;  %v4063_v42 = vpack.c.bf16 %v560_v38, %v559_v34  ;;  %v561_v43 = vld [vmem:[#allocation4 + $0x120] sm:$0xff]  ;;  %v675_v46 = vld [vmem:[#allocation4 + $0xb0] sm:$0xff] }
  0xd8   : > { %4054 = vmatpush3.bf16.msra.mxu0 %v4051_v9  ;;  %v4087_v44 = vpack.c.bf16 %v676_v40, %v674_v39  ;;  %v673_v45 = vld [vmem:[#allocation4 + $0x98] sm:$0xff]  ;;  %v678_v48 = vld [vmem:[#allocation4 + $0xd0] sm:$0xff]  ;;  %v680_v49 = vld [vmem:[#allocation4 + $0xe8] sm:$0xff] }
  0xd9   : > { %4056 = vmatprep.subr.bf16.mxu0 %v4055_v21  ;;  %v562_v47 = vld [vmem:[#allocation4 + $0x138] sm:$0xff]  ;;  %v4089_v50 = vpack.c.bf16 %v675_v46, %v673_v45  ;;  %v563_v52 = vld [vmem:[#allocation4 + $0x150] sm:$0xff]  ;;  %v4091_v53 = vpack.c.bf16 %v680_v49, %v678_v48  ;;  %v677_v54 = vld [vmem:[#allocation4 + $0xc8] sm:$0xff] }
  0xda   : > { %4082 = vmatpush1.bf16.msra.mxu1 %v4081_v32  ;;  %v4067_v51 = vpack.c.bf16 %v562_v47, %v561_v43  ;;  %v679_v55 = vld [vmem:[#allocation4 + $0xe0] sm:$0xff]  ;;  %v564_v56 = vld [vmem:[#allocation4 + $0x168] sm:$0xff]  ;;  %v684_v58 = vld [vmem:[#allocation4 + $0x118] sm:$0xff] }
  0xdb   : > { %4084 = vmatprep.subr.bf16.mxu1 %v4083_v35  ;;  %v682_v57 = vld [vmem:[#allocation4 + $0x100] sm:$0xff]  ;;  %v4093_v59 = vpack.c.bf16 %v679_v55, %v677_v54  ;;  %v4071_v60 = vpack.c.bf16 %v564_v56, %v563_v52  ;;  %v681_v62 = vld [vmem:[#allocation4 + $0xf8] sm:$0xff]  ;;  %v683_v63 = vld [vmem:[#allocation4 + $0x110] sm:$0xff] }
  0xdc   : > { %4058 = vmatpush3.bf16.msra.mxu0 %v4055_v21  ;;  %v4095_v61 = vpack.c.bf16 %v684_v58, %v682_v57  ;;  %v686_v0 = vld [vmem:[#allocation4 + $0x130] sm:$0xff]  ;;  %v688_v1 = vld [vmem:[#allocation4 + $0x148] sm:$0xff]  ;;  %v4097_v2 = vpack.c.bf16 %v683_v63, %v681_v62  ;;  %v687_v5 = vld [vmem:[#allocation4 + $0x140] sm:$0xff] }
  0xdd   : > { %4060 = vmatprep.subr.bf16.mxu0 %v4059_v33  ;;  %v4099_v3 = vpack.c.bf16 %v688_v1, %v686_v0  ;;  %v685_v4 = vld [vmem:[#allocation4 + $0x128] sm:$0xff]  ;;  %v547_v8 = vld [vmem:[%s5936_s29 + $0x10] sm:$0xff]  ;;  %v548_v9 = vld [vmem:[%s5936_s29 + $0x18] sm:$0xff] }
  0xde   : > { %4086 = vmatpush1.bf16.msra.mxu1 %v4085_v41  ;;  %v546_v6 = vld [vmem:[%s5936_s29 + $0x8] sm:$0xff]  ;;  %v4101_v7 = vpack.c.bf16 %v687_v5, %v685_v4  ;;  %v690_v10 = vld [vmem:[#allocation4 + $0x160] sm:$0xff]  ;;  %v692_v11 = vld [vmem:[#allocation4 + $0x178] sm:$0xff] }
  0xdf   : > { %4088 = vmatprep.subr.bf16.mxu1 %v4087_v44  ;;  %v4103_v12 = vpack.c.bf16 %v692_v11, %v690_v10  ;;  %v689_v13 = vld [vmem:[#allocation4 + $0x158] sm:$0xff]  ;;  %v691_v14 = vld [vmem:[#allocation4 + $0x170] sm:$0xff]  ;;  %v813_v17 = vld [vmem:[#allocation6 + $0x8] sm:$0xff] }
  0xe0   : > { %4062 = vmatpush3.bf16.msra.mxu0 %v4059_v33  ;;  %v4105_v15 = vpack.c.bf16 %v691_v14, %v689_v13  ;;  %v819_v18 = vld [vmem:[#allocation6 + $0x38] sm:$0xff]  ;;  %v821_v21 = vld [vmem:[#allocation6 + $0x48] sm:$0xff]  ;;  %v812_v22 = vld [vmem:[#allocation6] sm:$0xff] }
  0xe1   : > { %4064 = vmatprep.subr.bf16.mxu0 %v4063_v42  ;;  %v815_v19 = vld [vmem:[#allocation6 + $0x18] sm:$0xff]  ;;  %v4107_v20 = vpack.c.bf16 %v819_v18, %v813_v17  ;;  %v818_v23 = vld [vmem:[#allocation6 + $0x30] sm:$0xff]  ;;  %v825_v26 = vld [vmem:[#allocation6 + $0x68] sm:$0xff] }
  0xe2   : > { %4090 = vmatpush1.bf16.msra.mxu1 %v4089_v50  ;;  %v4171_v24 = vpack.c.bf16 %v821_v21, %v815_v19  ;;  %v4109_v25 = vpack.c.bf16 %v818_v23, %v812_v22  ;;  %v831_v27 = vld [vmem:[#allocation6 + $0x98] sm:$0xff]  ;;  %v824_v29 = vld [vmem:[#allocation6 + $0x60] sm:$0xff]  ;;  %v830_v30 = vld [vmem:[#allocation6 + $0x90] sm:$0xff] }
  0xe3   : > { %4092 = vmatprep.subr.bf16.mxu1 %v4091_v53  ;;  %v4111_v28 = vpack.c.bf16 %v831_v27, %v825_v26  ;;  %v4113_v31 = vpack.c.bf16 %v830_v30, %v824_v29  ;;  %v837_v32 = vld [vmem:[#allocation6 + $0xc8] sm:$0xff]  ;;  %v843_v33 = vld [vmem:[#allocation6 + $0xf8] sm:$0xff]  ;;  %v836_v35 = vld [vmem:[#allocation6 + $0xc0] sm:$0xff] }
  0xe4   : > { %4066 = vmatpush3.bf16.msra.mxu0 %v4063_v42  ;;  %v4115_v34 = vpack.c.bf16 %v843_v33, %v837_v32  ;;  %v842_v36 = vld [vmem:[#allocation6 + $0xf0] sm:$0xff]  ;;  %v849_v38 = vld [vmem:[#allocation6 + $0x128] sm:$0xff]  ;;  %v855_v39 = vld [vmem:[#allocation6 + $0x158] sm:$0xff] }
  0xe5   : > { %4068 = vmatprep.subr.bf16.mxu0 %v4067_v51  ;;  %v4117_v37 = vpack.c.bf16 %v842_v36, %v836_v35  ;;  %v4119_v40 = vpack.c.bf16 %v855_v39, %v849_v38  ;;  %v848_v41 = vld [vmem:[#allocation6 + $0x120] sm:$0xff]  ;;  %v854_v42 = vld [vmem:[#allocation6 + $0x150] sm:$0xff]  ;;  %v861_v43 = vld [vmem:[#allocation6 + $0x188] sm:$0xff] }
  0xe6   : > { %4094 = vmatpush1.bf16.msra.mxu1 %v4093_v59  ;;  %v867_v44 = vld [vmem:[#allocation6 + $0x1b8] sm:$0xff]  ;;  %v4121_v45 = vpack.c.bf16 %v854_v42, %v848_v41  ;;  %v860_v47 = vld [vmem:[#allocation6 + $0x180] sm:$0xff]  ;;  %v866_v48 = vld [vmem:[#allocation6 + $0x1b0] sm:$0xff] }
  0xe7   : > { %4096 = vmatprep.subr.bf16.mxu1 %v4095_v61  ;;  %v4123_v46 = vpack.c.bf16 %v867_v44, %v861_v43  ;;  %v873_v49 = vld [vmem:[#allocation6 + $0x1e8] sm:$0xff]  ;;  %v879_v50 = vld [vmem:[#allocation6 + $0x218] sm:$0xff]  ;;  %v872_v53 = vld [vmem:[#allocation6 + $0x1e0] sm:$0xff] }
  0xe8   : > { %4070 = vmatpush3.bf16.msra.mxu0 %v4067_v51  ;;  %v4125_v51 = vpack.c.bf16 %v866_v48, %v860_v47  ;;  %v4127_v52 = vpack.c.bf16 %v879_v50, %v873_v49  ;;  %v878_v54 = vld [vmem:[#allocation6 + $0x210] sm:$0xff]  ;;  %v885_v55 = vld [vmem:[#allocation6 + $0x248] sm:$0xff]  ;;  %v891_v56 = vld [vmem:[#allocation6 + $0x278] sm:$0xff] }
  0xe9   : > { %4072 = vmatprep.subr.bf16.mxu0 %v4071_v60  ;;  %v4129_v57 = vpack.c.bf16 %v878_v54, %v872_v53  ;;  %v4131_v58 = vpack.c.bf16 %v891_v56, %v885_v55  ;;  %v884_v59 = vld [vmem:[#allocation6 + $0x240] sm:$0xff]  ;;  %v897_v61 = vld [vmem:[#allocation6 + $0x2a8] sm:$0xff]  ;;  %v903_v62 = vld [vmem:[#allocation6 + $0x2d8] sm:$0xff] }
  0xea   : > { %4098 = vmatpush1.bf16.msra.mxu1 %v4097_v2  ;;  %v4135_v0 = vpack.c.bf16 %v903_v62, %v897_v61  ;;  %v896_v1 = vld [vmem:[#allocation6 + $0x2a0] sm:$0xff]  ;;  %v902_v2 = vld [vmem:[#allocation6 + $0x2d0] sm:$0xff]  ;;  %v915_v4 = vld [vmem:[#allocation6 + $0x338] sm:$0xff] }
  0xeb   : > { %4100 = vmatprep.subr.bf16.mxu1 %v4099_v3  ;;  %v909_v3 = vld [vmem:[#allocation6 + $0x308] sm:$0xff]  ;;  %v4137_v5 = vpack.c.bf16 %v902_v2, %v896_v1  ;;  %v927_v10 = vld [vmem:[#allocation6 + $0x398] sm:$0xff]  ;;  %v920_v13 = vld [vmem:[#allocation6 + $0x360] sm:$0xff] }
  0xec   : > { %4074 = vmatpush3.bf16.msra.mxu0 %v4071_v60  ;;  %v890_v60 = vld [vmem:[#allocation6 + $0x270] sm:$0xff]  ;;  %v939_v17 = vld [vmem:[#allocation6 + $0x3f8] sm:$0xff]  ;;  %v945_v22 = vld [vmem:[#allocation6 + $0x428] sm:$0xff] }
  0xed   : > { %4108 = vmatprep.subr.bf16.mxu0 %v4107_v20  ;;  %v4133_v63 = vpack.c.bf16 %v890_v60, %v884_v59  ;;  %v926_v14 = vld [vmem:[#allocation6 + $0x390] sm:$0xff]  ;;  %v932_v20 = vld [vmem:[#allocation6 + $0x3c0] sm:$0xff]  ;;  %v951_v23 = vld [vmem:[#allocation6 + $0x458] sm:$0xff] }
  0xee   : > { %4102 = vmatpush1.bf16.msra.mxu1 %v4101_v7  ;;  %v908_v7 = vld [vmem:[#allocation6 + $0x300] sm:$0xff]  ;;  %v4145_v18 = vpack.c.bf16 %v926_v14, %v920_v13  ;;  %v938_v21 = vld [vmem:[#allocation6 + $0x3f0] sm:$0xff]  ;;  %v963_v29 = vld [vmem:[#allocation6 + $0x4b8] sm:$0xff] }
  0xef   : > { %4038 = vmatmul.mubr.f32.vlgmr.msra.gmra.mrb[0].mxu0 %v546_v6  ;;  %4104 = vmatprep.subr.bf16.mxu1 %v4103_v12  ;;  %v4139_v6 = vpack.c.bf16 %v915_v4, %v909_v3  ;;  %v944_v26 = vld [vmem:[#allocation6 + $0x420] sm:$0xff]  ;;  %v950_v27 = vld [vmem:[#allocation6 + $0x450] sm:$0xff]  ;;  %v975_v35 = vld [vmem:[#allocation6 + $0x518] sm:$0xff] }
  0xf0   : > { %4040 = vmatprep.mubr.f32.mxu0 %v547_v8  ;;  %4110 = vmatpush1.bf16.msra.mxu0 %v4109_v25  ;;  %v914_v8 = vld [vmem:[#allocation6 + $0x330] sm:$0xff]  ;;  %v4151_v25 = vpack.c.bf16 %v951_v23, %v945_v22  ;;  %v4153_v30 = vpack.c.bf16 %v950_v27, %v944_v26  ;;  %v956_v32 = vld [vmem:[#allocation6 + $0x480] sm:$0xff]  ;;  %v987_v41 = vld [vmem:[#allocation6 + $0x578] sm:$0xff] }
  0xf1   : > { %4112 = vmatprep.subr.bf16.mxu0 %v4111_v28  ;;  %v4141_v11 = vpack.c.bf16 %v914_v8, %v908_v7  ;;  %v957_v28 = vld [vmem:[#allocation6 + $0x488] sm:$0xff]  ;;  %v962_v33 = vld [vmem:[#allocation6 + $0x4b0] sm:$0xff]  ;;  %v968_v38 = vld [vmem:[#allocation6 + $0x4e0] sm:$0xff] }
  0xf2   : > { %4106 = vmatpush1.bf16.msra.mxu1 %v4105_v15  ;;  %v933_v15 = vld [vmem:[#allocation6 + $0x3c8] sm:$0xff]  ;;  %v4157_v36 = vpack.c.bf16 %v962_v33, %v956_v32  ;;  %v974_v39 = vld [vmem:[#allocation6 + $0x510] sm:$0xff]  ;;  %v980_v44 = vld [vmem:[#allocation6 + $0x540] sm:$0xff] }
  0xf3   : > { %4041 = vmatmul.mubr.f32.gmra.mrb[2].mxu0 %v548_v9  ;;  %4172 = vmatprep.subr.bf16.mxu1 %v4171_v24  ;;  %v921_v9 = vld [vmem:[#allocation6 + $0x368] sm:$0xff]  ;;  %v4147_v19 = vpack.c.bf16 %v939_v17, %v933_v15  ;;  %v4149_v24 = vpack.c.bf16 %v938_v21, %v932_v20  ;;  %v4161_v42 = vpack.c.bf16 %v974_v39, %v968_v38  ;;  %v3890_v47 = vld [vmem:[#allocation12] ss:$0 sm:$0xff]  ;;  %v820_v50 = vld [vmem:[#allocation6 + $0x40] sm:$0xff] }
  0xf4   : > { %4114 = vmatpush1.bf16.msra.mxu0 %v4113_v31  ;;  %v4143_v12 = vpack.c.bf16 %v927_v10, %v921_v9  ;;  %v4155_v31 = vpack.c.bf16 %v963_v29, %v957_v28  ;;  %v814_v49 = vld [vmem:[#allocation6 + $0x10] sm:$0xff]  ;;  %v833_v53 = vld [vmem:[#allocation6 + $0xa8] sm:$0xff]  ;;  %v832_v61 = vld [vmem:[#allocation6 + $0xa0] sm:$0xff] }
  0xf5   : > { %4116 = vmatprep.subr.bf16.mxu0 %v4115_v34  ;;  %v969_v34 = vld [vmem:[#allocation6 + $0x4e8] sm:$0xff]  ;;  %v4173_v55 = vpack.c.bf16 %v820_v50, %v814_v49  ;;  %v826_v60 = vld [vmem:[#allocation6 + $0x70] sm:$0xff]  ;;  %v851_v7 = vld [vmem:[#allocation6 + $0x138] sm:$0xff] }
  0xf6   : > { %v4177_v2 = vpack.c.bf16 %v832_v61, %v826_v60  ;;  %v857_v8 = vld [vmem:[#allocation6 + $0x168] sm:$0xff]  ;;  %v850_v13 = vld [vmem:[#allocation6 + $0x130] sm:$0xff]  ;;  %v856_v14 = vld [vmem:[#allocation6 + $0x160] sm:$0xff] }
  0xf7   : > { %v863_v15 = vld [vmem:[#allocation6 + $0x198] sm:$0xff]  ;;  %v869_v17 = vld [vmem:[#allocation6 + $0x1c8] sm:$0xff]  ;;  %v862_v21 = vld [vmem:[#allocation6 + $0x190] sm:$0xff] }
  0xf8   : > { %4118 = vmatpush1.bf16.msra.mxu0 %v4117_v37  ;;  %v4159_v37 = vpack.c.bf16 %v975_v35, %v969_v34  ;;  %v4187_v20 = vpack.c.bf16 %v869_v17, %v863_v15  ;;  %v868_v22 = vld [vmem:[#allocation6 + $0x1c0] sm:$0xff]  ;;  %v875_v23 = vld [vmem:[#allocation6 + $0x1f8] sm:$0xff]  ;;  %v874_v27 = vld [vmem:[#allocation6 + $0x1f0] sm:$0xff] }
  0xf9   : > { %4120 = vmatprep.subr.bf16.mxu0 %v4119_v40  ;;  %v981_v40 = vld [vmem:[#allocation6 + $0x548] sm:$0xff]  ;;  %v880_v28 = vld [vmem:[#allocation6 + $0x220] sm:$0xff]  ;;  %v887_v29 = vld [vmem:[#allocation6 + $0x258] sm:$0xff] }
  0xfa   : > { %v4163_v43 = vpack.c.bf16 %v987_v41, %v981_v40  ;;  %v886_v33 = vld [vmem:[#allocation6 + $0x250] sm:$0xff]  ;;  %v892_v34 = vld [vmem:[#allocation6 + $0x280] sm:$0xff]  ;;  %v899_v35 = vld [vmem:[#allocation6 + $0x2b8] sm:$0xff] }
  0xfb   : > { %v898_v39 = vld [vmem:[#allocation6 + $0x2b0] sm:$0xff]  ;;  %v904_v40 = vld [vmem:[#allocation6 + $0x2e0] sm:$0xff]  ;;  %v911_v41 = vld [vmem:[#allocation6 + $0x318] sm:$0xff] }
  0xfc   : > { %4122 = vmatpush1.bf16.msra.mxu0 %v4121_v45  ;;  %v986_v45 = vld [vmem:[#allocation6 + $0x570] sm:$0xff]  ;;  %v953_v60 = vld [vmem:[#allocation6 + $0x468] sm:$0xff] }
  0xfd   : > { %4124 = vmatprep.subr.bf16.mxu0 %v4123_v46  ;;  %v4165_v46 = vpack.c.bf16 %v986_v45, %v980_v44  ;;  %v910_v45 = vld [vmem:[#allocation6 + $0x310] sm:$0xff] }
 0x100   : > { %4126 = vmatpush1.bf16.msra.mxu0 %v4125_v51 }
 0x101   : > { %4128 = vmatprep.subr.bf16.mxu0 %v4127_v52  ;;  %v827_v52 = vld [vmem:[#allocation6 + $0x78] sm:$0xff] }
 0x102   : > { %v4175_v59 = vpack.c.bf16 %v833_v53, %v827_v52  ;;  %v928_v52 = vld [vmem:[#allocation6 + $0x3a0] sm:$0xff]  ;;  %v935_v53 = vld [vmem:[#allocation6 + $0x3d8] sm:$0xff] }
 0x104   : > { %4130 = vmatpush1.bf16.msra.mxu0 %v4129_v57 }
 0x105   : > { %4132 = vmatprep.subr.bf16.mxu0 %v4131_v58 }
 0x108   : > { %4134 = vmatpush1.bf16.msra.mxu0 %v4133_v63  ;;  %v839_v63 = vld [vmem:[#allocation6 + $0xd8] sm:$0xff] }
 0x109   : > { %4136 = vmatprep.subr.bf16.mxu0 %v4135_v0  ;;  %v845_v0 = vld [vmem:[#allocation6 + $0x108] sm:$0xff] }
 0x10a   : > { %v4179_v4 = vpack.c.bf16 %v845_v0, %v839_v63  ;;  %v946_v63 = vld [vmem:[#allocation6 + $0x430] sm:$0xff]  ;;  %v952_v0 = vld [vmem:[#allocation6 + $0x460] sm:$0xff] }
 0x10c   : > { %4138 = vmatpush1.bf16.msra.mxu0 %v4137_v5  ;;  %v838_v5 = vld [vmem:[#allocation6 + $0xd0] sm:$0xff] }
 0x10d   : > { %4140 = vmatprep.subr.bf16.mxu0 %v4139_v6  ;;  %v844_v6 = vld [vmem:[#allocation6 + $0x100] sm:$0xff] }
 0x110   : > { %4142 = vmatpush1.bf16.msra.mxu0 %v4141_v11  ;;  %v4181_v11 = vpack.c.bf16 %v844_v6, %v838_v5  ;;  %v958_v5 = vld [vmem:[#allocation6 + $0x490] sm:$0xff]  ;;  %v964_v6 = vld [vmem:[#allocation6 + $0x4c0] sm:$0xff] }
 0x111   : > { %4144 = vmatprep.subr.bf16.mxu0 %v4143_v12  ;;  %v4183_v12 = vpack.c.bf16 %v857_v8, %v851_v7  ;;  %v971_v7 = vld [vmem:[#allocation6 + $0x4f8] sm:$0xff]  ;;  %v977_v8 = vld [vmem:[#allocation6 + $0x528] sm:$0xff] }
 0x114   : > { %4146 = vmatpush1.bf16.msra.mxu0 %v4145_v18 }
 0x115   : > { %4148 = vmatprep.subr.bf16.mxu0 %v4147_v19  ;;  %v4185_v19 = vpack.c.bf16 %v856_v14, %v850_v13  ;;  %v983_v13 = vld [vmem:[#allocation6 + $0x558] sm:$0xff]  ;;  %v989_v14 = vld [vmem:[#allocation6 + $0x588] sm:$0xff] }
 0x116   : > { %v4227_v17 = vpack.c.bf16 %v989_v14, %v983_v13 }
 0x118   : > { %4150 = vmatpush1.bf16.msra.mxu0 %v4149_v24  ;;  %v881_v24 = vld [vmem:[#allocation6 + $0x228] sm:$0xff] }
 0x119   : > { %4152 = vmatprep.subr.bf16.mxu0 %v4151_v25  ;;  %v4189_v25 = vpack.c.bf16 %v868_v22, %v862_v21  ;;  %v4191_v26 = vpack.c.bf16 %v881_v24, %v875_v23  ;;  %v993_v21 = vld [vmem:[#allocation6 + $0x5a8] sm:$0xff]  ;;  %v999_v22 = vld [vmem:[#allocation6 + $0x5d8] sm:$0xff] }
 0x11a   : > { %v995_v23 = vld [vmem:[#allocation6 + $0x5b8] sm:$0xff]  ;;  %v4167_v24 = vpack.c.bf16 %v999_v22, %v993_v21 }
 0x11c   : > { %4154 = vmatpush1.bf16.msra.mxu0 %v4153_v30  ;;  %v893_v30 = vld [vmem:[#allocation6 + $0x288] sm:$0xff] }
 0x11d   : > { %4156 = vmatprep.subr.bf16.mxu0 %v4155_v31  ;;  %v4193_v31 = vpack.c.bf16 %v880_v28, %v874_v27  ;;  %v4195_v32 = vpack.c.bf16 %v893_v30, %v887_v29  ;;  %v998_v27 = vld [vmem:[#allocation6 + $0x5d0] sm:$0xff] }
 0x11e   : > { %v994_v30 = vld [vmem:[#allocation6 + $0x5b0] sm:$0xff] }
 0x120   : > { %4158 = vmatpush1.bf16.msra.mxu0 %v4157_v36  ;;  %v905_v36 = vld [vmem:[#allocation6 + $0x2e8] sm:$0xff] }
 0x121   : > { %4160 = vmatprep.subr.bf16.mxu0 %v4159_v37  ;;  %v4197_v37 = vpack.c.bf16 %v892_v34, %v886_v33  ;;  %v4199_v38 = vpack.c.bf16 %v905_v36, %v899_v35  ;;  %v817_v33 = vld [vmem:[#allocation6 + $0x28] sm:$0xff]  ;;  %v823_v34 = vld [vmem:[#allocation6 + $0x58] sm:$0xff] }
 0x122   : > { %v1305_v35 = vld [vmem:[#allocation6 + $0x618] sm:$0xff]  ;;  %v4235_v36 = vpack.c.bf16 %v823_v34, %v817_v33 }
 0x124   : > { %4162 = vmatpush1.bf16.msra.mxu0 %v4161_v42  ;;  %v917_v42 = vld [vmem:[#allocation6 + $0x348] sm:$0xff] }
 0x125   : > { %4164 = vmatprep.subr.bf16.mxu0 %v4163_v43  ;;  %v4201_v43 = vpack.c.bf16 %v904_v40, %v898_v39  ;;  %v4203_v44 = vpack.c.bf16 %v917_v42, %v911_v41  ;;  %v695_v39 = vlaneseq  ;;  %v693_v42 = vld [vmem:[#allocation12 + $0x1] sm:$0x3] }
 0x127   : > { %v5957_v40 = vshrl.u32 %v695_v39, 7  ;;  %vm3675_vm4 = vcmp.lt.s32.totalorder %v695_v39, 256 }
 0x128   : > { %4166 = vmatpush1.bf16.msra.mxu0 %v4165_v46  ;;  %v916_v46 = vld [vmem:[#allocation6 + $0x340] sm:$0xff] }
 0x129   : > { %v4205_v49 = vpack.c.bf16 %v916_v46, %v910_v45  ;;  %4168 = vmatprep.subr.bf16.mxu0 %v4167_v24  ;;  %v5960_v41 = vsub.s32 0, %v5957_v40  ;;  %v1328_v24 = vld [vmem:[#allocation6 + $0x6d0] sm:$0xff] }
 0x1c2   : > { %v4039_v48 = vpop.f32.mrb[0].mxu0 }
 0x1c3   : > { %v638_v51 = vpop.f32.mrb[1].mxu0  ;;  %v644_v56 = vadd.f32 %v4039_v48, %v3890_v47  ;;  %v929_v48 = vld [vmem:[#allocation6 + $0x3a8] sm:$0xff] }
 0x1c4   : > { %v639_v54 = vadd.f32 %v3890_v47, %v638_v51  ;;  %v922_v51 = vld [vmem:[#allocation6 + $0x370] sm:$0xff] }
 0x1c5   : > { %v658_v3 = vmax.f32 %v644_v56, 0.0 }
 0x1c6   : > { %v657_v57 = vmax.f32 %v639_v54, 0.0  ;;  %v4042_v58 = vpop.f32.mrb[2].mxu0  ;;  %v941_v54 = vld [vmem:[#allocation6 + $0x408] sm:$0xff] }
 0x1c7   : > { %v648_v62 = vpop.f32.mrb[3].mxu0  ;;  %v654_v9 = vadd.f32 %v4042_v58, %v3890_v47  ;;  %v4211_v56 = vpack.c.bf16 %v941_v54, %v935_v53  ;;  %v940_v58 = vld [vmem:[#allocation6 + $0x400] sm:$0xff]  ;;  %v829_v53 = vld [vmem:[#allocation6 + $0x88] sm:$0xff] }
 0x1c8   : > { %770 = vmatmul.mubr.f32.vlgmr.msra.gmra.mrb[0].mxu1 %v657_v57  ;;  %v649_v1 = vadd.f32 %v3890_v47, %v648_v62  ;;  %v923_v47 = vld [vmem:[#allocation6 + $0x378] sm:$0xff]  ;;  %v934_v57 = vld [vmem:[#allocation6 + $0x3d0] sm:$0xff] }
 0x1c9   : > { %775 = vmatprep.mubr.f32.mxu1 %v5596_v16  ;;  %4174 = vmatpush1.bf16.msra.mxu1 %v4173_v55  ;;  %v660_v18 = vmax.f32 %v654_v9, 0.0  ;;  %v4207_v50 = vpack.c.bf16 %v929_v48, %v923_v47  ;;  %v4209_v55 = vpack.c.bf16 %v928_v52, %v922_v51  ;;  %v4213_v61 = vpack.c.bf16 %v940_v58, %v934_v57  ;;  %v816_v47 = vld [vmem:[#allocation6 + $0x20] sm:$0xff]  ;;  %v822_v48 = vld [vmem:[#allocation6 + $0x50] sm:$0xff]  ;;  %v1323_v57 = vld [vmem:[#allocation6 + $0x6a8] sm:$0xff] }
 0x1ca   : > { %4176 = vmatprep.subr.bf16.mxu1 %v4175_v59  ;;  %v659_v10 = vmax.f32 %v649_v1, 0.0  ;;  %v947_v59 = vld [vmem:[#allocation6 + $0x438] sm:$0xff]  ;;  %v4221_v9 = vpack.c.bf16 %v964_v6, %v958_v5  ;;  %v1304_v51 = vld [vmem:[#allocation6 + $0x610] sm:$0xff]  ;;  %v1310_v52 = vld [vmem:[#allocation6 + $0x640] sm:$0xff] }
 0x1cb   : > { %v4215_v62 = vpack.c.bf16 %v953_v60, %v947_v59  ;;  %v959_v1 = vld [vmem:[#allocation6 + $0x498] sm:$0xff]  ;;  %v4237_v60 = vpack.c.bf16 %v822_v48, %v816_v47  ;;  %v1316_v5 = vld [vmem:[#allocation6 + $0x670] sm:$0xff]  ;;  %v1322_v6 = vld [vmem:[#allocation6 + $0x6a0] sm:$0xff] }
 0x1cc   : > { %776 = vmatmul.mubr.f32.gmra.mrb[2].mxu1 %v658_v3  ;;  %v4217_v3 = vpack.c.bf16 %v952_v0, %v946_v63  ;;  %v834_v63 = vld [vmem:[#allocation6 + $0xb0] sm:$0xff] }
 0x1cd   : > { %781 = vmatprep.mubr.f32.mxu1 %v5596_v16  ;;  %4178 = vmatpush1.bf16.msra.mxu1 %v4177_v2  ;;  %v965_v2 = vld [vmem:[#allocation6 + $0x4c8] sm:$0xff]  ;;  %v858_v47 = vld [vmem:[#allocation6 + $0x170] sm:$0xff] }
 0x1ce   : > { %4180 = vmatprep.subr.bf16.mxu1 %v4179_v4  ;;  %v4219_v4 = vpack.c.bf16 %v965_v2, %v959_v1  ;;  %v1340_v48 = vld [vmem:[#allocation6 + $0x730] sm:$0xff] }
 0x1d0   : > { %782 = vmatmul.mubr.f32.gmra.mrb[4].mxu1 %v659_v10  ;;  %v4223_v10 = vpack.c.bf16 %v977_v8, %v971_v7  ;;  %v841_v7 = vld [vmem:[#allocation6 + $0xe8] sm:$0xff] }
 0x1d1   : > { %787 = vmatprep.mubr.f32.mxu1 %v5596_v16  ;;  %4182 = vmatpush1.bf16.msra.mxu1 %v4181_v11  ;;  %v970_v11 = vld [vmem:[#allocation6 + $0x4f0] sm:$0xff] }
 0x1d2   : > { %4184 = vmatprep.subr.bf16.mxu1 %v4183_v12  ;;  %v976_v12 = vld [vmem:[#allocation6 + $0x520] sm:$0xff] }
 0x1d3   : > { %v4225_v15 = vpack.c.bf16 %v976_v12, %v970_v11  ;;  %v1335_v11 = vld [vmem:[#allocation6 + $0x708] sm:$0xff] }
 0x1d4   : > { %788 = vmatmul.mubr.f32.gmra.mrb[6].mxu1 %v660_v18  ;;  %v982_v18 = vld [vmem:[#allocation6 + $0x550] sm:$0xff] }
 0x1d5   : > { %4186 = vmatpush1.bf16.msra.mxu1 %v4185_v19  ;;  %v988_v19 = vld [vmem:[#allocation6 + $0x580] sm:$0xff] }
 0x1d6   : > { %4188 = vmatprep.subr.bf16.mxu1 %v4187_v20  ;;  %v4229_v20 = vpack.c.bf16 %v988_v19, %v982_v18  ;;  %v846_v18 = vld [vmem:[#allocation6 + $0x110] sm:$0xff] }
 0x1d9   : > { %4190 = vmatpush1.bf16.msra.mxu1 %v4189_v25  ;;  %v1001_v25 = vld [vmem:[#allocation6 + $0x5e8] sm:$0xff] }
 0x1da   : > { %4192 = vmatprep.subr.bf16.mxu1 %v4191_v26  ;;  %v992_v26 = vld [vmem:[#allocation6 + $0x5a0] sm:$0xff]  ;;  %v4231_v28 = vpack.c.bf16 %v1001_v25, %v995_v23 }
 0x1db   : > { %v4169_v29 = vpack.c.bf16 %v998_v27, %v992_v26  ;;  %v1334_v25 = vld [vmem:[#allocation6 + $0x700] sm:$0xff]  ;;  %v853_v26 = vld [vmem:[#allocation6 + $0x148] sm:$0xff] }
 0x1dd   : > { %4194 = vmatpush1.bf16.msra.mxu1 %v4193_v31  ;;  %v1000_v31 = vld [vmem:[#allocation6 + $0x5e0] sm:$0xff]  ;;  %4170 = vmatpush1.bf16.msra.mxu0 %v4169_v29  ;;  %v1341_v29 = vld [vmem:[#allocation6 + $0x738] sm:$0xff] }
 0x1de   : > { %4196 = vmatprep.subr.bf16.mxu1 %v4195_v32  ;;  %v4233_v32 = vpack.c.bf16 %v1000_v31, %v994_v30  ;;  %4236 = vmatprep.subr.bf16.mxu0 %v4235_v36  ;;  %v1347_v30 = vld [vmem:[#allocation6 + $0x768] sm:$0xff]  ;;  %v852_v36 = vld [vmem:[#allocation6 + $0x140] sm:$0xff] }
 0x1e1   : > { %4198 = vmatpush1.bf16.msra.mxu1 %v4197_v37  ;;  %v1311_v37 = vld [vmem:[#allocation6 + $0x648] sm:$0xff] }
 0x1e2   : > { %4200 = vmatprep.subr.bf16.mxu1 %v4199_v38  ;;  %v4363_v38 = vpack.c.bf16 %v1311_v37, %v1305_v35  ;;  %v4373_v35 = vpack.c.bf16 %v1334_v25, %v1328_v24  ;;  %v894_v24 = vld [vmem:[#allocation6 + $0x290] sm:$0xff] }
 0x1e5   : > { %4202 = vmatpush1.bf16.msra.mxu1 %v4201_v43  ;;  %v5963_v43 = vsub.s32 1, %v5957_v40 }
 0x1e6   : > { %4204 = vmatprep.subr.bf16.mxu1 %v4203_v44  ;;  %v5966_v44 = vrot.slane %v693_v42, %v5960_v41 }
 0x1e7   : > { %v5969_v45 = vrot.slane %v693_v42, %v5963_v43 }
 0x1e9   : > { %4206 = vmatpush1.bf16.msra.mxu1 %v4205_v49 }
 0x1ea   : > { %4208 = vmatprep.subr.bf16.mxu1 %v4207_v50 }
 0x1ed   : > { %4210 = vmatpush1.bf16.msra.mxu1 %v4209_v55  ;;  %v835_v55 = vld [vmem:[#allocation6 + $0xb8] sm:$0xff] }
 0x1ee   : > { %4212 = vmatprep.subr.bf16.mxu1 %v4211_v56  ;;  %v1317_v56 = vld [vmem:[#allocation6 + $0x678] sm:$0xff] }
 0x1f1   : > { %4214 = vmatpush1.bf16.msra.mxu1 %v4213_v61  ;;  %v4365_v61 = vpack.c.bf16 %v1310_v52, %v1304_v51  ;;  %v865_v51 = vld [vmem:[#allocation6 + $0x1a8] sm:$0xff]  ;;  %v871_v52 = vld [vmem:[#allocation6 + $0x1d8] sm:$0xff] }
 0x1f2   : > { %4216 = vmatprep.subr.bf16.mxu1 %v4215_v62  ;;  %v828_v62 = vld [vmem:[#allocation6 + $0x80] sm:$0xff] }
 0x1f3   : > { %v4241_v14 = vpack.c.bf16 %v834_v63, %v828_v62  ;;  %v1358_v62 = vld [vmem:[#allocation6 + $0x7c0] sm:$0xff]  ;;  %v877_v63 = vld [vmem:[#allocation6 + $0x208] sm:$0xff] }
 0x1f5   : > { %4218 = vmatpush1.bf16.msra.mxu1 %v4217_v3  ;;  %v4239_v3 = vpack.c.bf16 %v835_v55, %v829_v53 }
 0x1f6   : > { %4220 = vmatprep.subr.bf16.mxu1 %v4219_v4  ;;  %v4367_v4 = vpack.c.bf16 %v1323_v57, %v1317_v56  ;;  %v4249_v56 = vpack.c.bf16 %v858_v47, %v852_v36  ;;  %v864_v57 = vld [vmem:[#allocation6 + $0x1a0] sm:$0xff] }
 0x1f7   : > { %v900_v36 = vld [vmem:[#allocation6 + $0x2c0] sm:$0xff] }
 0x1f8   : > { %v1394_v47 = vld [vmem:[#allocation6 + $0x8e0] sm:$0xff] }
 0x1f9   : > { %4222 = vmatpush1.bf16.msra.mxu1 %v4221_v9  ;;  %v847_v9 = vld [vmem:[#allocation6 + $0x118] sm:$0xff] }
 0x1fa   : > { %4224 = vmatprep.subr.bf16.mxu1 %v4223_v10  ;;  %v1329_v10 = vld [vmem:[#allocation6 + $0x6d8] sm:$0xff]  ;;  %v4243_v22 = vpack.c.bf16 %v847_v9, %v841_v7  ;;  %v882_v9 = vld [vmem:[#allocation6 + $0x230] sm:$0xff] }
 0x1fb   : > { %v4371_v23 = vpack.c.bf16 %v1335_v11, %v1329_v10 }
 0x1fd   : > { %4226 = vmatpush1.bf16.msra.mxu1 %v4225_v15  ;;  %v4369_v15 = vpack.c.bf16 %v1322_v6, %v1316_v5  ;;  %v6012_v5 = vld [vmem:[%s5907_s1 + $0x8] sm:$0xff] }
 0x1fe   : > { %4228 = vmatprep.subr.bf16.mxu1 %v4227_v17  ;;  %v840_v17 = vld [vmem:[#allocation6 + $0xe0] sm:$0xff] }
 0x1ff   : > { %v4245_v34 = vpack.c.bf16 %v846_v18, %v840_v17  ;;  %v895_v17 = vld [vmem:[#allocation6 + $0x298] sm:$0xff] }
 0x200   : > { %v1377_v18 = vld [vmem:[#allocation6 + $0x858] sm:$0xff] }
 0x201   : > { %4230 = vmatpush1.bf16.msra.mxu1 %v4229_v20 }
 0x202   : > { %4232 = vmatprep.subr.bf16.mxu1 %v4231_v28  ;;  %v859_v28 = vld [vmem:[#allocation6 + $0x178] sm:$0xff] }
 0x203   : > { %v4247_v42 = vpack.c.bf16 %v859_v28, %v853_v26  ;;  %v1376_v26 = vld [vmem:[#allocation6 + $0x850] sm:$0xff]  ;;  %v901_v28 = vld [vmem:[#allocation6 + $0x2c8] sm:$0xff] }
 0x205   : > { %4234 = vmatpush1.bf16.msra.mxu1 %v4233_v32 }
 0x206   : > { %4364 = vmatprep.subr.bf16.mxu1 %v4363_v38 }
 0x29b   : > { %v771_v46 = vpop.f32.mrb[0].mxu1 }
 0x29c   : > { %v772_v49 = vadd.f32 %v771_v46, %v5966_v44  ;;  %v773_v50 = vpop.f32.mrb[1].mxu1  ;;  %v4375_v46 = vpack.c.bf16 %v1347_v30, %v1341_v29  ;;  %v907_v29 = vld [vmem:[#allocation6 + $0x2f8] sm:$0xff] }
 0x29d   : > { %v774_v54 = vadd.f32 %v773_v50, %v5969_v45  ;;  %v1389_v30 = vld [vmem:[#allocation6 + $0x8b8] sm:$0xff] }
 0x29e   : > { %v5975_v0 = vmax.f32 %v772_v49, 0.0  ;;  %v1346_v49 = vld [vmem:[#allocation6 + $0x760] sm:$0xff] }
 0x29f   : > { %v5973_v58 = vmax.f32 %v774_v54, 0.0  ;;  %v777_v59 = vpop.f32.mrb[2].mxu1  ;;  %v1359_v54 = vld [vmem:[#allocation6 + $0x7c8] sm:$0xff] }
 0x2a0   : > { %v778_v1 = vadd.f32 %v777_v59, %v5966_v44  ;;  %v779_v2 = vpop.f32.mrb[3].mxu1  ;;  %v870_v59 = vld [vmem:[#allocation6 + $0x1d0] sm:$0xff] }
 0x2a1   : > { %v780_v8 = vadd.f32 %v779_v2, %v5969_v45  ;;  %1099 = vmatprep.mubr.f32.mxu0 %v5973_v58  ;;  %1188 = vmatprep.mubr.f32.mxu1 %v5973_v58  ;;  %v883_v2 = vld [vmem:[#allocation6 + $0x238] sm:$0xff]  ;;  %v4253_v6 = vpack.c.bf16 %v870_v59, %v864_v57  ;;  %v1400_v59 = vld [vmem:[#allocation6 + $0x910] sm:$0xff] }
 0x2a2   : > { %1100 = vmatmul.mubr.f32.vlgmr.msra.gmra.mrb[4].mxu0 %v5975_v0  ;;  %1189 = vmatmul.mubr.f32.vlgmr.msra.gmra.mrb[8].mxu1 %v5975_v0  ;;  %v5985_v19 = vmax.f32 %v778_v1, 0.0  ;;  %v4255_v10 = vpack.c.bf16 %v883_v2, %v877_v63  ;;  %v1413_v63 = vld [vmem:[#allocation6 + $0x978] sm:$0xff] }
 0x2a3   : > { %v5983_v12 = vmax.f32 %v780_v8, 0.0  ;;  %4238 = vmatpush1.bf16.msra.mxu0 %v4237_v60  ;;  %4366 = vmatpush1.bf16.msra.mxu1 %v4365_v61  ;;  %v783_v13 = vpop.f32.mrb[4].mxu1  ;;  %v4251_v60 = vpack.c.bf16 %v871_v52, %v865_v51  ;;  %v1352_v61 = vld [vmem:[#allocation6 + $0x790] sm:$0xff]  ;;  %v876_v8 = vld [vmem:[#allocation6 + $0x200] sm:$0xff]  ;;  %v1407_v51 = vld [vmem:[#allocation6 + $0x948] sm:$0xff] }
 0x2a4   : > { %v784_v20 = vadd.f32 %v783_v13, %v5966_v44  ;;  %v785_v21 = vpop.f32.mrb[5].mxu1  ;;  %4240 = vmatprep.subr.bf16.mxu0 %v4239_v3  ;;  %4368 = vmatprep.subr.bf16.mxu1 %v4367_v4  ;;  %v1365_v3 = vld [vmem:[#allocation6 + $0x7f8] sm:$0xff]  ;;  %v1371_v4 = vld [vmem:[#allocation6 + $0x828] sm:$0xff]  ;;  %v4381_v7 = vpack.c.bf16 %v1358_v62, %v1352_v61  ;;  %v1364_v13 = vld [vmem:[#allocation6 + $0x7f0] sm:$0xff] }
 0x2a5   : > { %v786_v27 = vadd.f32 %v785_v21, %v5969_v45  ;;  %1105 = vmatprep.mubr.f32.mxu0 %v5983_v12  ;;  %1194 = vmatprep.mubr.f32.mxu1 %v5983_v12  ;;  %v4383_v11 = vpack.c.bf16 %v1371_v4, %v1365_v3  ;;  %v4257_v21 = vpack.c.bf16 %v882_v9, %v876_v8  ;;  %v925_v61 = vld [vmem:[#allocation6 + $0x388] sm:$0xff]  ;;  %v931_v62 = vld [vmem:[#allocation6 + $0x3b8] sm:$0xff]  ;;  %v924_v4 = vld [vmem:[#allocation6 + $0x380] sm:$0xff] }
 0x2a6   : > { %v5991_v31 = vmax.f32 %v784_v20, 0.0  ;;  %1106 = vmatmul.mubr.f32.gmra.mrb[6].mxu0 %v5985_v19  ;;  %1195 = vmatmul.mubr.f32.gmra.mrb[10].mxu1 %v5985_v19  ;;  %v1383_v20 = vld [vmem:[#allocation6 + $0x888] sm:$0xff]  ;;  %v1412_v9 = vld [vmem:[#allocation6 + $0x970] sm:$0xff] }
 0x2a7   : > { %v5995_v32 = vmax.f32 %v786_v27, 0.0  ;;  %4242 = vmatpush1.bf16.msra.mxu0 %v4241_v14  ;;  %4370 = vmatpush1.bf16.msra.mxu1 %v4369_v15  ;;  %v789_v33 = vpop.f32.mrb[6].mxu1  ;;  %v1370_v14 = vld [vmem:[#allocation6 + $0x820] sm:$0xff]  ;;  %v889_v15 = vld [vmem:[#allocation6 + $0x268] sm:$0xff]  ;;  %v4387_v25 = vpack.c.bf16 %v1383_v20, %v1377_v18 }
 0x2a8   : > { %v790_v37 = vadd.f32 %v789_v33, %v5966_v44  ;;  %v791_v38 = vpop.f32.mrb[7].mxu1  ;;  %4244 = vmatprep.subr.bf16.mxu0 %v4243_v22  ;;  %4372 = vmatprep.subr.bf16.mxu1 %v4371_v23  ;;  %v1353_v44 = vld [vmem:[#allocation6 + $0x798] sm:$0xff]  ;;  %v4385_v22 = vpack.c.bf16 %v1370_v14, %v1364_v13  ;;  %v888_v23 = vld [vmem:[#allocation6 + $0x260] sm:$0xff]  ;;  %v1395_v33 = vld [vmem:[#allocation6 + $0x8e8] sm:$0xff] }
 0x2a9   : > { %v792_v50 = vadd.f32 %v791_v38, %v5969_v45  ;;  %1111 = vmatprep.mubr.f32.mxu0 %v5995_v32  ;;  %1200 = vmatprep.mubr.f32.mxu1 %v5995_v32  ;;  %v4377_v45 = vpack.c.bf16 %v1346_v49, %v1340_v48  ;;  %v4379_v1 = vpack.c.bf16 %v1359_v54, %v1353_v44  ;;  %v1382_v27 = vld [vmem:[#allocation6 + $0x880] sm:$0xff]  ;;  %v913_v48 = vld [vmem:[#allocation6 + $0x328] sm:$0xff]  ;;  %v919_v49 = vld [vmem:[#allocation6 + $0x358] sm:$0xff] }
 0x2aa   : > { %v6001_v53 = vmax.f32 %v790_v37, 0.0  ;;  %1112 = vmatmul.mubr.f32.gmra.mrb[8].mxu0 %v5991_v31  ;;  %1201 = vmatmul.mubr.f32.gmra.mrb[12].mxu1 %v5991_v31  ;;  %v906_v37 = vld [vmem:[#allocation6 + $0x2f0] sm:$0xff]  ;;  %v4263_v38 = vpack.c.bf16 %v907_v29, %v901_v28  ;;  %v912_v54 = vld [vmem:[#allocation6 + $0x320] sm:$0xff]  ;;  %v943_v13 = vld [vmem:[#allocation6 + $0x418] sm:$0xff] }
 0x2ab   : > { %v6005_v55 = vmax.f32 %v792_v50, 0.0  ;;  %4246 = vmatpush1.bf16.msra.mxu0 %v4245_v34  ;;  %4374 = vmatpush1.bf16.msra.mxu1 %v4373_v35  ;;  %v4261_v34 = vpack.c.bf16 %v894_v24, %v888_v23  ;;  %v4389_v35 = vpack.c.bf16 %v1382_v27, %v1376_v26  ;;  %v1401_v50 = vld [vmem:[#allocation6 + $0x918] sm:$0xff]  ;;  %v4265_v52 = vpack.c.bf16 %v906_v37, %v900_v36  ;;  %v936_v20 = vld [vmem:[#allocation6 + $0x3e0] sm:$0xff]  ;;  %v1424_v24 = vld [vmem:[#allocation6 + $0x9d0] sm:$0xff] }
 0x2ac   : > { %4248 = vmatprep.subr.bf16.mxu0 %v4247_v42  ;;  %4376 = vmatprep.subr.bf16.mxu1 %v4375_v46  ;;  %v4391_v42 = vpack.c.bf16 %v1395_v33, %v1389_v30  ;;  %v1388_v46 = vld [vmem:[#allocation6 + $0x8b0] sm:$0xff]  ;;  %v4395_v57 = vpack.c.bf16 %v1407_v51, %v1401_v50  ;;  %v1425_v14 = vld [vmem:[#allocation6 + $0x9d8] sm:$0xff]  ;;  %v1443_v28 = vld [vmem:[#allocation6 + $0xa68] sm:$0xff] }
 0x2ad   : > { %1117 = vmatprep.mubr.f32.mxu0 %v6005_v55  ;;  %1206 = vmatprep.mubr.f32.mxu1 %v6005_v55  ;;  %v4393_v44 = vpack.c.bf16 %v1394_v47, %v1388_v46  ;;  %v955_v26 = vld [vmem:[#allocation6 + $0x478] sm:$0xff]  ;;  %v948_v33 = vld [vmem:[#allocation6 + $0x440] sm:$0xff]  ;;  %v1436_v37 = vld [vmem:[#allocation6 + $0xa30] sm:$0xff] }
 0x2ae   : > { %1118 = vmatmul.mubr.f32.gmra.mrb[10].mxu0 %v6001_v53  ;;  %1207 = vmatmul.mubr.f32.gmra.mrb[14].mxu1 %v6001_v53  ;;  %v1437_v27 = vld [vmem:[#allocation6 + $0xa38] sm:$0xff]  ;;  %v960_v51 = vld [vmem:[#allocation6 + $0x4a0] sm:$0xff] }
 0x2af   : > { %4250 = vmatpush1.bf16.msra.mxu0 %v4249_v56  ;;  %4378 = vmatpush1.bf16.msra.mxu1 %v4377_v45  ;;  %v918_v56 = vld [vmem:[#allocation6 + $0x350] sm:$0xff]  ;;  %v4267_v45 = vpack.c.bf16 %v919_v49, %v913_v48  ;;  %v4407_v36 = vpack.c.bf16 %v1443_v28, %v1437_v27  ;;  %v967_v46 = vld [vmem:[#allocation6 + $0x4d8] sm:$0xff]  ;;  %v1455_v48 = vld [vmem:[#allocation6 + $0xac8] sm:$0xff] }
 0x2b0   : > { %1277 = vmatprep.mubr.f32.mxu0 %v5973_v58  ;;  %4252 = vmatprep.subr.bf16.mxu0 %v4251_v60  ;;  %v4259_v58 = vpack.c.bf16 %v895_v17, %v889_v15  ;;  %v1406_v60 = vld [vmem:[#allocation6 + $0x940] sm:$0xff]  ;;  %v4269_v2 = vpack.c.bf16 %v918_v56, %v912_v54  ;;  %v1431_v15 = vld [vmem:[#allocation6 + $0xa08] sm:$0xff]  ;;  %v1449_v47 = vld [vmem:[#allocation6 + $0xa98] sm:$0xff] }
 0x2b1   : > { %4380 = vmatprep.subr.bf16.mxu1 %v4379_v1  ;;  %1678 = vmatprep.mubr.f32.mxu1 %v6012_v5  ;;  %v1419_v1 = vld [vmem:[#allocation6 + $0x9a8] sm:$0xff]  ;;  %v4397_v3 = vpack.c.bf16 %v1406_v60, %v1400_v59  ;;  %v4403_v23 = vpack.c.bf16 %v1431_v15, %v1425_v14  ;;  %v4411_v54 = vpack.c.bf16 %v1455_v48, %v1449_v47  ;;  %v1448_v56 = vld [vmem:[#allocation6 + $0xa90] sm:$0xff]  ;;  %v979_v59 = vld [vmem:[#allocation6 + $0x538] sm:$0xff] }
 0x2b2   : > { %v4399_v8 = vpack.c.bf16 %v1419_v1, %v1413_v63  ;;  %v1461_v60 = vld [vmem:[#allocation6 + $0xaf8] sm:$0xff]  ;;  %v972_v1 = vld [vmem:[#allocation6 + $0x500] sm:$0xff] }
 0x2b3   : > { %4254 = vmatpush1.bf16.msra.mxu0 %v4253_v6  ;;  %4382 = vmatpush1.bf16.msra.mxu1 %v4381_v7  ;;  %v930_v6 = vld [vmem:[#allocation6 + $0x3b0] sm:$0xff]  ;;  %v4271_v7 = vpack.c.bf16 %v931_v62, %v925_v61  ;;  %v1467_v61 = vld [vmem:[#allocation6 + $0xb28] sm:$0xff]  ;;  %v984_v15 = vld [vmem:[#allocation6 + $0x560] sm:$0xff] }
 0x2b4   : > { %4256 = vmatprep.subr.bf16.mxu0 %v4255_v10  ;;  %4384 = vmatprep.subr.bf16.mxu1 %v4383_v11  ;;  %v1418_v10 = vld [vmem:[#allocation6 + $0x9a0] sm:$0xff]  ;;  %v937_v11 = vld [vmem:[#allocation6 + $0x3e8] sm:$0xff]  ;;  %v4273_v17 = vpack.c.bf16 %v930_v6, %v924_v4  ;;  %v4415_v4 = vpack.c.bf16 %v1467_v61, %v1461_v60  ;;  %v1460_v6 = vld [vmem:[#allocation6 + $0xaf0] sm:$0xff] }
 0x2b5   : > { %v4401_v18 = vpack.c.bf16 %v1418_v10, %v1412_v9  ;;  %v991_v9 = vld [vmem:[#allocation6 + $0x598] sm:$0xff]  ;;  %v996_v28 = vld [vmem:[#allocation6 + $0x5c0] sm:$0xff]  ;;  %v1320_v61 = vld [vmem:[#allocation6 + $0x690] sm:$0xff] }
 0x2b6   : > { %v1473_v10 = vld [vmem:[#allocation6 + $0xb58] sm:$0xff]  ;;  %v1314_v60 = vld [vmem:[#allocation6 + $0x660] sm:$0xff] }
 0x2b7   : > { %4258 = vmatpush1.bf16.msra.mxu0 %v4257_v21  ;;  %4386 = vmatpush1.bf16.msra.mxu1 %v4385_v22  ;;  %v942_v21 = vld [vmem:[#allocation6 + $0x410] sm:$0xff]  ;;  %v4275_v22 = vpack.c.bf16 %v943_v13, %v937_v11  ;;  %v1479_v11 = vld [vmem:[#allocation6 + $0xb88] sm:$0xff] }
 0x2b8   : > { %4260 = vmatprep.subr.bf16.mxu0 %v4259_v58  ;;  %4388 = vmatprep.subr.bf16.mxu1 %v4387_v25  ;;  %v1430_v58 = vld [vmem:[#allocation6 + $0xa00] sm:$0xff]  ;;  %v949_v25 = vld [vmem:[#allocation6 + $0x448] sm:$0xff]  ;;  %v4277_v29 = vpack.c.bf16 %v942_v21, %v936_v20  ;;  %v4419_v20 = vpack.c.bf16 %v1479_v11, %v1473_v10  ;;  %v1472_v21 = vld [vmem:[#allocation6 + $0xb50] sm:$0xff] }
 0x2b9   : > { %v4405_v30 = vpack.c.bf16 %v1430_v58, %v1424_v24  ;;  %v1003_v24 = vld [vmem:[#allocation6 + $0x5f8] sm:$0xff]  ;;  %v1332_v10 = vld [vmem:[#allocation6 + $0x6f0] sm:$0xff]  ;;  %v6030_v11 = vld [vmem:[%s5907_s1 + $0x28] sm:$0xff] }
 0x2ba   : > { %v1485_v58 = vld [vmem:[#allocation6 + $0xbb8] sm:$0xff] }
 0x2bb   : > { %4262 = vmatpush1.bf16.msra.mxu0 %v4261_v34  ;;  %4390 = vmatpush1.bf16.msra.mxu1 %v4389_v35  ;;  %v954_v34 = vld [vmem:[#allocation6 + $0x470] sm:$0xff]  ;;  %v4279_v35 = vpack.c.bf16 %v955_v26, %v949_v25  ;;  %v1491_v25 = vld [vmem:[#allocation6 + $0xbe8] sm:$0xff] }
 0x2bc   : > { %4264 = vmatprep.subr.bf16.mxu0 %v4263_v38  ;;  %4392 = vmatprep.subr.bf16.mxu1 %v4391_v42  ;;  %v1442_v38 = vld [vmem:[#allocation6 + $0xa60] sm:$0xff]  ;;  %v961_v42 = vld [vmem:[#allocation6 + $0x4a8] sm:$0xff]  ;;  %v4281_v49 = vpack.c.bf16 %v954_v34, %v948_v33  ;;  %v4423_v33 = vpack.c.bf16 %v1491_v25, %v1485_v58  ;;  %v1484_v34 = vld [vmem:[#allocation6 + $0xbb0] sm:$0xff] }
 0x2bd   : > { %v4409_v50 = vpack.c.bf16 %v1442_v38, %v1436_v37  ;;  %v1309_v37 = vld [vmem:[#allocation6 + $0x638] sm:$0xff]  ;;  %v1307_v38 = vld [vmem:[#allocation6 + $0x628] sm:$0xff] }
 0x2be   : > { %v1351_v58 = vld [vmem:[#allocation6 + $0x788] sm:$0xff]  ;;  %v1357_v25 = vld [vmem:[#allocation6 + $0x7b8] sm:$0xff] }
 0x2bf   : > { %4266 = vmatpush1.bf16.msra.mxu0 %v4265_v52  ;;  %4394 = vmatpush1.bf16.msra.mxu1 %v4393_v44  ;;  %v966_v52 = vld [vmem:[#allocation6 + $0x4d0] sm:$0xff]  ;;  %v4283_v44 = vpack.c.bf16 %v967_v46, %v961_v42  ;;  %v1313_v42 = vld [vmem:[#allocation6 + $0x658] sm:$0xff] }
 0x2c0   : > { %4268 = vmatprep.subr.bf16.mxu0 %v4267_v45  ;;  %4396 = vmatprep.subr.bf16.mxu1 %v4395_v57  ;;  %v1454_v45 = vld [vmem:[#allocation6 + $0xac0] sm:$0xff]  ;;  %v973_v57 = vld [vmem:[#allocation6 + $0x508] sm:$0xff]  ;;  %v4285_v62 = vpack.c.bf16 %v966_v52, %v960_v51  ;;  %v4427_v51 = vpack.c.bf16 %v1313_v42, %v1307_v38  ;;  %v1369_v38 = vld [vmem:[#allocation6 + $0x818] sm:$0xff] }
 0x2c1   : > { %v4413_v63 = vpack.c.bf16 %v1454_v45, %v1448_v56  ;;  %v1315_v52 = vld [vmem:[#allocation6 + $0x668] sm:$0xff]  ;;  %v1312_v56 = vld [vmem:[#allocation6 + $0x650] sm:$0xff]  ;;  %v6017_v45 = vld [vmem:[%s5907_s1] sm:$0xff] }
 0x2c3   : > { %4270 = vmatpush1.bf16.msra.mxu0 %v4269_v2  ;;  %4398 = vmatpush1.bf16.msra.mxu1 %v4397_v3  ;;  %v978_v2 = vld [vmem:[#allocation6 + $0x530] sm:$0xff]  ;;  %v4287_v3 = vpack.c.bf16 %v979_v59, %v973_v57 }
 0x2c4   : > { %4272 = vmatprep.subr.bf16.mxu0 %v4271_v7  ;;  %4400 = vmatprep.subr.bf16.mxu1 %v4399_v8  ;;  %v1466_v7 = vld [vmem:[#allocation6 + $0xb20] sm:$0xff]  ;;  %v985_v8 = vld [vmem:[#allocation6 + $0x568] sm:$0xff]  ;;  %v4289_v13 = vpack.c.bf16 %v978_v2, %v972_v1  ;;  %v1333_v1 = vld [vmem:[#allocation6 + $0x6f8] sm:$0xff] }
 0x2c5   : > { %v4417_v14 = vpack.c.bf16 %v1466_v7, %v1460_v6  ;;  %v6026_v6 = vld [vmem:[%s5907_s1 + $0x10] sm:$0xff]  ;;  %v4305_v7 = vpack.c.bf16 %v1320_v61, %v1314_v60 }
 0x2c6   : > { %v1360_v60 = vld [vmem:[#allocation6 + $0x7d0] sm:$0xff] }
 0x2c7   : > { %4274 = vmatpush1.bf16.msra.mxu0 %v4273_v17  ;;  %4402 = vmatpush1.bf16.msra.mxu1 %v4401_v18  ;;  %v990_v17 = vld [vmem:[#allocation6 + $0x590] sm:$0xff]  ;;  %v4291_v18 = vpack.c.bf16 %v991_v9, %v985_v8  ;;  %v1326_v9 = vld [vmem:[#allocation6 + $0x6c0] sm:$0xff] }
 0x2c8   : > { %4276 = vmatprep.subr.bf16.mxu0 %v4275_v22  ;;  %4404 = vmatprep.subr.bf16.mxu1 %v4403_v23  ;;  %v1478_v22 = vld [vmem:[#allocation6 + $0xb80] sm:$0xff]  ;;  %v997_v23 = vld [vmem:[#allocation6 + $0x5c8] sm:$0xff]  ;;  %v4293_v26 = vpack.c.bf16 %v990_v17, %v984_v15  ;;  %v1324_v15 = vld [vmem:[#allocation6 + $0x6b0] sm:$0xff] }
 0x2c9   : > { %v4421_v27 = vpack.c.bf16 %v1478_v22, %v1472_v21  ;;  %v6036_v17 = vld [vmem:[%s5907_s1 + $0x20] sm:$0xff]  ;;  %v1344_v22 = vld [vmem:[#allocation6 + $0x750] sm:$0xff] }
 0x2cb   : > { %4278 = vmatpush1.bf16.msra.mxu0 %v4277_v29  ;;  %4406 = vmatpush1.bf16.msra.mxu1 %v4405_v30  ;;  %v1002_v29 = vld [vmem:[#allocation6 + $0x5f0] sm:$0xff]  ;;  %v4295_v30 = vpack.c.bf16 %v1003_v24, %v997_v23  ;;  %v1331_v23 = vld [vmem:[#allocation6 + $0x6e8] sm:$0xff]  ;;  %v1337_v24 = vld [vmem:[#allocation6 + $0x718] sm:$0xff] }
 0x2cc   : > { %4280 = vmatprep.subr.bf16.mxu0 %v4279_v35  ;;  %4408 = vmatprep.subr.bf16.mxu1 %v4407_v36  ;;  %v1490_v35 = vld [vmem:[#allocation6 + $0xbe0] sm:$0xff]  ;;  %v1303_v36 = vld [vmem:[#allocation6 + $0x608] sm:$0xff]  ;;  %v4297_v46 = vpack.c.bf16 %v1002_v29, %v996_v28  ;;  %v6046_v28 = vld [vmem:[%s5907_s1 + $0x30] sm:$0xff] }
 0x2cd   : > { %v4425_v47 = vpack.c.bf16 %v1490_v35, %v1484_v34  ;;  %v4299_v48 = vpack.c.bf16 %v1309_v37, %v1303_v36  ;;  %v1349_v34 = vld [vmem:[#allocation6 + $0x778] sm:$0xff]  ;;  %v4315_v35 = vpack.c.bf16 %v1357_v25, %v1351_v58  ;;  %v1350_v36 = vld [vmem:[#allocation6 + $0x780] sm:$0xff]  ;;  %v1356_v37 = vld [vmem:[#allocation6 + $0x7b0] sm:$0xff] }
 0x2ce   : > { %v1378_v58 = vld [vmem:[#allocation6 + $0x860] sm:$0xff]  ;;  %v1384_v25 = vld [vmem:[#allocation6 + $0x890] sm:$0xff] }
 0x2cf   : > { %4282 = vmatpush1.bf16.msra.mxu0 %v4281_v49  ;;  %4410 = vmatpush1.bf16.msra.mxu1 %v4409_v50  ;;  %v1302_v49 = vld [vmem:[#allocation6 + $0x600] sm:$0xff]  ;;  %v1308_v50 = vld [vmem:[#allocation6 + $0x630] sm:$0xff] }
 0x2d0   : > { %4284 = vmatprep.subr.bf16.mxu0 %v4283_v44  ;;  %4412 = vmatprep.subr.bf16.mxu1 %v4411_v54  ;;  %v1321_v44 = vld [vmem:[#allocation6 + $0x698] sm:$0xff]  ;;  %v1306_v54 = vld [vmem:[#allocation6 + $0x620] sm:$0xff]  ;;  %v4301_v57 = vpack.c.bf16 %v1308_v50, %v1302_v49  ;;  %v1355_v49 = vld [vmem:[#allocation6 + $0x7a8] sm:$0xff] }
 0x2d1   : > { %v4303_v59 = vpack.c.bf16 %v1321_v44, %v1315_v52  ;;  %v4429_v2 = vpack.c.bf16 %v1312_v56, %v1306_v54  ;;  %v1361_v50 = vld [vmem:[#allocation6 + $0x7d8] sm:$0xff]  ;;  %v1362_v52 = vld [vmem:[#allocation6 + $0x7e0] sm:$0xff]  ;;  %v1368_v44 = vld [vmem:[#allocation6 + $0x810] sm:$0xff] }
 0x2d2   : > { %v1375_v54 = vld [vmem:[#allocation6 + $0x848] sm:$0xff]  ;;  %v1381_v56 = vld [vmem:[#allocation6 + $0x878] sm:$0xff]  ;;  %v4321_v61 = vpack.c.bf16 %v1368_v44, %v1362_v52 }
 0x2d3   : > { %4286 = vmatpush1.bf16.msra.mxu0 %v4285_v62  ;;  %4414 = vmatpush1.bf16.msra.mxu1 %v4413_v63  ;;  %v6020_v62 = vld [vmem:[%s5907_s1 + $0x18] sm:$0xff]  ;;  %v1327_v63 = vld [vmem:[#allocation6 + $0x6c8] sm:$0xff] }
 0x2d4   : > { %4288 = vmatprep.subr.bf16.mxu0 %v4287_v3  ;;  %4416 = vmatprep.subr.bf16.mxu1 %v4415_v4  ;;  %v1319_v3 = vld [vmem:[#allocation6 + $0x688] sm:$0xff]  ;;  %v1325_v4 = vld [vmem:[#allocation6 + $0x6b8] sm:$0xff]  ;;  %v4307_v8 = vpack.c.bf16 %v1333_v1, %v1327_v63 }
 0x2d5   : > { %v1367_v63 = vld [vmem:[#allocation6 + $0x808] sm:$0xff]  ;;  %v1373_v1 = vld [vmem:[#allocation6 + $0x838] sm:$0xff] }
 0x2d7   : > { %4290 = vmatpush1.bf16.msra.mxu0 %v4289_v13  ;;  %4418 = vmatpush1.bf16.msra.mxu1 %v4417_v14  ;;  %v1345_v13 = vld [vmem:[#allocation6 + $0x758] sm:$0xff]  ;;  %v4431_v14 = vpack.c.bf16 %v1325_v4, %v1319_v3  ;;  %v1374_v3 = vld [vmem:[#allocation6 + $0x840] sm:$0xff]  ;;  %v1380_v4 = vld [vmem:[#allocation6 + $0x870] sm:$0xff] }
 0x2d8   : > { %4292 = vmatprep.subr.bf16.mxu0 %v4291_v18  ;;  %4420 = vmatprep.subr.bf16.mxu1 %v4419_v20  ;;  %v4309_v18 = vpack.c.bf16 %v1332_v10, %v1326_v9  ;;  %v1338_v20 = vld [vmem:[#allocation6 + $0x720] sm:$0xff]  ;;  %v4447_v10 = vpack.c.bf16 %v1373_v1, %v1367_v63  ;;  %v1428_v63 = vld [vmem:[#allocation6 + $0x9f0] sm:$0xff]  ;;  %v1435_v1 = vld [vmem:[#allocation6 + $0xa28] sm:$0xff] }
 0x2d9   : > { %v4313_v29 = vpack.c.bf16 %v1344_v22, %v1338_v20  ;;  %v1392_v20 = vld [vmem:[#allocation6 + $0x8d0] sm:$0xff]  ;;  %v1405_v22 = vld [vmem:[#allocation6 + $0x938] sm:$0xff] }
 0x2db   : > { %4294 = vmatpush1.bf16.msra.mxu0 %v4293_v26  ;;  %4422 = vmatpush1.bf16.msra.mxu1 %v4421_v27  ;;  %v1336_v27 = vld [vmem:[#allocation6 + $0x710] sm:$0xff] }
 0x2dc   : > { %4296 = vmatprep.subr.bf16.mxu0 %v4295_v30  ;;  %4424 = vmatprep.subr.bf16.mxu1 %v4423_v33  ;;  %v4435_v30 = vpack.c.bf16 %v1337_v24, %v1331_v23  ;;  %v1343_v33 = vld [vmem:[#allocation6 + $0x748] sm:$0xff] }
 0x2df   : > { %4298 = vmatpush1.bf16.msra.mxu0 %v4297_v46  ;;  %4426 = vmatpush1.bf16.msra.mxu1 %v4425_v47  ;;  %v1342_v46 = vld [vmem:[#allocation6 + $0x740] sm:$0xff]  ;;  %v1348_v47 = vld [vmem:[#allocation6 + $0x770] sm:$0xff] }
 0x2e0   : > { %4300 = vmatprep.subr.bf16.mxu0 %v4299_v48  ;;  %4428 = vmatprep.subr.bf16.mxu1 %v4427_v51  ;;  %v4317_v48 = vpack.c.bf16 %v1356_v37, %v1350_v36  ;;  %v4453_v36 = vpack.c.bf16 %v1384_v25, %v1378_v58  ;;  %v1445_v58 = vld [vmem:[#allocation6 + $0xa78] sm:$0xff] }
 0x2e2   : > { %1278 = vmatmul.mubr.f32.vlgmr.msra.gmra.mrb[12].mxu0 %v5975_v0  ;;  %1679 = vmatmul.mubr.f32.vlgmr.msra.gmra.mrb[8].mxu1 %v6017_v45  ;;  %v1339_v0 = vld [vmem:[#allocation6 + $0x728] sm:$0xff] }
 0x2e3   : > { %1283 = vmatprep.mubr.f32.mxu0 %v5983_v12  ;;  %4302 = vmatpush1.bf16.msra.mxu0 %v4301_v57  ;;  %v1318_v12 = vld [vmem:[#allocation6 + $0x680] sm:$0xff]  ;;  %v4311_v21 = vpack.c.bf16 %v1345_v13, %v1339_v0  ;;  %v4443_v57 = vpack.c.bf16 %v1361_v50, %v1355_v49  ;;  %v4325_v13 = vpack.c.bf16 %v1380_v4, %v1374_v3  ;;  %v1416_v49 = vld [vmem:[#allocation6 + $0x990] sm:$0xff]  ;;  %v1423_v50 = vld [vmem:[#allocation6 + $0x9c8] sm:$0xff] }
 0x2e4   : > { %1684 = vmatprep.mubr.f32.mxu1 %v6020_v62  ;;  %4304 = vmatprep.subr.bf16.mxu0 %v4303_v59  ;;  %v4433_v26 = vpack.c.bf16 %v1324_v15, %v1318_v12  ;;  %v1354_v59 = vld [vmem:[#allocation6 + $0x7a0] sm:$0xff]  ;;  %v1385_v12 = vld [vmem:[#allocation6 + $0x898] sm:$0xff] }
 0x2e5   : > { %4430 = vmatpush1.bf16.msra.mxu1 %v4429_v2  ;;  %v4323_v2 = vpack.c.bf16 %v1381_v56, %v1375_v54  ;;  %v4445_v9 = vpack.c.bf16 %v1360_v60, %v1354_v59  ;;  %v1366_v0 = vld [vmem:[#allocation6 + $0x800] sm:$0xff]  ;;  %v1408_v56 = vld [vmem:[#allocation6 + $0x950] sm:$0xff]  ;;  %v1421_v59 = vld [vmem:[#allocation6 + $0x9b8] sm:$0xff] }
 0x2e6   : > { %1284 = vmatmul.mubr.f32.gmra.mrb[14].mxu0 %v5985_v19  ;;  %1685 = vmatmul.mubr.f32.gmra.mrb[10].mxu1 %v6026_v6  ;;  %v6040_v19 = vld [vmem:[%s5907_s1 + $0x38] sm:$0xff]  ;;  %v1402_v54 = vld [vmem:[#allocation6 + $0x920] sm:$0xff] }
 0x2e7   : > { %1289 = vmatprep.mubr.f32.mxu0 %v5995_v32  ;;  %4306 = vmatpush1.bf16.msra.mxu0 %v4305_v7  ;;  %v1330_v32 = vld [vmem:[#allocation6 + $0x6e0] sm:$0xff]  ;;  %v1387_v7 = vld [vmem:[#allocation6 + $0x8a8] sm:$0xff]  ;;  %v4461_v3 = vpack.c.bf16 %v1408_v56, %v1402_v54  ;;  %v1469_v54 = vld [vmem:[#allocation6 + $0xb38] sm:$0xff] }
 0x2e8   : > { %1690 = vmatprep.mubr.f32.mxu1 %v6030_v11  ;;  %4308 = vmatprep.subr.bf16.mxu0 %v4307_v8  ;;  %v4437_v42 = vpack.c.bf16 %v1336_v27, %v1330_v32  ;;  %v1393_v8 = vld [vmem:[#allocation6 + $0x8d8] sm:$0xff]  ;;  %v1391_v32 = vld [vmem:[#allocation6 + $0x8c8] sm:$0xff] }
 0x2e9   : > { %4432 = vmatprep.subr.bf16.mxu1 %v4431_v14  ;;  %v1379_v14 = vld [vmem:[#allocation6 + $0x868] sm:$0xff]  ;;  %v4327_v15 = vpack.c.bf16 %v1393_v8, %v1387_v7  ;;  %v1397_v27 = vld [vmem:[#allocation6 + $0x8f8] sm:$0xff]  ;;  %v1414_v7 = vld [vmem:[#allocation6 + $0x980] sm:$0xff] }
 0x2ea   : > { %1290 = vmatmul.mubr.f32.gmra.mrb[16].mxu0 %v5991_v31  ;;  %1691 = vmatmul.mubr.f32.gmra.mrb[12].mxu1 %v6036_v17  ;;  %v1363_v31 = vld [vmem:[#allocation6 + $0x7e8] sm:$0xff]  ;;  %v4451_v24 = vpack.c.bf16 %v1385_v12, %v1379_v14  ;;  %v4455_v37 = vpack.c.bf16 %v1397_v27, %v1391_v32  ;;  %v1420_v8 = vld [vmem:[#allocation6 + $0x9b0] sm:$0xff] }
 0x2eb   : > { %1295 = vmatprep.mubr.f32.mxu0 %v6005_v55  ;;  %4310 = vmatpush1.bf16.msra.mxu0 %v4309_v18  ;;  %v4439_v55 = vpack.c.bf16 %v1349_v34, %v1343_v33  ;;  %v4319_v51 = vpack.c.bf16 %v1369_v38, %v1363_v31  ;;  %v1386_v18 = vld [vmem:[#allocation6 + $0x8a0] sm:$0xff]  ;;  %v1404_v33 = vld [vmem:[#allocation6 + $0x930] sm:$0xff]  ;;  %v1411_v34 = vld [vmem:[#allocation6 + $0x968] sm:$0xff] }
 0x2ec   : > { %1696 = vmatprep.mubr.f32.mxu1 %v6040_v19  ;;  %4312 = vmatprep.subr.bf16.mxu0 %v4311_v21  ;;  %v1399_v21 = vld [vmem:[#allocation6 + $0x908] sm:$0xff]  ;;  %v1390_v31 = vld [vmem:[#allocation6 + $0x8c0] sm:$0xff]  ;;  %v1396_v38 = vld [vmem:[#allocation6 + $0x8f0] sm:$0xff] }
 0x2ed   : > { %4434 = vmatpush1.bf16.msra.mxu1 %v4433_v26  ;;  %v4329_v26 = vpack.c.bf16 %v1392_v20, %v1386_v18  ;;  %v4457_v52 = vpack.c.bf16 %v1396_v38, %v1390_v31  ;;  %v1440_v14 = vld [vmem:[#allocation6 + $0xa50] sm:$0xff]  ;;  %v1447_v12 = vld [vmem:[#allocation6 + $0xa88] sm:$0xff]  ;;  %v4465_v18 = vpack.c.bf16 %v1420_v8, %v1414_v7  ;;  %v1457_v31 = vld [vmem:[#allocation6 + $0xad8] sm:$0xff] }
 0x2ee   : > { %1296 = vmatmul.mubr.f32.gmra.mrb[18].mxu0 %v6001_v53  ;;  %1697 = vmatmul.mubr.f32.gmra.mrb[14].mxu1 %v6046_v28  ;;  %v4441_v53 = vpack.c.bf16 %v1348_v47, %v1342_v46  ;;  %v1409_v46 = vld [vmem:[#allocation6 + $0x958] sm:$0xff]  ;;  %v1452_v32 = vld [vmem:[#allocation6 + $0xab0] sm:$0xff]  ;;  %v1459_v27 = vld [vmem:[#allocation6 + $0xae8] sm:$0xff] }
 0x2ef   : > { %4314 = vmatpush1.bf16.msra.mxu0 %v4313_v29  ;;  %4436 = vmatprep.subr.bf16.mxu1 %v4435_v30  ;;  %v4331_v29 = vpack.c.bf16 %v1405_v22, %v1399_v21  ;;  %v1398_v30 = vld [vmem:[#allocation6 + $0x900] sm:$0xff]  ;;  %v1432_v22 = vld [vmem:[#allocation6 + $0xa10] sm:$0xff]  ;;  %v1481_v7 = vld [vmem:[#allocation6 + $0xb98] sm:$0xff] }
 0x2f0   : > { %4316 = vmatprep.subr.bf16.mxu0 %v4315_v35  ;;  %1589 = vmatprep.mubr.f32.mxu0 %v6012_v5  ;;  %v1417_v35 = vld [vmem:[#allocation6 + $0x998] sm:$0xff]  ;;  %v1426_v21 = vld [vmem:[#allocation6 + $0x9e0] sm:$0xff] }
 0x2f1   : > { %4438 = vmatpush1.bf16.msra.mxu1 %v4437_v42  ;;  %1767 = vmatprep.mubr.f32.mxu1 %v6012_v5  ;;  %v1372_v5 = vld [vmem:[#allocation6 + $0x830] sm:$0xff]  ;;  %v4333_v42 = vpack.c.bf16 %v1404_v33, %v1398_v30  ;;  %v4335_v47 = vpack.c.bf16 %v1417_v35, %v1411_v34  ;;  %v4469_v30 = vpack.c.bf16 %v1432_v22, %v1426_v21  ;;  %v1438_v34 = vld [vmem:[#allocation6 + $0xa40] sm:$0xff] }
 0x2f2   : > { %4440 = vmatprep.subr.bf16.mxu1 %v4439_v55  ;;  %v4449_v23 = vpack.c.bf16 %v1372_v5, %v1366_v0  ;;  %v1403_v55 = vld [vmem:[#allocation6 + $0x928] sm:$0xff]  ;;  %v1433_v0 = vld [vmem:[#allocation6 + $0xa18] sm:$0xff]  ;;  %v1444_v35 = vld [vmem:[#allocation6 + $0xa70] sm:$0xff] }
 0x2f3   : > { %4318 = vmatpush1.bf16.msra.mxu0 %v4317_v48  ;;  %v1410_v48 = vld [vmem:[#allocation6 + $0x960] sm:$0xff]  ;;  %v4459_v44 = vpack.c.bf16 %v1409_v46, %v1403_v55  ;;  %v1464_v55 = vld [vmem:[#allocation6 + $0xb10] sm:$0xff]  ;;  %v1471_v46 = vld [vmem:[#allocation6 + $0xb48] sm:$0xff] }
 0x2f4   : > { %4320 = vmatprep.subr.bf16.mxu0 %v4319_v51  ;;  %v1429_v51 = vld [vmem:[#allocation6 + $0x9f8] sm:$0xff]  ;;  %v1486_v22 = vld [vmem:[#allocation6 + $0xbc0] sm:$0xff] }
 0x2f5   : > { %4442 = vmatpush1.bf16.msra.mxu1 %v4441_v53  ;;  %v4337_v53 = vpack.c.bf16 %v1416_v49, %v1410_v48  ;;  %v4339_v60 = vpack.c.bf16 %v1429_v51, %v1423_v50  ;;  %v4473_v48 = vpack.c.bf16 %v1444_v35, %v1438_v34  ;;  %v1450_v50 = vld [vmem:[#allocation6 + $0xaa0] sm:$0xff]  ;;  %v1456_v51 = vld [vmem:[#allocation6 + $0xad0] sm:$0xff]  ;;  %v1965_v35 = vld [vmem:[%s6644_s25 + $0x28] sm:$0xff] }
 0x2f6   : > { %4444 = vmatprep.subr.bf16.mxu1 %v4443_v57  ;;  %v1415_v57 = vld [vmem:[#allocation6 + $0x988] sm:$0xff]  ;;  %v1964_v34 = vld [vmem:[%s6644_s25 + $0x20] sm:$0xff] }
 0x2f7   : > { %4322 = vmatpush1.bf16.msra.mxu0 %v4321_v61  ;;  %v1422_v61 = vld [vmem:[#allocation6 + $0x9c0] sm:$0xff]  ;;  %v4463_v4 = vpack.c.bf16 %v1421_v59, %v1415_v57  ;;  %v1476_v57 = vld [vmem:[#allocation6 + $0xb70] sm:$0xff]  ;;  %v1483_v59 = vld [vmem:[#allocation6 + $0xba8] sm:$0xff] }
 0x2f8   : > { %4324 = vmatprep.subr.bf16.mxu0 %v4323_v2  ;;  %v1441_v2 = vld [vmem:[#allocation6 + $0xa58] sm:$0xff] }
 0x2f9   : > { %4446 = vmatpush1.bf16.msra.mxu1 %v4445_v9  ;;  %v4341_v9 = vpack.c.bf16 %v1428_v63, %v1422_v61  ;;  %v4343_v5 = vpack.c.bf16 %v1441_v2, %v1435_v1  ;;  %v4477_v61 = vpack.c.bf16 %v1456_v51, %v1450_v50  ;;  %v1462_v1 = vld [vmem:[#allocation6 + $0xb00] sm:$0xff]  ;;  %v1468_v2 = vld [vmem:[#allocation6 + $0xb30] sm:$0xff]  ;;  %v1969_v51 = vld [vmem:[%s6644_s25 + $0x48] sm:$0xff] }
 0x2fa   : > { %4448 = vmatprep.subr.bf16.mxu1 %v4447_v10  ;;  %v1427_v10 = vld [vmem:[#allocation6 + $0x9e8] sm:$0xff]  ;;  %v1968_v50 = vld [vmem:[%s6644_s25 + $0x40] sm:$0xff] }
 0x2fb   : > { %4326 = vmatpush1.bf16.msra.mxu0 %v4325_v13  ;;  %v1434_v13 = vld [vmem:[#allocation6 + $0xa20] sm:$0xff]  ;;  %v4467_v20 = vpack.c.bf16 %v1433_v0, %v1427_v10  ;;  %v1488_v10 = vld [vmem:[#allocation6 + $0xbd0] sm:$0xff]  ;;  %v4481_v0 = vpack.c.bf16 %v1468_v2, %v1462_v1  ;;  %v1973_v2 = vld [vmem:[%s6644_s25 + $0x68] sm:$0xff] }
 0x2fc   : > { %4328 = vmatprep.subr.bf16.mxu0 %v4327_v15  ;;  %v1453_v15 = vld [vmem:[#allocation6 + $0xab8] sm:$0xff]  ;;  %v1972_v1 = vld [vmem:[%s6644_s25 + $0x60] sm:$0xff] }
 0x2fd   : > { %4450 = vmatpush1.bf16.msra.mxu1 %v4449_v23  ;;  %v4345_v23 = vpack.c.bf16 %v1440_v14, %v1434_v13  ;;  %v4347_v25 = vpack.c.bf16 %v1453_v15, %v1447_v12  ;;  %v1474_v13 = vld [vmem:[#allocation6 + $0xb60] sm:$0xff]  ;;  %v1480_v14 = vld [vmem:[#allocation6 + $0xb90] sm:$0xff]  ;;  %v1487_v15 = vld [vmem:[#allocation6 + $0xbc8] sm:$0xff] }
 0x2fe   : > { %4452 = vmatprep.subr.bf16.mxu1 %v4451_v24  ;;  %v1439_v24 = vld [vmem:[#allocation6 + $0xa48] sm:$0xff] }
 0x2ff   : > { %4330 = vmatpush1.bf16.msra.mxu0 %v4329_v26  ;;  %v1446_v26 = vld [vmem:[#allocation6 + $0xa80] sm:$0xff]  ;;  %v4471_v33 = vpack.c.bf16 %v1445_v58, %v1439_v24  ;;  %v1979_v58 = vld [vmem:[%s6644_s25 + $0x98] sm:$0xff] }
 0x300   : > { %4332 = vmatprep.subr.bf16.mxu0 %v4331_v29  ;;  %v1465_v29 = vld [vmem:[#allocation6 + $0xb18] sm:$0xff] }
 0x301   : > { %4454 = vmatpush1.bf16.msra.mxu1 %v4453_v36  ;;  %v4349_v36 = vpack.c.bf16 %v1452_v32, %v1446_v26  ;;  %v4351_v38 = vpack.c.bf16 %v1465_v29, %v1459_v27  ;;  %v1962_v26 = vld [vmem:[%s6644_s25 + $0x10] sm:$0xff]  ;;  %v1963_v32 = vld [vmem:[%s6644_s25 + $0x18] sm:$0xff]  ;;  %v1980_v29 = vld [vmem:[%s6644_s25 + $0xa0] sm:$0xff] }
 0x302   : > { %4456 = vmatprep.subr.bf16.mxu1 %v4455_v37  ;;  %v1451_v37 = vld [vmem:[#allocation6 + $0xaa8] sm:$0xff]  ;;  %v4497_v27 = vpack.c.bf16 %v1963_v32, %v1962_v26  ;;  %v6187_v26 = vsub.s32 2, %v5957_v40  ;;  %v6189_v32 = vld [vmem:[#allocation12 + $0x3] sm:$0x3f] }
 0x303   : > { %4334 = vmatpush1.bf16.msra.mxu0 %v4333_v42  ;;  %v1458_v42 = vld [vmem:[#allocation6 + $0xae0] sm:$0xff]  ;;  %v4475_v49 = vpack.c.bf16 %v1457_v31, %v1451_v37  ;;  %v1982_v37 = vld [vmem:[%s6644_s25 + $0xb0] sm:$0xff]  ;;  %v1983_v31 = vld [vmem:[%s6644_s25 + $0xb8] sm:$0xff] }
 0x304   : > { %4336 = vmatprep.subr.bf16.mxu0 %v4335_v47  ;;  %v1477_v47 = vld [vmem:[#allocation6 + $0xb78] sm:$0xff] }
 0x305   : > { %4458 = vmatpush1.bf16.msra.mxu1 %v4457_v52  ;;  %v4353_v52 = vpack.c.bf16 %v1464_v55, %v1458_v42  ;;  %v4355_v56 = vpack.c.bf16 %v1477_v47, %v1471_v46  ;;  %v1966_v42 = vld [vmem:[%s6644_s25 + $0x30] sm:$0xff]  ;;  %v1967_v55 = vld [vmem:[%s6644_s25 + $0x38] sm:$0xff]  ;;  %v1984_v47 = vld [vmem:[%s6644_s25 + $0xc0] sm:$0xff] }
 0x306   : > { %4460 = vmatprep.subr.bf16.mxu1 %v4459_v44  ;;  %v1463_v44 = vld [vmem:[#allocation6 + $0xb08] sm:$0xff]  ;;  %v4505_v46 = vpack.c.bf16 %v1967_v55, %v1966_v42 }
 0x307   : > { %4338 = vmatpush1.bf16.msra.mxu0 %v4337_v53  ;;  %v1470_v53 = vld [vmem:[#allocation6 + $0xb40] sm:$0xff]  ;;  %v4479_v63 = vpack.c.bf16 %v1469_v54, %v1463_v44  ;;  %v1986_v44 = vld [vmem:[%s6644_s25 + $0xd0] sm:$0xff]  ;;  %v1987_v54 = vld [vmem:[%s6644_s25 + $0xd8] sm:$0xff] }
 0x308   : > { %4340 = vmatprep.subr.bf16.mxu0 %v4339_v60  ;;  %v1489_v60 = vld [vmem:[#allocation6 + $0xbd8] sm:$0xff] }
 0x309   : > { %4462 = vmatpush1.bf16.msra.mxu1 %v4461_v3  ;;  %v4357_v3 = vpack.c.bf16 %v1476_v57, %v1470_v53  ;;  %v4359_v8 = vpack.c.bf16 %v1489_v60, %v1483_v59  ;;  %v1970_v53 = vld [vmem:[%s6644_s25 + $0x50] sm:$0xff]  ;;  %v1971_v57 = vld [vmem:[%s6644_s25 + $0x58] sm:$0xff]  ;;  %v1988_v60 = vld [vmem:[%s6644_s25 + $0xe0] sm:$0xff] }
 0x30a   : > { %4464 = vmatprep.subr.bf16.mxu1 %v4463_v4  ;;  %v1475_v4 = vld [vmem:[#allocation6 + $0xb68] sm:$0xff]  ;;  %v4513_v59 = vpack.c.bf16 %v1971_v57, %v1970_v53 }
 0x30b   : > { %4342 = vmatpush1.bf16.msra.mxu0 %v4341_v9  ;;  %v1482_v9 = vld [vmem:[#allocation6 + $0xba0] sm:$0xff] }
 0x30c   : > { %4344 = vmatprep.subr.bf16.mxu0 %v4343_v5  ;;  %v4483_v5 = vpack.c.bf16 %v1481_v7, %v1475_v4  ;;  %v4361_v12 = vpack.c.bf16 %v1488_v10, %v1482_v9  ;;  %v1990_v4 = vld [vmem:[%s6644_s25 + $0xf0] sm:$0xff]  ;;  %v1991_v7 = vld [vmem:[%s6644_s25 + $0xf8] sm:$0xff] }
 0x30d   : > { %4466 = vmatpush1.bf16.msra.mxu1 %v4465_v18  ;;  %v1493_v18 = vld [vmem:[#allocation6 + $0xbf8] sm:$0xff]  ;;  %v1974_v9 = vld [vmem:[%s6644_s25 + $0x70] sm:$0xff] }
 0x30e   : > { %4468 = vmatprep.subr.bf16.mxu1 %v4467_v20  ;;  %v4485_v20 = vpack.c.bf16 %v1480_v14, %v1474_v13  ;;  %v4487_v21 = vpack.c.bf16 %v1493_v18, %v1487_v15  ;;  %v1975_v10 = vld [vmem:[%s6644_s25 + $0x78] sm:$0xff]  ;;  %v2096_v15 = vld [vmem:[%s534_s28] sm:$0xff]  ;;  %v2098_v18 = vld [vmem:[%s534_s28 + $0x10] sm:$0xff] }
 0x30f   : > { %4346 = vmatpush1.bf16.msra.mxu0 %v4345_v23  ;;  %v1492_v23 = vld [vmem:[#allocation6 + $0xbf0] sm:$0xff]  ;;  %2104 = vrot.lane.b32.xlu0 %v2096_v15, %s5597_s17 }
 0x310   : > { %4348 = vmatprep.subr.bf16.mxu0 %v4347_v25  ;;  %v4489_v24 = vpack.c.bf16 %v1492_v23, %v1486_v22  ;;  %2108 = vrot.lane.b32.xlu1 %v2098_v18, %s5597_s17 }
 0x311   : > { %4470 = vmatpush1.bf16.msra.mxu1 %v4469_v30  ;;  %v1981_v30 = vld [vmem:[%s6644_s25 + $0xa8] sm:$0xff] }
 0x312   : > { %4472 = vmatprep.subr.bf16.mxu1 %v4471_v33  ;;  %v4499_v33 = vpack.c.bf16 %v1981_v30, %v1980_v29  ;;  %v6194_v29 = vsub.s32 3, %v5957_v40  ;;  %v1016_v30 = vrot.slane %v6189_v32, %v6187_v26 }
 0x313   : > { %4350 = vmatpush1.bf16.msra.mxu0 %v4349_v36  ;;  %v4501_v36 = vpack.c.bf16 %v1965_v35, %v1964_v34 }
 0x314   : > { %4352 = vmatprep.subr.bf16.mxu0 %v4351_v38  ;;  %v4503_v38 = vpack.c.bf16 %v1983_v31, %v1982_v37  ;;  %v1020_v34 = vrot.slane %v6189_v32, %v6194_v29  ;;  %v1012_v31 = vrot.slane %v6189_v32, %v5963_v43 }
 0x315   : > { %4474 = vmatpush1.bf16.msra.mxu1 %v4473_v48  ;;  %v1985_v48 = vld [vmem:[%s6644_s25 + $0xc8] sm:$0xff] }
 0x316   : > { %4476 = vmatprep.subr.bf16.mxu1 %v4475_v49  ;;  %v4507_v49 = vpack.c.bf16 %v1985_v48, %v1984_v47 }
 0x317   : > { %4354 = vmatpush1.bf16.msra.mxu0 %v4353_v52  ;;  %v4509_v52 = vpack.c.bf16 %v1969_v51, %v1968_v50 }
 0x318   : > { %4356 = vmatprep.subr.bf16.mxu0 %v4355_v56  ;;  %v4511_v56 = vpack.c.bf16 %v1987_v54, %v1986_v44 }
 0x319   : > { %4478 = vmatpush1.bf16.msra.mxu1 %v4477_v61  ;;  %v1989_v61 = vld [vmem:[%s6644_s25 + $0xe8] sm:$0xff] }
 0x31a   : > { %4480 = vmatprep.subr.bf16.mxu1 %v4479_v63  ;;  %v4515_v63 = vpack.c.bf16 %v1989_v61, %v1988_v60 }
 0x31b   : > { %4358 = vmatpush1.bf16.msra.mxu0 %v4357_v3  ;;  %v4517_v3 = vpack.c.bf16 %v1973_v2, %v1972_v1 }
 0x31c   : > { %4360 = vmatprep.subr.bf16.mxu0 %v4359_v8  ;;  %v4519_v8 = vpack.c.bf16 %v1991_v7, %v1990_v4 }
 0x31d   : > { %4482 = vmatpush1.bf16.msra.mxu1 %v4481_v0  ;;  %v4521_v0 = vpack.c.bf16 %v1975_v10, %v1974_v9 }
 0x31e   : > { %4484 = vmatprep.subr.bf16.mxu1 %v4483_v5 }
 0x31f   : > { %4362 = vmatpush1.bf16.msra.mxu0 %v4361_v12 }
 0x321   : > { %4486 = vmatpush1.bf16.msra.mxu1 %v4485_v20  ;;  %v2097_v20 = vld [vmem:[%s534_s28 + $0x8] sm:$0xff] }
 0x322   : > { %1590 = vmatmul.mubr.f32.vlgmr.msra.gmra.mrb[4].mxu0 %v6017_v45  ;;  %4488 = vmatprep.subr.bf16.mxu1 %v4487_v21  ;;  %v2099_v21 = vld [vmem:[%s534_s28 + $0x18] sm:$0xff] }
 0x323   : > { %1595 = vmatprep.mubr.f32.mxu0 %v6020_v62  ;;  %2106 = vrot.lane.b32.xlu0 %v2097_v20, %s5597_s17 }
 0x324   : > { %2110 = vrot.lane.b32.xlu1 %v2099_v21, %s5597_s17 }
 0x325   : > { %4490 = vmatpush1.bf16.msra.mxu1 %v4489_v24 }
 0x326   : > { %1596 = vmatmul.mubr.f32.gmra.mrb[6].mxu0 %v6026_v6 }
 0x327   : > { %1601 = vmatprep.mubr.f32.mxu0 %v6030_v11 }
 0x328   : > { %1768 = vmatmul.mubr.f32.vlgmr.msra.gmra.mrb[16].mxu1 %v6017_v45  ;;  %v1976_v45 = vld [vmem:[%s6644_s25 + $0x80] sm:$0xff] }
 0x329   : > { %1773 = vmatprep.mubr.f32.mxu1 %v6020_v62  ;;  %v1977_v62 = vld [vmem:[%s6644_s25 + $0x88] sm:$0xff] }
 0x32a   : > { %1602 = vmatmul.mubr.f32.gmra.mrb[8].mxu0 %v6036_v17 }
 0x32b   : > { %1607 = vmatprep.mubr.f32.mxu0 %v6040_v19 }
 0x32c   : > { %1774 = vmatmul.mubr.f32.gmra.mrb[18].mxu1 %v6026_v6  ;;  %v4491_v6 = vpack.c.bf16 %v1977_v62, %v1976_v45 }
 0x32d   : > { %1779 = vmatprep.mubr.f32.mxu1 %v6030_v11  ;;  %v1960_v11 = vld [vmem:[%s6644_s25] sm:$0xff] }
 0x32e   : > { %1608 = vmatmul.mubr.f32.gmra.mrb[10].mxu0 %v6046_v28  ;;  %4492 = vmatprep.subr.bf16.mxu0 %v4491_v6 }
 0x330   : > { %1780 = vmatmul.mubr.f32.gmra.mrb[20].mxu1 %v6036_v17  ;;  %v1961_v17 = vld [vmem:[%s6644_s25 + $0x8] sm:$0xff] }
 0x331   : > { %1785 = vmatprep.mubr.f32.mxu1 %v6040_v19  ;;  %v4493_v19 = vpack.c.bf16 %v1961_v17, %v1960_v11 }
 0x333   : > { %4494 = vmatpush3.bf16.msra.mxu0 %v4493_v19 }
 0x334   : > { %1786 = vmatmul.mubr.f32.gmra.mrb[22].mxu1 %v6046_v28  ;;  %v1978_v28 = vld [vmem:[%s6644_s25 + $0x90] sm:$0xff] }
 0x335   : > { %2263 = vmatprep.mubr.f32.mxu1 %v5596_v16  ;;  %v4495_v25 = vpack.c.bf16 %v1979_v58, %v1978_v28 }
 0x337   : > { %4496 = vmatprep.subr.bf16.mxu0 %v4495_v25 }
 0x338   : > { %4498 = vmatpush3.bf16.msra.mxu0 %v4497_v27  ;;  %v6191_v27 = vld [vmem:[#allocation12 + $0x9] sm:$0x3f] }
 0x339   : > { %4500 = vmatprep.subr.bf16.mxu0 %v4499_v33  ;;  %v1506_v33 = vrot.slane %v6191_v27, %v6187_v26  ;;  %v1510_v35 = vrot.slane %v6191_v27, %v6194_v29  ;;  %v1498_v37 = vrot.slane %v6191_v27, %v5960_v41 }
 0x33b   : > { %v4939_v42 = vadd.f32 %v1506_v33, %v1016_v30  ;;  %v6212_v55 = vadd.f32 %v1510_v35, %v1020_v34 }
 0x33c   : > { %4502 = vmatpush3.bf16.msra.mxu0 %v4501_v36  ;;  %v1008_v36 = vrot.slane %v6189_v32, %v5960_v41 }
 0x33d   : > { %4504 = vmatprep.subr.bf16.mxu0 %v4503_v38  ;;  %v1502_v38 = vrot.slane %v6191_v27, %v5963_v43 }
 0x33f   : > { %v4925_v47 = vadd.f32 %v1502_v38, %v1012_v31 }
 0x340   : > { %4506 = vmatpush3.bf16.msra.mxu0 %v4505_v46  ;;  %v4923_v46 = vadd.f32 %v1498_v37, %v1008_v36 }
 0x341   : > { %4508 = vmatprep.subr.bf16.mxu0 %v4507_v49 }
 0x344   : > { %4510 = vmatpush3.bf16.msra.mxu0 %v4509_v52 }
 0x345   : > { %4512 = vmatprep.subr.bf16.mxu0 %v4511_v56 }
 0x348   : > { %4514 = vmatpush3.bf16.msra.mxu0 %v4513_v59 }
 0x349   : > { %4516 = vmatprep.subr.bf16.mxu0 %v4515_v63 }
 0x34c   : > { %4518 = vmatpush3.bf16.msra.mxu0 %v4517_v3 }
 0x34d   : > { %4520 = vmatprep.subr.bf16.mxu0 %v4519_v8 }
 0x350   : > { %4522 = vmatpush3.bf16.msra.mxu0 %v4521_v0 }
 0x3b5   : > { %v6164_v5 = vpop.f32.mrb[12].mxu0  ;;  %v1680_v13 = vpop.f32.mrb[8].mxu1 }
 0x3b6   : > { %v6170_v14 = vpop.f32.mrb[13].mxu0  ;;  %v1682_v12 = vpop.f32.mrb[9].mxu1  ;;  %v4940_v48 = vadd.f32 %v4939_v42, %v1680_v13 }
 0x3b7   : > { %v4942_v49 = vadd.f32 %v6212_v55, %v1682_v12 }
 0x3b8   : > { %v3899_v54 = vmul.f32 -1.442695, %v4940_v48 }
 0x3b9   : > { %v6172_v22 = vpop.f32.mrb[14].mxu0  ;;  %v1686_v23 = vpop.f32.mrb[10].mxu1  ;;  %v3900_v57 = vmul.f32 -1.442695, %v4942_v49 }
 0x3ba   : > { %v6174_v24 = vpop.f32.mrb[15].mxu0  ;;  %v1688_v45 = vpop.f32.mrb[11].mxu1  ;;  %v4944_v56 = vadd.f32 %v4939_v42, %v1686_v23 }
 0x3bb   : > { %v4946_v59 = vadd.f32 %v6212_v55, %v1688_v45 }
 0x3bc   : > { %v3901_v4 = vmul.f32 -1.442695, %v4944_v56 }
 0x3bd   : > { %v6176_v62 = vpop.f32.mrb[16].mxu0  ;;  %v1692_v6 = vpop.f32.mrb[12].mxu1  ;;  %v3902_v10 = vmul.f32 -1.442695, %v4946_v59 }
 0x3be   : > { %v6178_v11 = vpop.f32.mrb[17].mxu0  ;;  %v1694_v17 = vpop.f32.mrb[13].mxu1  ;;  %v4948_v7 = vadd.f32 %v4939_v42, %v1692_v6 }
 0x3bf   : > { %v4950_v0 = vadd.f32 %v6212_v55, %v1694_v17 }
 0x3c0   : > { %v3903_v23 = vmul.f32 -1.442695, %v4948_v7 }
 0x3c1   : > { %v6180_v19 = vpop.f32.mrb[18].mxu0  ;;  %v1698_v28 = vpop.f32.mrb[14].mxu1  ;;  %v3904_v30 = vmul.f32 -1.442695, %v4950_v0 }
 0x3c2   : > { %v6182_v58 = vpop.f32.mrb[19].mxu0  ;;  %v6184_v25 = vpop.f32.mrb[15].mxu1  ;;  %v4952_v35 = vadd.f32 %v4939_v42, %v1698_v28 }
 0x3c3   : > { %v4954_v28 = vadd.f32 %v6212_v55, %v6184_v25 }
 0x3c5   : > { %v3906_v55 = vmul.f32 -1.442695, %v4954_v28 }
 0x3f5   : > { %v1591_v50 = vpop.f32.mrb[4].mxu0 }
 0x3f6   : > { %v4924_v51 = vadd.f32 %v4923_v46, %v1591_v50  ;;  %v1593_v52 = vpop.f32.mrb[5].mxu0 }
 0x3f7   : > { %v4926_v44 = vadd.f32 %v4925_v47, %v1593_v52 }
 0x3f8   : > { %v3891_v53 = vmul.f32 -1.442695, %v4924_v51 }
 0x3f9   : > { %v3892_v60 = vmul.f32 -1.442695, %v4926_v44  ;;  %v1597_v61 = vpop.f32.mrb[6].mxu0 }
 0x3fa   : > { %5140 = vpow2.f32 %v3891_v53  ;;  %v4928_v63 = vadd.f32 %v4923_v46, %v1597_v61  ;;  %v1599_v1 = vpop.f32.mrb[7].mxu0  ;;  %v6234_v53 = vsub.s32 4, %v5957_v40  ;;  %v6239_v61 = vsub.s32 5, %v5957_v40 }
 0x3fb   : > { %5142 = vpow2.f32 %v3892_v60  ;;  %v4930_v2 = vadd.f32 %v4925_v47, %v1599_v1  ;;  %v6216_v3 = vpop.f32.mrb[16].mxu1 }
 0x3fc   : > { %5144 = vpow2.f32 %v3899_v54  ;;  %v3893_v8 = vmul.f32 -1.442695, %v4928_v63  ;;  %v6218_v9 = vpop.f32.mrb[17].mxu1  ;;  %v3905_v54 = vmul.f32 -1.442695, %v4952_v35  ;;  %v6247_v7 = vrot.slane %v6191_v27, %v6239_v61 }
 0x3fd   : > { %5146 = vpow2.f32 %v3900_v57  ;;  %v3894_v13 = vmul.f32 -1.442695, %v4930_v2  ;;  %v1603_v12 = vpop.f32.mrb[8].mxu0  ;;  %v6243_v2 = vrot.slane %v6191_v27, %v6234_v53  ;;  %v6251_v0 = vrot.slane %v6189_v32, %v6234_v53 }
 0x3fe   : > { %5148 = vpow2.f32 %v3893_v8  ;;  %v4932_v15 = vadd.f32 %v4923_v46, %v1603_v12  ;;  %v1605_v18 = vpop.f32.mrb[9].mxu0  ;;  %v6257_v27 = vrot.slane %v6189_v32, %v6239_v61 }
 0x3ff   : > { %5150 = vpow2.f32 %v3894_v13  ;;  %v4934_v20 = vadd.f32 %v4925_v47, %v1605_v18  ;;  %v6221_v21 = vpop.f32.mrb[18].mxu1 }
 0x400   : > { %5152 = vpow2.f32 %v3901_v4  ;;  %v3895_v45 = vmul.f32 -1.442695, %v4932_v15  ;;  %v6223_v6 = vpop.f32.mrb[19].mxu1  ;;  %v1776_v32 = vadd.f32 %v6221_v21, %v6243_v2  ;;  %v1286_v21 = vadd.f32 %v6172_v22, %v6251_v0 }
 0x401   : > { %5154 = vpow2.f32 %v3902_v10  ;;  %v3896_v33 = vmul.f32 -1.442695, %v4934_v20  ;;  %v1609_v34 = vpop.f32.mrb[10].mxu0 }
 0x402   : > { %5156 = vpow2.f32 %v3895_v45  ;;  %v4936_v17 = vadd.f32 %v4923_v46, %v1609_v34  ;;  %v1611_v36 = vpop.f32.mrb[11].mxu0 }
 0x403   : > { %5158 = vpow2.f32 %v3896_v33  ;;  %v4938_v37 = vadd.f32 %v4925_v47, %v1611_v36  ;;  %v6225_v31 = vpop.f32.mrb[20].mxu1 }
 0x404   : > { %v5141_v38 = vpop.eup %5140  ;;  %5160 = vpow2.f32 %v3903_v23  ;;  %v3897_v48 = vmul.f32 -1.442695, %v4936_v17  ;;  %v6227_v49 = vpop.f32.mrb[21].mxu1  ;;  %v1770_v23 = vadd.f32 %v6216_v3, %v6243_v2  ;;  %v1280_v3 = vadd.f32 %v6164_v5, %v6251_v0 }
 0x405   : > { %v5143_v50 = vpop.eup %5142  ;;  %5162 = vpow2.f32 %v3904_v30  ;;  %v1824_v51 = vadd.f32 1.0, %v5141_v38  ;;  %v3898_v52 = vmul.f32 -1.442695, %v4938_v37  ;;  %v1772_v30 = vadd.f32 %v6218_v9, %v6247_v7 }
 0x406   : > { %v5145_v44 = vpop.eup %5144  ;;  %v1825_v42 = vadd.f32 1.0, %v5143_v50  ;;  %5164 = vpow2.f32 %v3897_v48  ;;  %v1282_v9 = vadd.f32 %v6170_v14, %v6257_v27  ;;  %v1782_v14 = vadd.f32 %v6225_v31, %v6243_v2 }
 0x407   : > { %v5147_v46 = vpop.eup %5146  ;;  %5166 = vrcp.f32 %v1824_v51  ;;  %v6231_v47 = vpop.f32.mrb[22].mxu1  ;;  %v1880_v60 = vadd.f32 1.0, %v5145_v44  ;;  %v1778_v51 = vadd.f32 %v6223_v6, %v6247_v7  ;;  %v1288_v6 = vadd.f32 %v6174_v24, %v6257_v27 }
 0x408   : > { %v5149_v56 = vpop.eup %5148  ;;  %5168 = vrcp.f32 %v1825_v42  ;;  %v6236_v57 = vpop.f32.mrb[23].mxu1  ;;  %v1881_v13 = vadd.f32 1.0, %v5147_v46  ;;  %v1292_v31 = vadd.f32 %v6176_v62, %v6251_v0  ;;  %v1788_v24 = vadd.f32 %v6231_v47, %v6243_v2 }
 0x409   : > { %v5151_v59 = vpop.eup %5150  ;;  %v1826_v63 = vadd.f32 1.0, %v5149_v56  ;;  %5170 = vpow2.f32 %v3898_v52  ;;  %v1790_v62 = vadd.f32 %v6236_v57, %v6247_v7  ;;  %v1298_v47 = vadd.f32 %v6180_v19, %v6251_v0 }
 0x40a   : > { %v5153_v25 = vpop.eup %5152  ;;  %5172 = vpow2.f32 %v3905_v54  ;;  %v1827_v1 = vadd.f32 1.0, %v5151_v59 }
 0x40b   : > { %v5155_v4 = vpop.eup %5154  ;;  %5174 = vrcp.f32 %v1826_v63  ;;  %v1882_v18 = vadd.f32 1.0, %v5153_v25  ;;  %v1784_v63 = vadd.f32 %v6227_v49, %v6247_v7  ;;  %v1294_v49 = vadd.f32 %v6178_v11, %v6257_v27 }
 0x40c   : > { %v5157_v8 = vpop.eup %5156  ;;  %5176 = vrcp.f32 %v1827_v1  ;;  %v1883_v34 = vadd.f32 1.0, %v5155_v4 }
 0x40d   : > { %v5159_v10 = vpop.eup %5158  ;;  %5178 = vrcp.f32 %v1880_v60  ;;  %v1828_v12 = vadd.f32 1.0, %v5157_v8 }
 0x40e   : > { %v5161_v15 = vpop.eup %5160  ;;  %5180 = vpow2.f32 %v3906_v55  ;;  %v1829_v20 = vadd.f32 1.0, %v5159_v10 }
 0x40f   : > { %v5163_v45 = vpop.eup %5162  ;;  %5182 = vrcp.f32 %v1828_v12  ;;  %v1884_v17 = vadd.f32 1.0, %v5161_v15 }
 0x410   : > { %v5165_v33 = vpop.eup %5164  ;;  %5184 = vrcp.f32 %v1829_v20  ;;  %v1885_v5 = vadd.f32 1.0, %v5163_v45 }
 0x411   : > { %v5167_v35 = vpop.eup %5166  ;;  %5186 = vrcp.f32 %v1881_v13  ;;  %v1830_v36 = vadd.f32 1.0, %v5165_v33 }
 0x412   : > { %v5169_v37 = vpop.eup %5168  ;;  %5188 = vrcp.f32 %v1882_v18  ;;  %v1904_v38 = vmul.f32 %v5167_v35, %v1770_v23 }
 0x413   : > { %v5171_v48 = vpop.eup %5170  ;;  %5190 = vrcp.f32 %v1830_v36  ;;  %v1905_v50 = vmul.f32 %v5169_v37, %v1772_v30  ;;  %v1300_v37 = vadd.f32 %v6182_v58, %v6257_v27 }
 0x414   : > { %v5173_v52 = vpop.eup %5172  ;;  %5192 = vrcp.f32 %v1883_v34  ;;  %v1831_v44 = vadd.f32 1.0, %v5171_v48  ;;  %v1912_v54 = vadd.f32 %v1904_v38, %v1280_v3  ;;  %v5316_v3 = vld [vmem:[%s5907_s1] sm:$0xff] }
 0x415   : > { %v5175_v28 = vpop.eup %5174  ;;  %5194 = vrcp.f32 %v1884_v17  ;;  %v1913_v42 = vadd.f32 %v1905_v50, %v1282_v9  ;;  %v1886_v22 = vadd.f32 1.0, %v5173_v52 }
 0x416   : > { %v5177_v46 = vpop.eup %5176  ;;  %5196 = vrcp.f32 %v1831_v44  ;;  %v1906_v56 = vmul.f32 %v5175_v28, %v1776_v32  ;;  %v5317_v32 = vld [vmem:[%s5907_s1 + $0x8] sm:$0xff] }
 0x417   : > { %v5179_v59 = vpop.eup %5178  ;;  %5198 = vtanh.f32 %v1912_v54  ;;  %v1907_v60 = vmul.f32 %v5177_v46, %v1778_v51  ;;  %v5318_v54 = vld [vmem:[%s5907_s1 + $0x10] sm:$0xff]  ;;  %v5319_v46 = vld [vmem:[%s5907_s1 + $0x18] sm:$0xff] }
 0x418   : > { %v5181_v25 = vpop.eup %5180  ;;  %5200 = vtanh.f32 %v1913_v42  ;;  %v1914_v55 = vadd.f32 %v1906_v56, %v1286_v21  ;;  %v1928_v34 = vsub.f32 1.0, %v5179_v59  ;;  %v1944_v19 = vmul.f32 %v5316_v3, %v5179_v59 }
 0x419   : > { %v5183_v1 = vpop.eup %5182  ;;  %5202 = vrcp.f32 %v1885_v5  ;;  %v1915_v4 = vadd.f32 %v1907_v60, %v1288_v6  ;;  %v1887_v23 = vadd.f32 1.0, %v5181_v25 }
 0x41a   : > { %v5185_v8 = vpop.eup %5184  ;;  %5204 = vtanh.f32 %v1914_v55  ;;  %v1908_v10 = vmul.f32 %v5183_v1, %v1782_v14  ;;  %v5320_v1 = vld [vmem:[%s5907_s1 + $0x20] sm:$0xff] }
 0x41b   : > { %v5187_v13 = vpop.eup %5186  ;;  %5206 = vtanh.f32 %v1915_v4  ;;  %v1909_v12 = vmul.f32 %v5185_v8, %v1784_v63  ;;  %v5321_v8 = vld [vmem:[%s5907_s1 + $0x28] sm:$0xff] }
 0x41c   : > { %v5189_v15 = vpop.eup %5188  ;;  %v1916_v18 = vadd.f32 %v1908_v10, %v1292_v31  ;;  %5208 = vrcp.f32 %v1886_v22  ;;  %v1929_v36 = vsub.f32 1.0, %v5187_v13  ;;  %v1945_v48 = vmul.f32 %v5317_v32, %v5187_v13 }
 0x41d   : > { %v5191_v20 = vpop.eup %5190  ;;  %v1917_v45 = vadd.f32 %v1909_v12, %v1294_v49  ;;  %v1930_v9 = vsub.f32 1.0, %v5189_v15  ;;  %v1946_v28 = vmul.f32 %v5318_v54, %v5189_v15 }
 0x41e   : > { %v5193_v30 = vpop.eup %5192  ;;  %5210 = vtanh.f32 %v1916_v18  ;;  %v1910_v2 = vmul.f32 %v5191_v20, %v1788_v24  ;;  %v5322_v18 = vld [vmem:[%s5907_s1 + $0x30] sm:$0xff] }
 0x41f   : > { %v5195_v33 = vpop.eup %5194  ;;  %5212 = vtanh.f32 %v1917_v45  ;;  %v1931_v51 = vsub.f32 1.0, %v5193_v30  ;;  %v1947_v21 = vmul.f32 %v5319_v46, %v5193_v30 }
 0x420   : > { %v5197_v11 = vpop.eup %5196  ;;  %v1918_v35 = vadd.f32 %v1910_v2, %v1298_v47  ;;  %5214 = vrcp.f32 %v1887_v23  ;;  %v1932_v59 = vsub.f32 1.0, %v5195_v33  ;;  %v1948_v22 = vmul.f32 %v5320_v1, %v5195_v33  ;;  %v5323_v47 = vld [vmem:[%s5907_s1 + $0x38] sm:$0xff]  ;;  %s5599_s1 = smov 112  }
 0x421   : > { %v5199_v17 = vpop.eup %5198  ;;  %v1911_v57 = vmul.f32 %v5197_v11, %v1790_v62 }
 0x422   : > { %v5201_v7 = vpop.eup %5200  ;;  %v1936_v0 = vmul.f32 %v5199_v17, %v1928_v34  ;;  %5216 = vtanh.f32 %v1918_v35  ;;  %v5598_v34 = vmov 48   ;;  %v2175_v35 = vld [vmem:[#allocation7 + $0x8] sm:$0xff]  ;;  %v2177_v17 = vld [vmem:[#allocation7 + $0x18] sm:$0xff] }
 0x423   : > { %v5203_v38 = vpop.eup %5202  ;;  %v1937_v58 = vmul.f32 %v5201_v7, %v1929_v36  ;;  %v1919_v27 = vadd.f32 %v1911_v57, %v1300_v37  ;;  %5137 = vset.pattern.permute.xlu1 %v5598_v34  ;;  %5136 = vset.pattern.permute.xlu0 %v5598_v34  ;;  %v2174_v36 = vld [vmem:[#allocation7] sm:$0xff]  ;;  %v4523_v37 = vpack.c.bf16 %v2177_v17, %v2175_v35  ;;  %v2176_v57 = vld [vmem:[#allocation7 + $0x10] sm:$0xff] }
 0x424   : > { %v5205_v50 = vpop.eup %5204  ;;  %v1952_v52 = vadd.f32 %v1944_v19, %v1936_v0  ;;  %v1933_v63 = vsub.f32 1.0, %v5203_v38  ;;  %v1949_v31 = vmul.f32 %v5321_v8, %v5203_v38  ;;  %v4525_v7 = vpack.c.bf16 %v2176_v57, %v2174_v36  ;;  %v3907_v19 = vld [vmem:[#allocation12 + $0x1d] ss:$0 sm:$0xff]  ;;  %v2290_v34 = vld [vmem:[#allocation6 + $0xc00] sm:$0xff]  ;;  %v2296_v35 = vld [vmem:[#allocation6 + $0xc30] sm:$0xff] }
 0x425   : > { %v5207_v44 = vpop.eup %5206  ;;  %v1938_v5 = vmul.f32 %v5205_v50, %v1930_v9  ;;  %5218 = vtanh.f32 %v1919_v27  ;;  %v1953_v42 = vadd.f32 %v1945_v48, %v1937_v58  ;;  %4524 = vmatprep.subr.bf16.mxu1 %v4523_v37  ;;  %v4529_v37 = vpack.c.bf16 %v2296_v35, %v2290_v34  ;;  %v2292_v57 = vld [vmem:[#allocation6 + $0xc10] sm:$0xff] }
 0x426   : > { %v1939_v56 = vmul.f32 %v5207_v44, %v1931_v51  ;;  %2140 = vst [vmem:[%s6294_s11] sm:$0xff] %v1952_v52  ;;  %v5209_v14 = vpop.eup %5208  ;;  %4526 = vmatpush1.bf16.msra.mxu1 %v4525_v7  ;;  %v2298_v7 = vld [vmem:[#allocation6 + $0xc40] sm:$0xff]  ;;  %v2340_v35 = vld [vmem:[#allocation6 + $0xd90] sm:$0xff] }
 0x427   : > { %2063 = vmatprep.mubr.f32.mxu0 %v1953_v42  ;;  %2141 = vst [vmem:[%s6294_s11 + $0x8] sm:$0xff] %v1953_v42  ;;  %v1954_v6 = vadd.f32 %v1946_v28, %v1938_v5  ;;  %v1934_v13 = vsub.f32 1.0, %v5209_v14  ;;  %v1950_v20 = vmul.f32 %v5322_v18, %v5209_v14  ;;  %v3439_v18 = vld [vmem:[#allocation9 + $0x8] sm:$0xff] }
 0x428   : > { %v5211_v60 = vpop.eup %5210  ;;  %2064 = vmatmul.mubr.f32.vlgmr.msra.gmra.mrb[20].mxu0 %v1952_v52  ;;  %v1955_v25 = vadd.f32 %v1947_v21, %v1939_v56 }
 0x429   : > { %v5213_v55 = vpop.eup %5212  ;;  %v1940_v4 = vmul.f32 %v5211_v60, %v1932_v59  ;;  %2142 = vst [vmem:[%s6294_s11 + $0x18] sm:$0xff] %v1954_v6 }
 0x42a   : > { %v1941_v10 = vmul.f32 %v5213_v55, %v1933_v63  ;;  %2068 = vmatprep.mubr.f32.mxu0 %v1955_v25  ;;  %2143 = vst [vmem:[%s6294_s11 + $0x20] sm:$0xff] %v1955_v25  ;;  %v5215_v24 = vpop.eup %5214 }
 0x42b   : > { %v1956_v49 = vadd.f32 %v1948_v22, %v1940_v4  ;;  %v1935_v45 = vsub.f32 1.0, %v5215_v24  ;;  %v1951_v2 = vmul.f32 %v5323_v47, %v5215_v24  ;;  %v2293_v47 = vld [vmem:[#allocation6 + $0xc18] sm:$0xff] }
 0x42c   : > { %v5217_v12 = vpop.eup %5216  ;;  %2069 = vmatmul.mubr.f32.gmra.mrb[22].mxu0 %v1954_v6  ;;  %v1957_v15 = vadd.f32 %v1949_v31, %v1941_v10  ;;  %v2105_v6 = vpop.permute.xlu0 %2104 }
 0x42d   : > { %v1942_v23 = vmul.f32 %v5217_v12, %v1934_v13  ;;  %2144 = vst [vmem:[%s6294_s11 + $0x30] sm:$0xff] %v1956_v49  ;;  %v2109_v31 = vpop.permute.xlu1 %2108 }
 0x42e   : > { %2073 = vmatprep.mubr.f32.mxu0 %v1957_v15  ;;  %2145 = vst [vmem:[%s6294_s11 + $0x38] sm:$0xff] %v1957_v15 }
 0x42f   : > { %v5219_v62 = vpop.eup %5218  ;;  %v1958_v30 = vadd.f32 %v1950_v20, %v1942_v23  ;;  %v5601_v20 = vmov 49  }
 0x430   : > { %v1943_v33 = vmul.f32 %v5219_v62, %v1935_v45  ;;  %2074 = vmatmul.mubr.f32.gmra.mrb[24].mxu0 %v1956_v49  ;;  %v2107_v22 = vpop.permute.xlu0 %2106  ;;  %v3438_v49 = vld [vmem:[#allocation9] sm:$0xff]  ;;  %v2291_v62 = vld [vmem:[#allocation6 + $0xc08] sm:$0xff] }
 0x431   : > { %2146 = vst [vmem:[%s6294_s11 + $0x48] sm:$0xff] %v1958_v30  ;;  %v2111_v13 = vpop.permute.xlu1 %2110 }
 0x432   : > { %v1959_v11 = vadd.f32 %v1951_v2, %v1943_v33 }
 0x434   : > { %2078 = vmatprep.mubr.f32.mxu0 %v1959_v11  ;;  %2147 = vst [vmem:[%s6294_s11 + $0x50] sm:$0xff] %v1959_v11  ;;  %v2299_v11 = vld [vmem:[#allocation6 + $0xc48] sm:$0xff] }
 0x435   : > { %2079 = vmatmul.mubr.f32.gmra.mrb[26].mxu0 %v1958_v30  ;;  %v2297_v30 = vld [vmem:[#allocation6 + $0xc38] sm:$0xff]  ;;  %v4591_v36 = vpack.c.bf16 %v2299_v11, %v2293_v47 }
 0x436   : > { %v4527_v33 = vpack.c.bf16 %v2297_v30, %v2291_v62  ;;  %v2341_v62 = vld [vmem:[#allocation6 + $0xd98] sm:$0xff]  ;;  %v2347_v30 = vld [vmem:[#allocation6 + $0xdc8] sm:$0xff] }
 0x437   : > { %4592 = vmatprep.subr.bf16.mxu0 %v4591_v36  ;;  %v4607_v34 = vpack.c.bf16 %v2347_v30, %v2341_v62  ;;  %v2351_v36 = vld [vmem:[#allocation6 + $0xde8] sm:$0xff]  ;;  %v2388_v30 = vld [vmem:[#allocation6 + $0xf10] sm:$0xff] }
 0x438   : > { %4528 = vmatprep.subr.bf16.mxu1 %v4527_v33  ;;  %v2338_v33 = vld [vmem:[#allocation6 + $0xd80] sm:$0xff] }
 0x4fb   : > { %v3993_v3 = vpop.f32.mrb[20].mxu0 }
 0x4fc   : > { %v3994_v0 = vpop.f32.mrb[21].mxu0 }
 0x4fd   : > { %v3995_v38 = vadd.f32 %v3994_v0, %v3993_v3  ;;  %v2303_v3 = vld [vmem:[#allocation6 + $0xc68] sm:$0xff]  ;;  %v2309_v0 = vld [vmem:[#allocation6 + $0xc98] sm:$0xff] }
 0x4ff   : > { %v2066_v32 = vadd.f32 %v3995_v38, %v3907_v19  ;;  %v3996_v48 = vpop.f32.mrb[22].mxu0  ;;  %v2305_v38 = vld [vmem:[#allocation6 + $0xc78] sm:$0xff] }
 0x500   : > { %v3997_v9 = vpop.f32.mrb[23].mxu0 }
 0x501   : > { %v2084_v58 = vmul.f32 0.5, %v2066_v32  ;;  %2149 = vst.msk [vmem:[%s6294_s11 + $0x10] sm:$0xff] %vm2148_vm0, %v2066_v32  ;;  %v3998_v27 = vadd.f32 %v3997_v9, %v3996_v48  ;;  %v4531_v48 = vpack.c.bf16 %v2309_v0, %v2303_v3  ;;  %v2350_v0 = vld [vmem:[#allocation6 + $0xde0] sm:$0xff] }
 0x503   : > { %v2088_v50 = vmul.f32 1.442695, %v2084_v58  ;;  %v6313_v51 = vadd.f32 %v3998_v27, %v3907_v19  ;;  %v3999_v52 = vpop.f32.mrb[24].mxu0  ;;  %v2302_v58 = vld [vmem:[#allocation6 + $0xc60] sm:$0xff]  ;;  %v2308_v27 = vld [vmem:[#allocation6 + $0xc90] sm:$0xff] }
 0x504   : > { %v4000_v44 = vpop.f32.mrb[25].mxu0 }
 0x505   : > { %5220 = vpow2.f32 %v2088_v50  ;;  %v2085_v54 = vmul.f32 0.5, %v6313_v51  ;;  %2150 = vst.msk [vmem:[%s6294_s11 + $0x28] sm:$0xff] %vm2148_vm0, %v6313_v51  ;;  %v4001_v28 = vadd.f32 %v4000_v44, %v3999_v52  ;;  %v2304_v50 = vld [vmem:[#allocation6 + $0xc70] sm:$0xff]  ;;  %v2310_v52 = vld [vmem:[#allocation6 + $0xca0] sm:$0xff]  ;;  %v2315_v44 = vld [vmem:[#allocation6 + $0xcc8] sm:$0xff] }
 0x507   : > { %v2090_v5 = vmul.f32 1.442695, %v2085_v54  ;;  %v6319_v42 = vadd.f32 %v4001_v28, %v3907_v19  ;;  %v2321_v54 = vld [vmem:[#allocation6 + $0xcf8] sm:$0xff] }
 0x508   : > { %v4002_v46 = vpop.f32.mrb[26].mxu0 }
 0x509   : > { %5222 = vpow2.f32 %v2090_v5  ;;  %v2086_v21 = vmul.f32 0.5, %v6319_v42  ;;  %2151 = vst.msk [vmem:[%s6294_s11 + $0x40] sm:$0xff] %vm2148_vm0, %v6319_v42  ;;  %v4003_v56 = vpop.f32.mrb[27].mxu0  ;;  %v4533_v5 = vpack.c.bf16 %v2308_v27, %v2302_v58  ;;  %v2358_v58 = vld [vmem:[#allocation6 + $0xe20] sm:$0xff]  ;;  %v2363_v27 = vld [vmem:[#allocation6 + $0xe48] sm:$0xff] }
 0x50a   : > { %v4004_v14 = vadd.f32 %v4003_v56, %v4002_v46  ;;  %v4597_v46 = vpack.c.bf16 %v2310_v52, %v2304_v50  ;;  %v2323_v56 = vld [vmem:[#allocation6 + $0xd08] sm:$0xff]  ;;  %v2369_v50 = vld [vmem:[#allocation6 + $0xe78] sm:$0xff] }
 0x50b   : > { %v2092_v59 = vmul.f32 1.442695, %v2086_v21  ;;  %v2317_v21 = vld [vmem:[#allocation6 + $0xcd8] sm:$0xff]  ;;  %v2371_v52 = vld [vmem:[#allocation6 + $0xe88] sm:$0xff] }
 0x50c   : > { %v6325_v60 = vadd.f32 %v4004_v14, %v3907_v19  ;;  %v4593_v19 = vpack.c.bf16 %v2298_v7, %v2292_v57  ;;  %v2314_v14 = vld [vmem:[#allocation6 + $0xcc0] sm:$0xff]  ;;  %v2353_v57 = vld [vmem:[#allocation6 + $0xdf8] sm:$0xff]  ;;  %v2359_v7 = vld [vmem:[#allocation6 + $0xe28] sm:$0xff] }
 0x50d   : > { %5224 = vpow2.f32 %v2092_v59  ;;  %v4535_v59 = vpack.c.bf16 %v2321_v54, %v2315_v44 }
 0x50e   : > { %v2087_v63 = vmul.f32 0.5, %v6325_v60  ;;  %2152 = vst.msk [vmem:[%s6294_s11 + $0x58] sm:$0xff] %vm2148_vm0, %v6325_v60  ;;  %4594 = vmatpush1.bf16.msra.mxu0 %v4593_v19 }
 0x50f   : > { %v5221_v25 = vpop.eup %5220 }
 0x510   : > { %v2094_v55 = vmul.f32 1.442695, %v2087_v63  ;;  %v2116_v1 = vmul.f32 %v5221_v25, %v2105_v6  ;;  %v4599_v6 = vpack.c.bf16 %v2323_v56, %v2317_v21  ;;  %v2320_v63 = vld [vmem:[#allocation6 + $0xcf0] sm:$0xff] }
 0x511   : > { %v2316_v25 = vld [vmem:[#allocation6 + $0xcd0] sm:$0xff] }
 0x512   : > { %5226 = vpow2.f32 %v2094_v55  ;;  %2124 = vrot.lane.b32.xlu0 %v2116_v1, %s5599_s1  ;;  %v2322_v55 = vld [vmem:[#allocation6 + $0xd00] sm:$0xff]  ;;  %v2327_v1 = vld [vmem:[#allocation6 + $0xd28] sm:$0xff]  ;;  %v2364_v56 = vld [vmem:[#allocation6 + $0xe50] sm:$0xff] }
 0x513   : > { %v5223_v4 = vpop.eup %5222 }
 0x514   : > { %v2117_v8 = vmul.f32 %v5223_v4, %v2107_v22  ;;  %v2329_v22 = vld [vmem:[#allocation6 + $0xd38] sm:$0xff]  ;;  %v2335_v4 = vld [vmem:[#allocation6 + $0xd68] sm:$0xff] }
 0x516   : > { %2126 = vrot.lane.b32.xlu1 %v2117_v8, %s5599_s1 }
 0x517   : > { %v5225_v10 = vpop.eup %5224 }
 0x518   : > { %v2118_v24 = vmul.f32 %v5225_v10, %v2109_v31  ;;  %v4537_v31 = vpack.c.bf16 %v2320_v63, %v2314_v14  ;;  %v4601_v10 = vpack.c.bf16 %v2322_v55, %v2316_v25  ;;  %v2370_v14 = vld [vmem:[#allocation6 + $0xe80] sm:$0xff]  ;;  %v2377_v63 = vld [vmem:[#allocation6 + $0xeb8] sm:$0xff]  ;;  %v2383_v25 = vld [vmem:[#allocation6 + $0xee8] sm:$0xff] }
 0x51a   : > { %2128 = vrot.lane.b32.xlu0 %v2118_v24, %s5599_s1  ;;  %v2326_v24 = vld [vmem:[#allocation6 + $0xd20] sm:$0xff] }
 0x51c   : > { %v5227_v12 = vpop.eup %5226 }
 0x51d   : > { %v2119_v15 = vmul.f32 %v5227_v12, %v2111_v13  ;;  %v2332_v13 = vld [vmem:[#allocation6 + $0xd50] sm:$0xff] }
 0x51e   : > { %3442 = vperm.xlu0 %5136, %v3438_v49   ;;  %v4541_v47 = vpack.c.bf16 %v2332_v13, %v2326_v24  ;;  %v2387_v24 = vld [vmem:[#allocation6 + $0xf08] sm:$0xff]  ;;  %v2393_v13 = vld [vmem:[#allocation6 + $0xf38] sm:$0xff] }
 0x51f   : > { %2130 = vrot.lane.b32.xlu1 %v2119_v15, %s5599_s1  ;;  %v4603_v15 = vpack.c.bf16 %v2335_v4, %v2329_v22  ;;  %v2380_v22 = vld [vmem:[#allocation6 + $0xed0] sm:$0xff] }
 0x522   : > { %3545 = vrot.lane.b32.xlu0 %v3439_v18, %s5600_s27 }
 0x523   : > { %3447 = vperm.xlu1 %5137, %v3439_v18   ;;  %5139 = vset.pattern.permute.xlu0 %v5601_v20  ;;  %v2328_v18 = vld [vmem:[#allocation6 + $0xd30] sm:$0xff] }
 0x527   : > { %3543 = vrot.lane.b32.xlu1 %v3438_v49, %s5600_s27 }
 0x528   : > { %5138 = vset.pattern.permute.xlu1 %v5601_v20  ;;  %v2334_v20 = vld [vmem:[#allocation6 + $0xd60] sm:$0xff] }
 0x52b   : > { %3537 = vperm.xlu1 %5138, %v3438_v49  }
 0x584   : > { %v2125_v23 = vpop.permute.xlu0 %2124 }
 0x585   : > { %v2136_v45 = vadd.f32 %v2125_v23, %v2066_v32  ;;  %v2311_v32 = vld [vmem:[#allocation6 + $0xca8] sm:$0xff] }
 0x586   : > { %v4595_v9 = vpack.c.bf16 %v2311_v32, %v2305_v38  ;;  %v2339_v23 = vld [vmem:[#allocation6 + $0xd88] sm:$0xff]  ;;  %v2356_v38 = vld [vmem:[#allocation6 + $0xe10] sm:$0xff] }
 0x587   : > { %2157 = vrot.lane.b32.xlu0 %v2136_v45, %s5602_s30  ;;  %3908 = vmatmul.mubr.msk.f32.vlgmr.msra.gmra.mrb[24].mxu1 %vm2190_vm1, %v2136_v45  ;;  %v2345_v45 = vld [vmem:[#allocation6 + $0xdb8] sm:$0xff]  ;;  %v4549_v44 = vpack.c.bf16 %v2356_v38, %v2350_v0 }
 0x588   : > { %v2127_v2 = vpop.permute.xlu1 %2126  ;;  %2269 = vmatprep.mubr.f32.mxu1 %v5596_v16  ;;  %4530 = vmatpush1.bf16.msra.mxu1 %v4529_v37  ;;  %v4543_v11 = vpack.c.bf16 %v2345_v45, %v2339_v23  ;;  %v2357_v37 = vld [vmem:[#allocation6 + $0xe18] sm:$0xff]  ;;  %v2392_v23 = vld [vmem:[#allocation6 + $0xf30] sm:$0xff]  ;;  %v4559_v45 = vpack.c.bf16 %v2393_v13, %v2387_v24 }
 0x589   : > { %v2137_v17 = vadd.f32 %v2127_v2, %v6313_v51  ;;  %4532 = vmatprep.subr.bf16.mxu1 %v4531_v48  ;;  %4596 = vmatprep.subr.bf16.mxu0 %v4595_v9  ;;  %v4605_v2 = vpack.c.bf16 %v2334_v20, %v2328_v18  ;;  %v4547_v32 = vpack.c.bf16 %v2357_v37, %v2351_v36  ;;  %v2352_v9 = vld [vmem:[#allocation6 + $0xdf0] sm:$0xff]  ;;  %v2386_v20 = vld [vmem:[#allocation6 + $0xf00] sm:$0xff]  ;;  %v2417_v0 = vld [vmem:[#allocation6 + $0xff8] sm:$0xff] }
 0x58a   : > { %4598 = vmatpush1.bf16.msra.mxu0 %v4597_v46  ;;  %v4611_v48 = vpack.c.bf16 %v2359_v7, %v2353_v57  ;;  %v4613_v54 = vpack.c.bf16 %v2358_v58, %v2352_v9  ;;  %v4551_v46 = vpack.c.bf16 %v2369_v50, %v2363_v27  ;;  %v2404_v36 = vld [vmem:[#allocation6 + $0xf90] sm:$0xff]  ;;  %v2413_v38 = vld [vmem:[#allocation6 + $0xfd8] sm:$0xff]  ;;  %v2410_v58 = vld [vmem:[#allocation6 + $0xfc0] sm:$0xff] }
 0x58b   : > { %2159 = vrot.lane.b32.xlu1 %v2137_v17, %s5602_s30  ;;  %3909 = vmatmul.mubr.msk.f32.gmra.mrb[26].mxu1 %vm2190_vm1, %v2137_v17  ;;  %v2346_v17 = vld [vmem:[#allocation6 + $0xdc0] sm:$0xff]  ;;  %v2400_v7 = vld [vmem:[#allocation6 + $0xf70] sm:$0xff] }
 0x58c   : > { %v2129_v51 = vpop.permute.xlu0 %2128  ;;  %2275 = vmatprep.mubr.f32.mxu1 %v5596_v16  ;;  %4534 = vmatpush1.bf16.msra.mxu1 %v4533_v5  ;;  %v4609_v19 = vpack.c.bf16 %v2346_v17, %v2340_v35  ;;  %v2368_v5 = vld [vmem:[#allocation6 + $0xe70] sm:$0xff]  ;;  %v2398_v17 = vld [vmem:[#allocation6 + $0xf60] sm:$0xff] }
 0x58d   : > { %v2138_v28 = vadd.f32 %v2129_v51, %v6319_v42  ;;  %v2333_v42 = vld [vmem:[#allocation6 + $0xd58] sm:$0xff]  ;;  %4536 = vmatprep.subr.bf16.mxu1 %v4535_v59  ;;  %4600 = vmatprep.subr.bf16.mxu0 %v4599_v6  ;;  %v2375_v59 = vld [vmem:[#allocation6 + $0xea8] sm:$0xff]  ;;  %v2416_v27 = vld [vmem:[#allocation6 + $0xff0] sm:$0xff] }
 0x58e   : > { %v4539_v12 = vpack.c.bf16 %v2333_v42, %v2327_v1  ;;  %4602 = vmatpush1.bf16.msra.mxu0 %v4601_v10  ;;  %v2365_v51 = vld [vmem:[#allocation6 + $0xe58] sm:$0xff]  ;;  %v4617_v1 = vpack.c.bf16 %v2370_v14, %v2364_v56  ;;  %v2374_v42 = vld [vmem:[#allocation6 + $0xea0] sm:$0xff]  ;;  %v2440_v24 = vld [vmem:[#allocation6 + $0x10b0] sm:$0xff] }
 0x58f   : > { %2161 = vrot.lane.b32.xlu0 %v2138_v28, %s5602_s30  ;;  %3910 = vmatmul.mubr.msk.f32.gmra.mrb[28].mxu1 %vm2190_vm1, %v2138_v28  ;;  %v2362_v28 = vld [vmem:[#allocation6 + $0xe40] sm:$0xff]  ;;  %v4615_v21 = vpack.c.bf16 %v2371_v52, %v2365_v51  ;;  %v2381_v6 = vld [vmem:[#allocation6 + $0xed8] sm:$0xff]  ;;  %v2412_v52 = vld [vmem:[#allocation6 + $0xfd0] sm:$0xff] }
 0x590   : > { %2281 = vmatprep.mubr.f32.mxu1 %v5596_v16  ;;  %4538 = vmatpush1.bf16.msra.mxu1 %v4537_v31  ;;  %v4553_v55 = vpack.c.bf16 %v2368_v5, %v2362_v28  ;;  %v4555_v4 = vpack.c.bf16 %v2381_v6, %v2375_v59  ;;  %v2376_v31 = vld [vmem:[#allocation6 + $0xeb0] sm:$0xff]  ;;  %v2382_v10 = vld [vmem:[#allocation6 + $0xee0] sm:$0xff]  ;;  %v2429_v28 = vld [vmem:[#allocation6 + $0x1058] sm:$0xff] }
 0x591   : > { %v2131_v8 = vpop.permute.xlu1 %2130  ;;  %4540 = vmatprep.subr.bf16.mxu1 %v4539_v12  ;;  %4604 = vmatprep.subr.bf16.mxu0 %v4603_v15  ;;  %v2395_v12 = vld [vmem:[#allocation6 + $0xf48] sm:$0xff]  ;;  %v4557_v15 = vpack.c.bf16 %v2380_v22, %v2374_v42  ;;  %v4621_v18 = vpack.c.bf16 %v2382_v10, %v2376_v31  ;;  %v2425_v5 = vld [vmem:[#allocation6 + $0x1038] sm:$0xff]  ;;  %v2422_v14 = vld [vmem:[#allocation6 + $0x1020] sm:$0xff] }
 0x592   : > { %v2139_v49 = vadd.f32 %v2131_v8, %v6325_v60  ;;  %v2344_v60 = vld [vmem:[#allocation6 + $0xdb0] sm:$0xff]  ;;  %4606 = vmatpush1.bf16.msra.mxu0 %v4605_v2  ;;  %v4619_v8 = vpack.c.bf16 %v2383_v25, %v2377_v63  ;;  %v2399_v2 = vld [vmem:[#allocation6 + $0xf68] sm:$0xff]  ;;  %v2441_v42 = vld [vmem:[#allocation6 + $0x10b8] sm:$0xff] }
 0x593   : > { %v4545_v3 = vpack.c.bf16 %v2344_v60, %v2338_v33  ;;  %4608 = vmatprep.subr.bf16.mxu0 %v4607_v34  ;;  %v2405_v33 = vld [vmem:[#allocation6 + $0xf98] sm:$0xff]  ;;  %v4561_v34 = vpack.c.bf16 %v2392_v23, %v2386_v20  ;;  %v2428_v59 = vld [vmem:[#allocation6 + $0x1050] sm:$0xff]  ;;  %v2434_v10 = vld [vmem:[#allocation6 + $0x1080] sm:$0xff] }
 0x594   : > { %2163 = vrot.lane.b32.xlu1 %v2139_v49, %s5602_s30  ;;  %3911 = vmatmul.mubr.msk.f32.gmra.mrb[30].mxu1 %vm2190_vm1, %v2139_v49  ;;  %v2389_v49 = vld [vmem:[#allocation6 + $0xf18] sm:$0xff]  ;;  %v4563_v37 = vpack.c.bf16 %v2405_v33, %v2399_v2  ;;  %v2424_v25 = vld [vmem:[#allocation6 + $0x1030] sm:$0xff] }
 0x595   : > { %4542 = vmatpush1.bf16.msra.mxu1 %v4541_v47  ;;  %v4623_v62 = vpack.c.bf16 %v2395_v12, %v2389_v49  ;;  %v2394_v47 = vld [vmem:[#allocation6 + $0xf40] sm:$0xff]  ;;  %v2401_v60 = vld [vmem:[#allocation6 + $0xf78] sm:$0xff]  ;;  %v2436_v12 = vld [vmem:[#allocation6 + $0x1090] sm:$0xff] }
 0x596   : > { %4544 = vmatprep.subr.bf16.mxu1 %v4543_v11  ;;  %4610 = vmatpush1.bf16.msra.mxu0 %v4609_v19  ;;  %v2407_v11 = vld [vmem:[#allocation6 + $0xfa8] sm:$0xff]  ;;  %v4625_v35 = vpack.c.bf16 %v2394_v47, %v2388_v30  ;;  %v2437_v22 = vld [vmem:[#allocation6 + $0x1098] sm:$0xff]  ;;  %v2446_v47 = vld [vmem:[#allocation6 + $0x10e0] sm:$0xff] }
 0x597   : > { %4612 = vmatprep.subr.bf16.mxu0 %v4611_v48  ;;  %v4627_v57 = vpack.c.bf16 %v2407_v11, %v2401_v60  ;;  %v2411_v19 = vld [vmem:[#allocation6 + $0xfc8] sm:$0xff]  ;;  %v4565_v48 = vpack.c.bf16 %v2404_v36, %v2398_v17  ;;  %v2453_v20 = vld [vmem:[#allocation6 + $0x1118] sm:$0xff]  ;;  %v2452_v2 = vld [vmem:[#allocation6 + $0x1110] sm:$0xff] }
 0x598   : > { %v4567_v50 = vpack.c.bf16 %v2417_v0, %v2411_v19  ;;  %v2449_v23 = vld [vmem:[#allocation6 + $0x10f8] sm:$0xff]  ;;  %v2448_v11 = vld [vmem:[#allocation6 + $0x10f0] sm:$0xff] }
 0x599   : > { %4546 = vmatpush1.bf16.msra.mxu1 %v4545_v3  ;;  %v2406_v3 = vld [vmem:[#allocation6 + $0xfa0] sm:$0xff]  ;;  %v2465_v17 = vld [vmem:[#allocation6 + $0x1178] sm:$0xff] }
 0x59a   : > { %4548 = vmatprep.subr.bf16.mxu1 %v4547_v32  ;;  %4614 = vmatpush1.bf16.msra.mxu0 %v4613_v54  ;;  %v2419_v32 = vld [vmem:[#allocation6 + $0x1008] sm:$0xff]  ;;  %v4629_v9 = vpack.c.bf16 %v2406_v3, %v2400_v7  ;;  %v2461_v36 = vld [vmem:[#allocation6 + $0x1158] sm:$0xff]  ;;  %v2458_v3 = vld [vmem:[#allocation6 + $0x1140] sm:$0xff] }
 0x59b   : > { %4616 = vmatprep.subr.bf16.mxu0 %v4615_v21  ;;  %v4631_v51 = vpack.c.bf16 %v2419_v32, %v2413_v38  ;;  %v2423_v54 = vld [vmem:[#allocation6 + $0x1028] sm:$0xff]  ;;  %v4569_v21 = vpack.c.bf16 %v2416_v27, %v2410_v58  ;;  %v2464_v38 = vld [vmem:[#allocation6 + $0x1170] sm:$0xff] }
 0x59c   : > { %v4571_v6 = vpack.c.bf16 %v2429_v28, %v2423_v54  ;;  %v2460_v32 = vld [vmem:[#allocation6 + $0x1150] sm:$0xff]  ;;  %v2471_v27 = vld [vmem:[#allocation6 + $0x11a8] sm:$0xff]  ;;  %v2470_v54 = vld [vmem:[#allocation6 + $0x11a0] sm:$0xff] }
 0x59d   : > { %4550 = vmatpush1.bf16.msra.mxu1 %v4549_v44  ;;  %v2418_v44 = vld [vmem:[#allocation6 + $0x1000] sm:$0xff]  ;;  %v2476_v28 = vld [vmem:[#allocation6 + $0x11d0] sm:$0xff] }
 0x59e   : > { %4552 = vmatprep.subr.bf16.mxu1 %v4551_v46  ;;  %4618 = vmatpush1.bf16.msra.mxu0 %v4617_v1  ;;  %v2431_v46 = vld [vmem:[#allocation6 + $0x1068] sm:$0xff]  ;;  %v4633_v56 = vpack.c.bf16 %v2418_v44, %v2412_v52 }
 0x59f   : > { %4620 = vmatprep.subr.bf16.mxu0 %v4619_v8  ;;  %v4635_v63 = vpack.c.bf16 %v2431_v46, %v2425_v5  ;;  %v2435_v1 = vld [vmem:[#allocation6 + $0x1088] sm:$0xff]  ;;  %v4573_v8 = vpack.c.bf16 %v2428_v59, %v2422_v14  ;;  %v4589_v46 = vpack.c.bf16 %v2476_v28, %v2470_v54  ;;  %v2324_v54 = vld [vmem:[#allocation6 + $0xd10] sm:$0xff] }
 0x5a0   : > { %v4575_v13 = vpack.c.bf16 %v2441_v42, %v2435_v1  ;;  %v2479_v44 = vld [vmem:[#allocation6 + $0x11e8] sm:$0xff] }
 0x5a1   : > { %4554 = vmatpush1.bf16.msra.mxu1 %v4553_v55  ;;  %v2430_v55 = vld [vmem:[#allocation6 + $0x1060] sm:$0xff]  ;;  %v2295_v59 = vld [vmem:[#allocation6 + $0xc28] sm:$0xff] }
 0x5a2   : > { %4556 = vmatprep.subr.bf16.mxu1 %v4555_v4  ;;  %4622 = vmatpush1.bf16.msra.mxu0 %v4621_v18  ;;  %v2443_v4 = vld [vmem:[#allocation6 + $0x10c8] sm:$0xff]  ;;  %v4637_v31 = vpack.c.bf16 %v2430_v55, %v2424_v25  ;;  %v6345_v42 = vpop.permute.xlu1 %3447 }
 0x5a3   : > { %4624 = vmatprep.subr.bf16.mxu0 %v4623_v62  ;;  %v4639_v49 = vpack.c.bf16 %v2443_v4, %v2437_v22  ;;  %v2447_v18 = vld [vmem:[#allocation6 + $0x10e8] sm:$0xff]  ;;  %v4577_v62 = vpack.c.bf16 %v2440_v24, %v2434_v10  ;;  %v6347_v22 = vpop.permute.xlu0 %3442 }
 0x5a4   : > { %v4579_v33 = vpack.c.bf16 %v2453_v20, %v2447_v18  ;;  %v2789_v55 = vld [vmem:[#allocation6 + $0x1248] sm:$0xff]  ;;  %v2294_v18 = vld [vmem:[#allocation6 + $0xc20] sm:$0xff]  ;;  %v2300_v20 = vld [vmem:[#allocation6 + $0xc50] sm:$0xff] }
 0x5a5   : > { %4558 = vmatpush1.bf16.msra.mxu1 %v4557_v15  ;;  %v2442_v15 = vld [vmem:[#allocation6 + $0x10c0] sm:$0xff] }
 0x5a6   : > { %4560 = vmatprep.subr.bf16.mxu1 %v4559_v45  ;;  %4626 = vmatpush1.bf16.msra.mxu0 %v4625_v35  ;;  %v2455_v45 = vld [vmem:[#allocation6 + $0x1128] sm:$0xff]  ;;  %v4641_v30 = vpack.c.bf16 %v2442_v15, %v2436_v12  ;;  %v6349_v4 = vpop.permute.xlu1 %3543  ;;  %v2178_v12 = vld [vmem:[#allocation12 + $0xf] sm:$0x3] }
 0x5a7   : > { %4628 = vmatprep.subr.bf16.mxu0 %v4627_v57  ;;  %v4643_v60 = vpack.c.bf16 %v2455_v45, %v2449_v23  ;;  %v2459_v35 = vld [vmem:[#allocation6 + $0x1148] sm:$0xff]  ;;  %v4581_v57 = vpack.c.bf16 %v2452_v2, %v2446_v47  ;;  %v6360_v15 = vrot.slane %v2178_v12, %v5963_v43  ;;  %v6363_v23 = vrot.slane %v2178_v12, %v5960_v41  ;;  %v2782_v45 = vld [vmem:[#allocation6 + $0x1210] sm:$0xff]  ;;  %v2313_v2 = vld [vmem:[#allocation6 + $0xcb8] sm:$0xff] }
 0x5a8   : > { %v4583_v19 = vpack.c.bf16 %v2465_v17, %v2459_v35  ;;  %v4657_v35 = vpack.c.bf16 %v2300_v20, %v2294_v18  ;;  %v2330_v18 = vld [vmem:[#allocation6 + $0xd40] sm:$0xff]  ;;  %v2336_v20 = vld [vmem:[#allocation6 + $0xd70] sm:$0xff] }
 0x5a9   : > { %4562 = vmatpush1.bf16.msra.mxu1 %v4561_v34  ;;  %v2454_v34 = vld [vmem:[#allocation6 + $0x1120] sm:$0xff] }
 0x5aa   : > { %4564 = vmatprep.subr.bf16.mxu1 %v4563_v37  ;;  %4630 = vmatpush1.bf16.msra.mxu0 %v4629_v9  ;;  %v2467_v37 = vld [vmem:[#allocation6 + $0x1188] sm:$0xff]  ;;  %v4645_v7 = vpack.c.bf16 %v2454_v34, %v2448_v11  ;;  %v4585_v9 = vpack.c.bf16 %v2464_v38, %v2458_v3 }
 0x5ab   : > { %4632 = vmatprep.subr.bf16.mxu0 %v4631_v51  ;;  %v4647_v0 = vpack.c.bf16 %v2467_v37, %v2461_v36  ;;  %v2473_v51 = vld [vmem:[#allocation6 + $0x11b8] sm:$0xff]  ;;  %v2306_v36 = vld [vmem:[#allocation6 + $0xc80] sm:$0xff]  ;;  %v2312_v37 = vld [vmem:[#allocation6 + $0xcb0] sm:$0xff] }
 0x5ac   : > { %v4651_v5 = vpack.c.bf16 %v2479_v44, %v2473_v51  ;;  %v2319_v38 = vld [vmem:[#allocation6 + $0xce8] sm:$0xff]  ;;  %v4661_v51 = vpack.c.bf16 %v2312_v37, %v2306_v36  ;;  %v2318_v44 = vld [vmem:[#allocation6 + $0xce0] sm:$0xff] }
 0x5ad   : > { %4566 = vmatpush1.bf16.msra.mxu1 %v4565_v48  ;;  %v2466_v48 = vld [vmem:[#allocation6 + $0x1180] sm:$0xff] }
 0x5ae   : > { %4568 = vmatprep.subr.bf16.mxu1 %v4567_v50  ;;  %4634 = vmatpush1.bf16.msra.mxu0 %v4633_v56  ;;  %v4649_v58 = vpack.c.bf16 %v2466_v48, %v2460_v32  ;;  %v2477_v50 = vld [vmem:[#allocation6 + $0x11d8] sm:$0xff]  ;;  %v2478_v56 = vld [vmem:[#allocation6 + $0x11e0] sm:$0xff] }
 0x5af   : > { %4636 = vmatprep.subr.bf16.mxu0 %v4635_v63  ;;  %v4587_v52 = vpack.c.bf16 %v2477_v50, %v2471_v27  ;;  %v2783_v63 = vld [vmem:[#allocation6 + $0x1218] sm:$0xff]  ;;  %v2342_v37 = vld [vmem:[#allocation6 + $0xda0] sm:$0xff] }
 0x5b0   : > { %v4783_v1 = vpack.c.bf16 %v2789_v55, %v2783_v63  ;;  %v2325_v48 = vld [vmem:[#allocation6 + $0xd18] sm:$0xff] }
 0x5b1   : > { %4570 = vmatpush1.bf16.msra.mxu1 %v4569_v21  ;;  %v2472_v21 = vld [vmem:[#allocation6 + $0x11b0] sm:$0xff]  ;;  %v2819_v63 = vld [vmem:[#allocation6 + $0x1338] sm:$0xff] }
 0x5b2   : > { %4572 = vmatprep.subr.bf16.mxu1 %v4571_v6  ;;  %4638 = vmatpush1.bf16.msra.mxu0 %v4637_v31  ;;  %v4653_v14 = vpack.c.bf16 %v2478_v56, %v2472_v21  ;;  %v2301_v6 = vld [vmem:[#allocation6 + $0xc58] sm:$0xff]  ;;  %v6353_v31 = vpop.permute.xlu1 %3537  ;;  %v2806_v21 = vld [vmem:[#allocation6 + $0x12d0] sm:$0xff]  ;;  %v2812_v56 = vld [vmem:[#allocation6 + $0x1300] sm:$0xff] }
 0x5b3   : > { %4640 = vmatprep.subr.bf16.mxu0 %v4639_v49  ;;  %v4655_v25 = vpack.c.bf16 %v2301_v6, %v2295_v59  ;;  %v2337_v6 = vld [vmem:[#allocation6 + $0xd78] sm:$0xff] }
 0x5b5   : > { %4574 = vmatpush1.bf16.msra.mxu1 %v4573_v8  ;;  %v6351_v8 = vpop.permute.xlu0 %3545 }
 0x5b6   : > { %4576 = vmatprep.subr.bf16.mxu1 %v4575_v13  ;;  %4642 = vmatpush1.bf16.msra.mxu0 %v4641_v30  ;;  %v2307_v30 = vld [vmem:[#allocation6 + $0xc88] sm:$0xff] }
 0x5b7   : > { %4644 = vmatprep.subr.bf16.mxu0 %v4643_v60  ;;  %v2801_v60 = vld [vmem:[#allocation6 + $0x12a8] sm:$0xff] }
 0x5b9   : > { %4578 = vmatpush1.bf16.msra.mxu1 %v4577_v62  ;;  %v2788_v62 = vld [vmem:[#allocation6 + $0x1240] sm:$0xff] }
 0x5ba   : > { %4580 = vmatprep.subr.bf16.mxu1 %v4579_v33  ;;  %4646 = vmatpush1.bf16.msra.mxu0 %v4645_v7  ;;  %v2795_v33 = vld [vmem:[#allocation6 + $0x1278] sm:$0xff]  ;;  %v4785_v17 = vpack.c.bf16 %v2788_v62, %v2782_v45  ;;  %v4659_v7 = vpack.c.bf16 %v2313_v2, %v2307_v30  ;;  %v2818_v45 = vld [vmem:[#allocation6 + $0x1330] sm:$0xff]  ;;  %v2824_v62 = vld [vmem:[#allocation6 + $0x1360] sm:$0xff] }
 0x5bb   : > { %4648 = vmatprep.subr.bf16.mxu0 %v4647_v0  ;;  %v4787_v3 = vpack.c.bf16 %v2801_v60, %v2795_v33  ;;  %v2800_v0 = vld [vmem:[#allocation6 + $0x12a0] sm:$0xff]  ;;  %v2349_v33 = vld [vmem:[#allocation6 + $0xdd8] sm:$0xff]  ;;  %v4797_v36 = vpack.c.bf16 %v2824_v62, %v2818_v45  ;;  %v2873_v62 = vld [vmem:[#allocation6 + $0x14e8] sm:$0xff] }
 0x5bc   : > { %v2831_v60 = vld [vmem:[#allocation6 + $0x1398] sm:$0xff] }
 0x5bd   : > { %4582 = vmatpush1.bf16.msra.mxu1 %v4581_v57  ;;  %v2867_v45 = vld [vmem:[#allocation6 + $0x14b8] sm:$0xff] }
 0x5be   : > { %4584 = vmatprep.subr.bf16.mxu1 %v4583_v19  ;;  %4650 = vmatpush1.bf16.msra.mxu0 %v4649_v58  ;;  %v2794_v19 = vld [vmem:[#allocation6 + $0x1270] sm:$0xff]  ;;  %v2813_v58 = vld [vmem:[#allocation6 + $0x1308] sm:$0xff] }
 0x5bf   : > { %4652 = vmatprep.subr.bf16.mxu0 %v4651_v5  ;;  %v4663_v5 = vpack.c.bf16 %v2325_v48, %v2319_v38  ;;  %v2355_v38 = vld [vmem:[#allocation6 + $0xe08] sm:$0xff]  ;;  %v2361_v48 = vld [vmem:[#allocation6 + $0xe38] sm:$0xff] }
 0x5c1   : > { %4586 = vmatpush1.bf16.msra.mxu1 %v4585_v9  ;;  %v2807_v9 = vld [vmem:[#allocation6 + $0x12d8] sm:$0xff] }
 0x5c2   : > { %4588 = vmatprep.subr.bf16.mxu1 %v4587_v52  ;;  %4654 = vmatpush1.bf16.msra.mxu0 %v4653_v14  ;;  %v4789_v52 = vpack.c.bf16 %v2800_v0, %v2794_v19  ;;  %v2331_v14 = vld [vmem:[#allocation6 + $0xd48] sm:$0xff]  ;;  %v2830_v19 = vld [vmem:[#allocation6 + $0x1390] sm:$0xff]  ;;  %v2836_v0 = vld [vmem:[#allocation6 + $0x13c0] sm:$0xff] }
 0x5c3   : > { %4784 = vmatprep.subr.bf16.mxu0 %v4783_v1 }
 0x5c5   : > { %4590 = vmatpush1.bf16.msra.mxu1 %v4589_v46  ;;  %v4791_v46 = vpack.c.bf16 %v2813_v58, %v2807_v9  ;;  %v2843_v9 = vld [vmem:[#allocation6 + $0x13f8] sm:$0xff]  ;;  %v2849_v58 = vld [vmem:[#allocation6 + $0x1428] sm:$0xff] }
 0x5c6   : > { %4656 = vmatprep.subr.bf16.mxu1 %v4655_v25  ;;  %v2825_v25 = vld [vmem:[#allocation6 + $0x1368] sm:$0xff] }
 0x5c7   : > { %v4795_v12 = vpack.c.bf16 %v2825_v25, %v2819_v63 }
 0x5f9   : > { %v2158_v10 = vpop.permute.xlu0 %2157 }
 0x5fa   : > { %2170 = vst.msk [vmem:[%s6294_s11 + $0x10] sm:$0xff] %vm2169_vm2, %v2158_v10  ;;  %v4665_v10 = vpack.c.bf16 %v2324_v54, %v2318_v44  ;;  %v6407_v44 = vld [vmem:[%s6294_s11 + $0x8] sm:$0xff]  ;;  %v4675_v54 = vpack.c.bf16 %v2361_v48, %v2355_v38  ;;  %v2396_v48 = vld [vmem:[#allocation6 + $0xf50] sm:$0xff] }
 0x5fd   : > { %v2160_v24 = vpop.permute.xlu1 %2159 }
 0x5fe   : > { %2171 = vst.msk [vmem:[%s6294_s11 + $0x28] sm:$0xff] %vm2169_vm2, %v2160_v24  ;;  %v4793_v24 = vpack.c.bf16 %v2812_v56, %v2806_v21  ;;  %v2848_v21 = vld [vmem:[#allocation6 + $0x1420] sm:$0xff]  ;;  %v2367_v56 = vld [vmem:[#allocation6 + $0xe68] sm:$0xff] }
 0x601   : > { %v2162_v13 = vpop.permute.xlu0 %2161 }
 0x602   : > { %2172 = vst.msk [vmem:[%s6294_s11 + $0x40] sm:$0xff] %vm2169_vm2, %v2162_v13 }
 0x606   : > { %v2164_v49 = vpop.permute.xlu1 %2163 }
 0x607   : > { %2173 = vst.msk [vmem:[%s6294_s11 + $0x58] sm:$0xff] %vm2169_vm2, %v2164_v49  ;;  %v4667_v49 = vpack.c.bf16 %v2337_v6, %v2331_v14  ;;  %v2373_v14 = vld [vmem:[#allocation6 + $0xe98] sm:$0xff]  ;;  %v2861_v6 = vld [vmem:[#allocation6 + $0x1488] sm:$0xff] }
 0x65a   : > { %v2265_v47 = vpop.f32.mrb[24].mxu1 }
 0x65b   : > { %v2267_v11 = vpop.f32.mrb[25].mxu1  ;;  %v6369_v57 = vadd.f32 %v2265_v47, %v6363_v23  ;;  %v2343_v47 = vld [vmem:[#allocation6 + $0xda8] sm:$0xff] }
 0x65c   : > { %v6366_v34 = vadd.f32 %v2267_v11, %v6360_v15  ;;  %v2837_v11 = vld [vmem:[#allocation6 + $0x13c8] sm:$0xff] }
 0x65e   : > { %v2271_v32 = vpop.f32.mrb[26].mxu1  ;;  %2577 = vmatprep.mubr.f32.mxu1 %v6366_v34  ;;  %2666 = vmatprep.mubr.f32.mxu0 %v6366_v34 }
 0x65f   : > { %v2273_v27 = vpop.f32.mrb[27].mxu1  ;;  %2578 = vmatmul.mubr.f32.vlgmr.msra.gmra.mrb[32].mxu1 %v6369_v57  ;;  %2667 = vmatmul.mubr.f32.vlgmr.msra.gmra.mrb[28].mxu0 %v6369_v57  ;;  %v6379_v28 = vadd.f32 %v2271_v32, %v6363_v23  ;;  %v4671_v32 = vpack.c.bf16 %v2349_v33, %v2343_v47  ;;  %v2384_v33 = vld [vmem:[#allocation6 + $0xef0] sm:$0xff] }
 0x660   : > { %v6376_v50 = vadd.f32 %v2273_v27, %v6360_v15  ;;  %4658 = vmatpush1.bf16.msra.mxu1 %v4657_v35  ;;  %4786 = vmatpush1.bf16.msra.mxu0 %v4785_v17  ;;  %v4669_v17 = vpack.c.bf16 %v2336_v20, %v2330_v18  ;;  %v4801_v27 = vpack.c.bf16 %v2836_v0, %v2830_v19  ;;  %v2379_v18 = vld [vmem:[#allocation6 + $0xec8] sm:$0xff]  ;;  %v2385_v20 = vld [vmem:[#allocation6 + $0xef8] sm:$0xff] }
 0x661   : > { %4660 = vmatprep.subr.bf16.mxu1 %v4659_v7  ;;  %4788 = vmatprep.subr.bf16.mxu0 %v4787_v3  ;;  %v2348_v7 = vld [vmem:[#allocation6 + $0xdd0] sm:$0xff]  ;;  %v2879_v19 = vld [vmem:[#allocation6 + $0x1518] sm:$0xff]  ;;  %v2885_v0 = vld [vmem:[#allocation6 + $0x1548] sm:$0xff] }
 0x662   : > { %v2277_v59 = vpop.f32.mrb[28].mxu1  ;;  %2583 = vmatprep.mubr.f32.mxu1 %v6376_v50  ;;  %2672 = vmatprep.mubr.f32.mxu0 %v6376_v50 }
 0x663   : > { %v2279_v55 = vpop.f32.mrb[29].mxu1  ;;  %2584 = vmatmul.mubr.f32.gmra.mrb[34].mxu1 %v6379_v28  ;;  %2673 = vmatmul.mubr.f32.gmra.mrb[30].mxu0 %v6379_v28  ;;  %v6389_v13 = vadd.f32 %v2277_v59, %v6363_v23  ;;  %v2855_v59 = vld [vmem:[#allocation6 + $0x1458] sm:$0xff] }
 0x664   : > { %v6386_v1 = vadd.f32 %v2279_v55, %v6360_v15  ;;  %4662 = vmatpush1.bf16.msra.mxu1 %v4661_v51  ;;  %4790 = vmatpush1.bf16.msra.mxu0 %v4789_v52  ;;  %v2354_v51 = vld [vmem:[#allocation6 + $0xe00] sm:$0xff]  ;;  %v2360_v52 = vld [vmem:[#allocation6 + $0xe30] sm:$0xff] }
 0x665   : > { %4664 = vmatprep.subr.bf16.mxu1 %v4663_v5  ;;  %4792 = vmatprep.subr.bf16.mxu0 %v4791_v46  ;;  %v4803_v5 = vpack.c.bf16 %v2849_v58, %v2843_v9  ;;  %v2842_v46 = vld [vmem:[#allocation6 + $0x13f0] sm:$0xff]  ;;  %v4677_v63 = vpack.c.bf16 %v2360_v52, %v2354_v51  ;;  %v2366_v55 = vld [vmem:[#allocation6 + $0xe60] sm:$0xff]  ;;  %v4815_v58 = vpack.c.bf16 %v2885_v0, %v2879_v19  ;;  %v2403_v51 = vld [vmem:[#allocation6 + $0xf88] sm:$0xff] }
 0x666   : > { %2589 = vmatprep.mubr.f32.mxu1 %v6386_v1  ;;  %2678 = vmatprep.mubr.f32.mxu0 %v6386_v1  ;;  %v4805_v25 = vpack.c.bf16 %v2848_v21, %v2842_v46  ;;  %v2409_v52 = vld [vmem:[#allocation6 + $0xfb8] sm:$0xff] }
 0x667   : > { %v2283_v30 = vpop.f32.mrb[30].mxu1  ;;  %2590 = vmatmul.mubr.f32.gmra.mrb[36].mxu1 %v6389_v13  ;;  %2679 = vmatmul.mubr.f32.gmra.mrb[32].mxu0 %v6389_v13 }
 0x668   : > { %v2285_v2 = vpop.f32.mrb[31].mxu1  ;;  %4666 = vmatpush1.bf16.msra.mxu1 %v4665_v10  ;;  %4794 = vmatpush1.bf16.msra.mxu0 %v4793_v24  ;;  %v6399_v3 = vadd.f32 %v2283_v30, %v6363_v23  ;;  %v4673_v23 = vpack.c.bf16 %v2348_v7, %v2342_v37  ;;  %v4679_v10 = vpack.c.bf16 %v2373_v14, %v2367_v56  ;;  %v2391_v37 = vld [vmem:[#allocation6 + $0xf28] sm:$0xff]  ;;  %v2397_v7 = vld [vmem:[#allocation6 + $0xf58] sm:$0xff]  ;;  %v2402_v56 = vld [vmem:[#allocation6 + $0xf80] sm:$0xff] }
 0x669   : > { %v6396_v35 = vadd.f32 %v2285_v2, %v6360_v15  ;;  %4668 = vmatprep.subr.bf16.mxu1 %v4667_v49  ;;  %4796 = vmatprep.subr.bf16.mxu0 %v4795_v12  ;;  %v4799_v15 = vpack.c.bf16 %v2837_v11, %v2831_v60  ;;  %v4807_v24 = vpack.c.bf16 %v2861_v6, %v2855_v59  ;;  %v2854_v49 = vld [vmem:[#allocation6 + $0x1450] sm:$0xff]  ;;  %v2860_v12 = vld [vmem:[#allocation6 + $0x1480] sm:$0xff] }
 0x66a   : > { %v4809_v47 = vpack.c.bf16 %v2860_v12, %v2854_v49  ;;  %v2378_v2 = vld [vmem:[#allocation6 + $0xec0] sm:$0xff]  ;;  %v4683_v60 = vpack.c.bf16 %v2385_v20, %v2379_v18  ;;  %v4811_v11 = vpack.c.bf16 %v2873_v62, %v2867_v45  ;;  %v4687_v9 = vpack.c.bf16 %v2397_v7, %v2391_v37  ;;  %v2408_v14 = vld [vmem:[#allocation6 + $0xfb0] sm:$0xff] }
 0x66b   : > { %2595 = vmatprep.mubr.f32.mxu1 %v6396_v35  ;;  %2684 = vmatprep.mubr.f32.mxu0 %v6396_v35  ;;  %v4685_v38 = vpack.c.bf16 %v2384_v33, %v2378_v2  ;;  %v4691_v59 = vpack.c.bf16 %v2409_v52, %v2403_v51  ;;  %v4693_v49 = vpack.c.bf16 %v2408_v14, %v2402_v56  ;;  %v2414_v18 = vld [vmem:[#allocation6 + $0xfe0] sm:$0xff]  ;;  %v2420_v20 = vld [vmem:[#allocation6 + $0x1010] sm:$0xff]  ;;  %v2427_v2 = vld [vmem:[#allocation6 + $0x1048] sm:$0xff] }
 0x66c   : > { %2596 = vmatmul.mubr.f32.gmra.mrb[38].mxu1 %v6399_v3  ;;  %2685 = vmatmul.mubr.f32.gmra.mrb[34].mxu0 %v6399_v3  ;;  %v2433_v33 = vld [vmem:[#allocation6 + $0x1078] sm:$0xff]  ;;  %v2426_v37 = vld [vmem:[#allocation6 + $0x1040] sm:$0xff]  ;;  %v2432_v7 = vld [vmem:[#allocation6 + $0x1070] sm:$0xff] }
 0x66d   : > { %4670 = vmatpush1.bf16.msra.mxu1 %v4669_v17  ;;  %4798 = vmatpush1.bf16.msra.mxu0 %v4797_v36  ;;  %v2866_v17 = vld [vmem:[#allocation6 + $0x14b0] sm:$0xff]  ;;  %v2872_v36 = vld [vmem:[#allocation6 + $0x14e0] sm:$0xff]  ;;  %v4699_v19 = vpack.c.bf16 %v2433_v33, %v2427_v2  ;;  %v2451_v56 = vld [vmem:[#allocation6 + $0x1108] sm:$0xff] }
 0x66e   : > { %2755 = vmatprep.mubr.f32.mxu1 %v6366_v34  ;;  %3156 = vmatprep.mubr.f32.mxu0 %v6407_v44  ;;  %v2372_v34 = vld [vmem:[#allocation6 + $0xe90] sm:$0xff]  ;;  %v2438_v51 = vld [vmem:[#allocation6 + $0x10a0] sm:$0xff]  ;;  %v2457_v14 = vld [vmem:[#allocation6 + $0x1138] sm:$0xff] }
 0x66f   : > { %4672 = vmatprep.subr.bf16.mxu1 %v4671_v32  ;;  %4800 = vmatprep.subr.bf16.mxu0 %v4799_v15  ;;  %v4681_v30 = vpack.c.bf16 %v2372_v34, %v2366_v55  ;;  %v4813_v32 = vpack.c.bf16 %v2872_v36, %v2866_v17  ;;  %v2390_v15 = vld [vmem:[#allocation6 + $0xf20] sm:$0xff]  ;;  %v2415_v55 = vld [vmem:[#allocation6 + $0xfe8] sm:$0xff]  ;;  %v2421_v34 = vld [vmem:[#allocation6 + $0x1018] sm:$0xff]  ;;  %v4697_v17 = vpack.c.bf16 %v2420_v20, %v2414_v18 }
 0x670   : > { %v4689_v46 = vpack.c.bf16 %v2396_v48, %v2390_v15  ;;  %v4695_v45 = vpack.c.bf16 %v2421_v34, %v2415_v55  ;;  %v2439_v15 = vld [vmem:[#allocation6 + $0x10a8] sm:$0xff]  ;;  %v2445_v48 = vld [vmem:[#allocation6 + $0x10d8] sm:$0xff]  ;;  %v2444_v52 = vld [vmem:[#allocation6 + $0x10d0] sm:$0xff] }
 0x671   : > { %4674 = vmatpush1.bf16.msra.mxu1 %v4673_v23  ;;  %4802 = vmatpush1.bf16.msra.mxu0 %v4801_v27  ;;  %v2878_v23 = vld [vmem:[#allocation6 + $0x1510] sm:$0xff]  ;;  %v2884_v27 = vld [vmem:[#allocation6 + $0x1540] sm:$0xff]  ;;  %v2463_v18 = vld [vmem:[#allocation6 + $0x1168] sm:$0xff] }
 0x672   : > { %4676 = vmatprep.subr.bf16.mxu1 %v4675_v54  ;;  %4804 = vmatprep.subr.bf16.mxu0 %v4803_v5  ;;  %v2891_v54 = vld [vmem:[#allocation6 + $0x1578] sm:$0xff]  ;;  %v2897_v5 = vld [vmem:[#allocation6 + $0x15a8] sm:$0xff]  ;;  %v4817_v21 = vpack.c.bf16 %v2884_v27, %v2878_v23  ;;  %v4701_v23 = vpack.c.bf16 %v2432_v7, %v2426_v37  ;;  %v2450_v55 = vld [vmem:[#allocation6 + $0x1100] sm:$0xff] }
 0x673   : > { %v4819_v6 = vpack.c.bf16 %v2897_v5, %v2891_v54  ;;  %v4703_v54 = vpack.c.bf16 %v2445_v48, %v2439_v15  ;;  %v2456_v34 = vld [vmem:[#allocation6 + $0x1130] sm:$0xff]  ;;  %v2469_v20 = vld [vmem:[#allocation6 + $0x1198] sm:$0xff]  ;;  %v2462_v2 = vld [vmem:[#allocation6 + $0x1160] sm:$0xff] }
 0x674   : > { %v2468_v33 = vld [vmem:[#allocation6 + $0x1190] sm:$0xff]  ;;  %v2475_v37 = vld [vmem:[#allocation6 + $0x11c8] sm:$0xff]  ;;  %v2481_v7 = vld [vmem:[#allocation6 + $0x11f8] sm:$0xff] }
 0x675   : > { %4678 = vmatpush1.bf16.msra.mxu1 %v4677_v63  ;;  %4806 = vmatpush1.bf16.msra.mxu0 %v4805_v25  ;;  %v2890_v63 = vld [vmem:[#allocation6 + $0x1570] sm:$0xff]  ;;  %v2896_v25 = vld [vmem:[#allocation6 + $0x15a0] sm:$0xff] }
 0x676   : > { %4680 = vmatprep.subr.bf16.mxu1 %v4679_v10  ;;  %4808 = vmatprep.subr.bf16.mxu0 %v4807_v24  ;;  %v2903_v10 = vld [vmem:[#allocation6 + $0x15d8] sm:$0xff]  ;;  %v2909_v24 = vld [vmem:[#allocation6 + $0x1608] sm:$0xff]  ;;  %v4821_v12 = vpack.c.bf16 %v2896_v25, %v2890_v63  ;;  %v4705_v63 = vpack.c.bf16 %v2444_v52, %v2438_v51  ;;  %v2474_v15 = vld [vmem:[#allocation6 + $0x11c0] sm:$0xff] }
 0x677   : > { %v4823_v62 = vpack.c.bf16 %v2909_v24, %v2903_v10  ;;  %v4707_v10 = vpack.c.bf16 %v2457_v14, %v2451_v56  ;;  %v2480_v48 = vld [vmem:[#allocation6 + $0x11f0] sm:$0xff]  ;;  %v2781_v51 = vld [vmem:[#allocation6 + $0x1208] sm:$0xff]  ;;  %v2787_v52 = vld [vmem:[#allocation6 + $0x1238] sm:$0xff] }
 0x678   : > { %v4719_v56 = vpack.c.bf16 %v2787_v52, %v2781_v51  ;;  %v6427_v51 = vld [vmem:[%s6294_s11 + $0x38] sm:$0xff] }
 0x679   : > { %4682 = vmatpush1.bf16.msra.mxu1 %v4681_v30  ;;  %4810 = vmatpush1.bf16.msra.mxu0 %v4809_v47  ;;  %v2902_v30 = vld [vmem:[#allocation6 + $0x15d0] sm:$0xff]  ;;  %v2908_v47 = vld [vmem:[#allocation6 + $0x1600] sm:$0xff] }
 0x67a   : > { %4684 = vmatprep.subr.bf16.mxu1 %v4683_v60  ;;  %4812 = vmatprep.subr.bf16.mxu0 %v4811_v11  ;;  %v2915_v60 = vld [vmem:[#allocation6 + $0x1638] sm:$0xff]  ;;  %v2921_v11 = vld [vmem:[#allocation6 + $0x1668] sm:$0xff]  ;;  %v4825_v36 = vpack.c.bf16 %v2908_v47, %v2902_v30  ;;  %v4709_v30 = vpack.c.bf16 %v2456_v34, %v2450_v55 }
 0x67b   : > { %v4827_v0 = vpack.c.bf16 %v2921_v11, %v2915_v60  ;;  %v4711_v60 = vpack.c.bf16 %v2469_v20, %v2463_v18  ;;  %v2793_v55 = vld [vmem:[#allocation6 + $0x1268] sm:$0xff]  ;;  %v2799_v34 = vld [vmem:[#allocation6 + $0x1298] sm:$0xff]  ;;  %v2792_v18 = vld [vmem:[#allocation6 + $0x1260] sm:$0xff] }
 0x67c   : > { %v2798_v20 = vld [vmem:[#allocation6 + $0x1290] sm:$0xff] }
 0x67d   : > { %4686 = vmatpush1.bf16.msra.mxu1 %v4685_v38  ;;  %4814 = vmatpush1.bf16.msra.mxu0 %v4813_v32  ;;  %v2914_v38 = vld [vmem:[#allocation6 + $0x1630] sm:$0xff]  ;;  %v2920_v32 = vld [vmem:[#allocation6 + $0x1660] sm:$0xff] }
 0x67e   : > { %4688 = vmatprep.subr.bf16.mxu1 %v4687_v9  ;;  %4816 = vmatprep.subr.bf16.mxu0 %v4815_v58  ;;  %v2927_v9 = vld [vmem:[#allocation6 + $0x1698] sm:$0xff]  ;;  %v2933_v58 = vld [vmem:[#allocation6 + $0x16c8] sm:$0xff]  ;;  %v4829_v27 = vpack.c.bf16 %v2920_v32, %v2914_v38  ;;  %v4713_v38 = vpack.c.bf16 %v2468_v33, %v2462_v2  ;;  %v6412_v33 = vld [vmem:[%s6294_s11] sm:$0xff] }
 0x67f   : > { %v4831_v5 = vpack.c.bf16 %v2933_v58, %v2927_v9  ;;  %v4715_v9 = vpack.c.bf16 %v2481_v7, %v2475_v37  ;;  %v2805_v2 = vld [vmem:[#allocation6 + $0x12c8] sm:$0xff]  ;;  %v6417_v37 = vld [vmem:[%s6294_s11 + $0x20] sm:$0xff] }
 0x681   : > { %4690 = vmatpush1.bf16.msra.mxu1 %v4689_v46  ;;  %4818 = vmatpush1.bf16.msra.mxu0 %v4817_v21  ;;  %v2926_v46 = vld [vmem:[#allocation6 + $0x1690] sm:$0xff]  ;;  %v2932_v21 = vld [vmem:[#allocation6 + $0x16c0] sm:$0xff] }
 0x682   : > { %4692 = vmatprep.subr.bf16.mxu1 %v4691_v59  ;;  %4820 = vmatprep.subr.bf16.mxu0 %v4819_v6  ;;  %v2939_v59 = vld [vmem:[#allocation6 + $0x16f8] sm:$0xff]  ;;  %v2945_v6 = vld [vmem:[#allocation6 + $0x1728] sm:$0xff]  ;;  %v4833_v25 = vpack.c.bf16 %v2932_v21, %v2926_v46  ;;  %v4717_v46 = vpack.c.bf16 %v2480_v48, %v2474_v15  ;;  %v2814_v15 = vld [vmem:[#allocation6 + $0x1310] sm:$0xff] }
 0x683   : > { %v4835_v24 = vpack.c.bf16 %v2945_v6, %v2939_v59  ;;  %v2780_v59 = vld [vmem:[#allocation6 + $0x1200] sm:$0xff]  ;;  %v2786_v6 = vld [vmem:[#allocation6 + $0x1230] sm:$0xff]  ;;  %v2817_v48 = vld [vmem:[#allocation6 + $0x1328] sm:$0xff] }
 0x685   : > { %4694 = vmatpush1.bf16.msra.mxu1 %v4693_v49  ;;  %4822 = vmatpush1.bf16.msra.mxu0 %v4821_v12  ;;  %v2938_v49 = vld [vmem:[#allocation6 + $0x16f0] sm:$0xff]  ;;  %v2944_v12 = vld [vmem:[#allocation6 + $0x1720] sm:$0xff] }
 0x686   : > { %4696 = vmatprep.subr.bf16.mxu1 %v4695_v45  ;;  %4824 = vmatprep.subr.bf16.mxu0 %v4823_v62  ;;  %v2951_v45 = vld [vmem:[#allocation6 + $0x1758] sm:$0xff]  ;;  %v2957_v62 = vld [vmem:[#allocation6 + $0x1788] sm:$0xff]  ;;  %v4837_v47 = vpack.c.bf16 %v2944_v12, %v2938_v49  ;;  %v4721_v49 = vpack.c.bf16 %v2786_v6, %v2780_v59 }
 0x687   : > { %v4839_v11 = vpack.c.bf16 %v2957_v62, %v2951_v45  ;;  %v4723_v45 = vpack.c.bf16 %v2799_v34, %v2793_v55  ;;  %v2835_v59 = vld [vmem:[#allocation6 + $0x13b8] sm:$0xff]  ;;  %v2833_v6 = vld [vmem:[#allocation6 + $0x13a8] sm:$0xff]  ;;  %v6437_v55 = vld [vmem:[%s6294_s11 + $0x50] sm:$0xff] }
 0x689   : > { %4698 = vmatpush1.bf16.msra.mxu1 %v4697_v17  ;;  %4826 = vmatpush1.bf16.msra.mxu0 %v4825_v36  ;;  %v2950_v17 = vld [vmem:[#allocation6 + $0x1750] sm:$0xff]  ;;  %v2956_v36 = vld [vmem:[#allocation6 + $0x1780] sm:$0xff] }
 0x68a   : > { %4700 = vmatprep.subr.bf16.mxu1 %v4699_v19  ;;  %4828 = vmatprep.subr.bf16.mxu0 %v4827_v0  ;;  %v2963_v19 = vld [vmem:[#allocation6 + $0x17b8] sm:$0xff]  ;;  %v2969_v0 = vld [vmem:[#allocation6 + $0x17e8] sm:$0xff]  ;;  %v4841_v32 = vpack.c.bf16 %v2956_v36, %v2950_v17  ;;  %v4725_v36 = vpack.c.bf16 %v2798_v20, %v2792_v18  ;;  %v2838_v18 = vld [vmem:[#allocation6 + $0x13d0] sm:$0xff] }
 0x68b   : > { %v4843_v58 = vpack.c.bf16 %v2969_v0, %v2963_v19  ;;  %v2815_v17 = vld [vmem:[#allocation6 + $0x1318] sm:$0xff]  ;;  %v2804_v19 = vld [vmem:[#allocation6 + $0x12c0] sm:$0xff]  ;;  %v2841_v20 = vld [vmem:[#allocation6 + $0x13e8] sm:$0xff] }
 0x68d   : > { %4702 = vmatpush1.bf16.msra.mxu1 %v4701_v23  ;;  %4830 = vmatpush1.bf16.msra.mxu0 %v4829_v27  ;;  %v2962_v23 = vld [vmem:[#allocation6 + $0x17b0] sm:$0xff]  ;;  %v2968_v27 = vld [vmem:[#allocation6 + $0x17e0] sm:$0xff] }
 0x68e   : > { %4704 = vmatprep.subr.bf16.mxu1 %v4703_v54  ;;  %4832 = vmatprep.subr.bf16.mxu0 %v4831_v5  ;;  %v2785_v54 = vld [vmem:[#allocation6 + $0x1228] sm:$0xff]  ;;  %v2791_v5 = vld [vmem:[#allocation6 + $0x1258] sm:$0xff]  ;;  %v4845_v21 = vpack.c.bf16 %v2968_v27, %v2962_v23 }
 0x68f   : > { %v4847_v14 = vpack.c.bf16 %v2791_v5, %v2785_v54  ;;  %v2827_v23 = vld [vmem:[#allocation6 + $0x1378] sm:$0xff]  ;;  %v2816_v54 = vld [vmem:[#allocation6 + $0x1320] sm:$0xff] }
 0x691   : > { %4706 = vmatpush1.bf16.msra.mxu1 %v4705_v63  ;;  %4834 = vmatpush1.bf16.msra.mxu0 %v4833_v25  ;;  %v2784_v63 = vld [vmem:[#allocation6 + $0x1220] sm:$0xff]  ;;  %v2790_v25 = vld [vmem:[#allocation6 + $0x1250] sm:$0xff] }
 0x692   : > { %4708 = vmatprep.subr.bf16.mxu1 %v4707_v10  ;;  %4836 = vmatprep.subr.bf16.mxu0 %v4835_v24  ;;  %v2797_v10 = vld [vmem:[#allocation6 + $0x1288] sm:$0xff]  ;;  %v2803_v24 = vld [vmem:[#allocation6 + $0x12b8] sm:$0xff]  ;;  %v4849_v12 = vpack.c.bf16 %v2790_v25, %v2784_v63 }
 0x693   : > { %v4851_v62 = vpack.c.bf16 %v2803_v24, %v2797_v10  ;;  %v2839_v63 = vld [vmem:[#allocation6 + $0x13d8] sm:$0xff]  ;;  %v2828_v10 = vld [vmem:[#allocation6 + $0x1380] sm:$0xff] }
 0x694   : > { %v2832_v24 = vld [vmem:[#allocation6 + $0x13a0] sm:$0xff] }
 0x695   : > { %4710 = vmatpush1.bf16.msra.mxu1 %v4709_v30  ;;  %4838 = vmatpush1.bf16.msra.mxu0 %v4837_v47  ;;  %v2796_v30 = vld [vmem:[#allocation6 + $0x1280] sm:$0xff]  ;;  %v2802_v47 = vld [vmem:[#allocation6 + $0x12b0] sm:$0xff] }
 0x696   : > { %4712 = vmatprep.subr.bf16.mxu1 %v4711_v60  ;;  %4840 = vmatprep.subr.bf16.mxu0 %v4839_v11  ;;  %v2811_v60 = vld [vmem:[#allocation6 + $0x12f8] sm:$0xff]  ;;  %v2809_v11 = vld [vmem:[#allocation6 + $0x12e8] sm:$0xff]  ;;  %v4853_v7 = vpack.c.bf16 %v2802_v47, %v2796_v30 }
 0x697   : > { %v4727_v0 = vpack.c.bf16 %v2811_v60, %v2805_v2  ;;  %v2851_v30 = vld [vmem:[#allocation6 + $0x1438] sm:$0xff]  ;;  %v4865_v2 = vpack.c.bf16 %v2838_v18, %v2832_v24 }
 0x698   : > { %v2887_v24 = vld [vmem:[#allocation6 + $0x1558] sm:$0xff] }
 0x699   : > { %4714 = vmatpush1.bf16.msra.mxu1 %v4713_v38  ;;  %4842 = vmatpush1.bf16.msra.mxu0 %v4841_v32  ;;  %v4855_v38 = vpack.c.bf16 %v2815_v17, %v2809_v11  ;;  %v2808_v32 = vld [vmem:[#allocation6 + $0x12e0] sm:$0xff]  ;;  %v2846_v17 = vld [vmem:[#allocation6 + $0x1410] sm:$0xff] }
 0x69a   : > { %4716 = vmatprep.subr.bf16.mxu1 %v4715_v9  ;;  %4844 = vmatprep.subr.bf16.mxu0 %v4843_v58  ;;  %v2823_v9 = vld [vmem:[#allocation6 + $0x1358] sm:$0xff]  ;;  %v2821_v58 = vld [vmem:[#allocation6 + $0x1348] sm:$0xff]  ;;  %v4857_v52 = vpack.c.bf16 %v2814_v15, %v2808_v32  ;;  %v2840_v11 = vld [vmem:[#allocation6 + $0x13e0] sm:$0xff] }
 0x69b   : > { %v4731_v5 = vpack.c.bf16 %v2823_v9, %v2817_v48  ;;  %v4741_v32 = vpack.c.bf16 %v2846_v17, %v2840_v11  ;;  %v2858_v9 = vld [vmem:[#allocation6 + $0x1470] sm:$0xff]  ;;  %v2893_v11 = vld [vmem:[#allocation6 + $0x1588] sm:$0xff]  ;;  %v2899_v17 = vld [vmem:[#allocation6 + $0x15b8] sm:$0xff] }
 0x69d   : > { %4718 = vmatpush1.bf16.msra.mxu1 %v4717_v46  ;;  %4846 = vmatpush1.bf16.msra.mxu0 %v4845_v21  ;;  %v4859_v46 = vpack.c.bf16 %v2827_v23, %v2821_v58  ;;  %v2820_v21 = vld [vmem:[#allocation6 + $0x1340] sm:$0xff] }
 0x69e   : > { %4720 = vmatprep.subr.bf16.mxu1 %v4719_v56  ;;  %4848 = vmatprep.subr.bf16.mxu0 %v4847_v14  ;;  %v2826_v56 = vld [vmem:[#allocation6 + $0x1370] sm:$0xff]  ;;  %v2829_v14 = vld [vmem:[#allocation6 + $0x1388] sm:$0xff]  ;;  %v2856_v58 = vld [vmem:[#allocation6 + $0x1460] sm:$0xff] }
 0x69f   : > { %v4861_v34 = vpack.c.bf16 %v2826_v56, %v2820_v21 }
 0x6a0   : > { %2756 = vmatmul.mubr.f32.vlgmr.msra.gmra.mrb[40].mxu1 %v6369_v57  ;;  %3157 = vmatmul.mubr.f32.vlgmr.msra.gmra.mrb[28].mxu0 %v6412_v33  ;;  %v2810_v57 = vld [vmem:[#allocation6 + $0x12f0] sm:$0xff] }
 0x6a1   : > { %2761 = vmatprep.mubr.f32.mxu1 %v6376_v50  ;;  %4722 = vmatpush1.bf16.msra.mxu1 %v4721_v49  ;;  %v6422_v50 = vld [vmem:[%s6294_s11 + $0x18] sm:$0xff]  ;;  %v4729_v27 = vpack.c.bf16 %v2810_v57, %v2804_v19  ;;  %v4735_v49 = vpack.c.bf16 %v2835_v59, %v2829_v14  ;;  %v2853_v19 = vld [vmem:[#allocation6 + $0x1448] sm:$0xff]  ;;  %v2864_v14 = vld [vmem:[#allocation6 + $0x14a0] sm:$0xff] }
 0x6a2   : > { %3162 = vmatprep.mubr.f32.mxu0 %v6417_v37  ;;  %4850 = vmatpush1.bf16.msra.mxu0 %v4849_v12  ;;  %v4863_v12 = vpack.c.bf16 %v2839_v63, %v2833_v6  ;;  %v2859_v57 = vld [vmem:[#allocation6 + $0x1478] sm:$0xff]  ;;  %v2870_v59 = vld [vmem:[#allocation6 + $0x14d0] sm:$0xff]  ;;  %v2868_v6 = vld [vmem:[#allocation6 + $0x14c0] sm:$0xff] }
 0x6a3   : > { %4724 = vmatprep.subr.bf16.mxu1 %v4723_v45  ;;  %4852 = vmatprep.subr.bf16.mxu0 %v4851_v62  ;;  %v2847_v45 = vld [vmem:[#allocation6 + $0x1418] sm:$0xff]  ;;  %v2845_v62 = vld [vmem:[#allocation6 + $0x1408] sm:$0xff]  ;;  %v4743_v48 = vpack.c.bf16 %v2859_v57, %v2853_v19  ;;  %v2888_v19 = vld [vmem:[#allocation6 + $0x1560] sm:$0xff] }
 0x6a4   : > { %2762 = vmatmul.mubr.f32.gmra.mrb[42].mxu1 %v6379_v28  ;;  %3163 = vmatmul.mubr.f32.gmra.mrb[30].mxu0 %v6422_v50  ;;  %v2822_v28 = vld [vmem:[#allocation6 + $0x1350] sm:$0xff]  ;;  %v4739_v60 = vpack.c.bf16 %v2847_v45, %v2841_v20  ;;  %v2876_v20 = vld [vmem:[#allocation6 + $0x1500] sm:$0xff] }
 0x6a5   : > { %2767 = vmatprep.mubr.f32.mxu1 %v6386_v1  ;;  %4726 = vmatpush1.bf16.msra.mxu1 %v4725_v36  ;;  %v6432_v1 = vld [vmem:[%s6294_s11 + $0x30] sm:$0xff]  ;;  %v4733_v25 = vpack.c.bf16 %v2822_v28, %v2816_v54  ;;  %v2844_v36 = vld [vmem:[#allocation6 + $0x1400] sm:$0xff]  ;;  %v2871_v54 = vld [vmem:[#allocation6 + $0x14d8] sm:$0xff] }
 0x6a6   : > { %3168 = vmatprep.mubr.f32.mxu0 %v6427_v51  ;;  %4854 = vmatpush1.bf16.msra.mxu0 %v4853_v7  ;;  %v2850_v7 = vld [vmem:[#allocation6 + $0x1430] sm:$0xff]  ;;  %v2869_v28 = vld [vmem:[#allocation6 + $0x14c8] sm:$0xff] }
 0x6a7   : > { %4728 = vmatprep.subr.bf16.mxu1 %v4727_v0  ;;  %4856 = vmatprep.subr.bf16.mxu0 %v4855_v38  ;;  %v2857_v0 = vld [vmem:[#allocation6 + $0x1468] sm:$0xff]  ;;  %v2863_v38 = vld [vmem:[#allocation6 + $0x1498] sm:$0xff]  ;;  %v4869_v15 = vpack.c.bf16 %v2850_v7, %v2844_v36  ;;  %v2882_v45 = vld [vmem:[#allocation6 + $0x1530] sm:$0xff] }
 0x6a8   : > { %2768 = vmatmul.mubr.f32.gmra.mrb[44].mxu1 %v6389_v13  ;;  %3169 = vmatmul.mubr.f32.gmra.mrb[32].mxu0 %v6432_v1  ;;  %v2834_v13 = vld [vmem:[#allocation6 + $0x13b0] sm:$0xff]  ;;  %v4871_v23 = vpack.c.bf16 %v2863_v38, %v2857_v0  ;;  %v4753_v36 = vpack.c.bf16 %v2882_v45, %v2876_v20  ;;  %v2892_v0 = vld [vmem:[#allocation6 + $0x1580] sm:$0xff]  ;;  %v4883_v38 = vpack.c.bf16 %v2899_v17, %v2893_v11  ;;  %v2929_v20 = vld [vmem:[#allocation6 + $0x16a8] sm:$0xff] }
 0x6a9   : > { %2773 = vmatprep.mubr.f32.mxu1 %v6396_v35  ;;  %4730 = vmatpush1.bf16.msra.mxu1 %v4729_v27  ;;  %v6442_v35 = vld [vmem:[%s6294_s11 + $0x48] sm:$0xff]  ;;  %v4737_v47 = vpack.c.bf16 %v2834_v13, %v2828_v10  ;;  %v2862_v27 = vld [vmem:[#allocation6 + $0x1490] sm:$0xff]  ;;  %v2883_v10 = vld [vmem:[#allocation6 + $0x1538] sm:$0xff] }
 0x6aa   : > { %3174 = vmatprep.mubr.f32.mxu0 %v6437_v55  ;;  %4858 = vmatpush1.bf16.msra.mxu0 %v4857_v52  ;;  %v2865_v52 = vld [vmem:[#allocation6 + $0x14a8] sm:$0xff]  ;;  %v4873_v21 = vpack.c.bf16 %v2862_v27, %v2856_v58  ;;  %v2894_v57 = vld [vmem:[#allocation6 + $0x1590] sm:$0xff]  ;;  %v2935_v45 = vld [vmem:[#allocation6 + $0x16d8] sm:$0xff] }
 0x6ab   : > { %4732 = vmatprep.subr.bf16.mxu1 %v4731_v5  ;;  %4860 = vmatprep.subr.bf16.mxu0 %v4859_v46  ;;  %v2875_v5 = vld [vmem:[#allocation6 + $0x14f8] sm:$0xff]  ;;  %v4747_v56 = vpack.c.bf16 %v2871_v54, %v2865_v52  ;;  %v2881_v13 = vld [vmem:[#allocation6 + $0x1528] sm:$0xff]  ;;  %v4757_v58 = vpack.c.bf16 %v2894_v57, %v2888_v19  ;;  %v2900_v52 = vld [vmem:[#allocation6 + $0x15c0] sm:$0xff]  ;;  %v4895_v17 = vpack.c.bf16 %v2935_v45, %v2929_v20 }
 0x6ac   : > { %2774 = vmatmul.mubr.f32.gmra.mrb[46].mxu1 %v6399_v3  ;;  %3175 = vmatmul.mubr.f32.gmra.mrb[34].mxu0 %v6442_v35  ;;  %v4867_v3 = vpack.c.bf16 %v2851_v30, %v2845_v62  ;;  %v4875_v63 = vpack.c.bf16 %v2875_v5, %v2869_v28  ;;  %v2880_v62 = vld [vmem:[#allocation6 + $0x1520] sm:$0xff]  ;;  %v4879_v30 = vpack.c.bf16 %v2887_v24, %v2881_v13  ;;  %v2906_v54 = vld [vmem:[#allocation6 + $0x15f0] sm:$0xff]  ;;  %v2941_v19 = vld [vmem:[#allocation6 + $0x1708] sm:$0xff] }
 0x6ad   : > { %4734 = vmatpush1.bf16.msra.mxu1 %v4733_v25  ;;  %3067 = vmatprep.mubr.f32.mxu1 %v6407_v44  ;;  %v2874_v25 = vld [vmem:[#allocation6 + $0x14f0] sm:$0xff]  ;;  %v2904_v28 = vld [vmem:[#allocation6 + $0x15e0] sm:$0xff]  ;;  %v2947_v57 = vld [vmem:[#allocation6 + $0x1738] sm:$0xff] }
 0x6ae   : > { %4862 = vmatpush1.bf16.msra.mxu0 %v4861_v34  ;;  %3245 = vmatprep.mubr.f32.mxu0 %v6407_v44  ;;  %v2852_v44 = vld [vmem:[#allocation6 + $0x1440] sm:$0xff]  ;;  %v2877_v34 = vld [vmem:[#allocation6 + $0x1508] sm:$0xff] }
 0x6af   : > { %4736 = vmatprep.subr.bf16.mxu1 %v4735_v49  ;;  %4864 = vmatprep.subr.bf16.mxu0 %v4863_v12  ;;  %v4745_v46 = vpack.c.bf16 %v2858_v9, %v2852_v44  ;;  %v4749_v49 = vpack.c.bf16 %v2870_v59, %v2864_v14  ;;  %v4877_v12 = vpack.c.bf16 %v2874_v25, %v2868_v6  ;;  %v2905_v44 = vld [vmem:[#allocation6 + $0x15e8] sm:$0xff]  ;;  %v2911_v9 = vld [vmem:[#allocation6 + $0x1618] sm:$0xff]  ;;  %v2916_v13 = vld [vmem:[#allocation6 + $0x1640] sm:$0xff] }
 0x6b0   : > { %v4751_v18 = vpack.c.bf16 %v2883_v10, %v2877_v34  ;;  %v4887_v5 = vpack.c.bf16 %v2911_v9, %v2905_v44  ;;  %v2917_v14 = vld [vmem:[#allocation6 + $0x1648] sm:$0xff]  ;;  %v2923_v59 = vld [vmem:[#allocation6 + $0x1678] sm:$0xff]  ;;  %v4761_v6 = vpack.c.bf16 %v2906_v54, %v2900_v52  ;;  %v2912_v34 = vld [vmem:[#allocation6 + $0x1620] sm:$0xff]  ;;  %v4899_v9 = vpack.c.bf16 %v2947_v57, %v2941_v19 }
 0x6b1   : > { %4738 = vmatpush1.bf16.msra.mxu1 %v4737_v47  ;;  %v2886_v47 = vld [vmem:[#allocation6 + $0x1550] sm:$0xff]  ;;  %v4891_v24 = vpack.c.bf16 %v2923_v59, %v2917_v14  ;;  %v2928_v11 = vld [vmem:[#allocation6 + $0x16a0] sm:$0xff]  ;;  %v2953_v52 = vld [vmem:[#allocation6 + $0x1768] sm:$0xff] }
 0x6b2   : > { %4866 = vmatpush1.bf16.msra.mxu0 %v4865_v2  ;;  %4740 = vmatprep.subr.bf16.mxu1 %v4739_v60  ;;  %v2889_v2 = vld [vmem:[#allocation6 + $0x1568] sm:$0xff]  ;;  %v2895_v60 = vld [vmem:[#allocation6 + $0x1598] sm:$0xff]  ;;  %v2918_v10 = vld [vmem:[#allocation6 + $0x1650] sm:$0xff] }
 0x6b3   : > { %4868 = vmatprep.subr.bf16.mxu0 %v4867_v3  ;;  %v4881_v3 = vpack.c.bf16 %v2886_v47, %v2880_v62  ;;  %v4755_v7 = vpack.c.bf16 %v2895_v60, %v2889_v2  ;;  %v4765_v62 = vpack.c.bf16 %v2918_v10, %v2912_v34  ;;  %v2924_v2 = vld [vmem:[#allocation6 + $0x1680] sm:$0xff]  ;;  %v2930_v60 = vld [vmem:[#allocation6 + $0x16b0] sm:$0xff]  ;;  %v2959_v54 = vld [vmem:[#allocation6 + $0x1798] sm:$0xff] }
 0x6b4   : > { %v2940_v44 = vld [vmem:[#allocation6 + $0x1700] sm:$0xff]  ;;  %v4903_v59 = vpack.c.bf16 %v2959_v54, %v2953_v52  ;;  %v2965_v34 = vld [vmem:[#allocation6 + $0x17c8] sm:$0xff]  ;;  %v2971_v10 = vld [vmem:[#allocation6 + $0x17f8] sm:$0xff] }
 0x6b5   : > { %4742 = vmatpush1.bf16.msra.mxu1 %v4741_v32  ;;  %v2898_v32 = vld [vmem:[#allocation6 + $0x15b0] sm:$0xff]  ;;  %v2952_v14 = vld [vmem:[#allocation6 + $0x1760] sm:$0xff]  ;;  %v4907_v20 = vpack.c.bf16 %v2971_v10, %v2965_v34 }
 0x6b6   : > { %4870 = vmatpush1.bf16.msra.mxu0 %v4869_v15  ;;  %4744 = vmatprep.subr.bf16.mxu1 %v4743_v48  ;;  %v2901_v15 = vld [vmem:[#allocation6 + $0x15c8] sm:$0xff]  ;;  %v2907_v48 = vld [vmem:[#allocation6 + $0x15f8] sm:$0xff]  ;;  %v2964_v45 = vld [vmem:[#allocation6 + $0x17c0] sm:$0xff] }
 0x6b7   : > { %4872 = vmatprep.subr.bf16.mxu0 %v4871_v23  ;;  %v4885_v23 = vpack.c.bf16 %v2898_v32, %v2892_v0  ;;  %v4759_v27 = vpack.c.bf16 %v2907_v48, %v2901_v15  ;;  %v4769_v0 = vpack.c.bf16 %v2930_v60, %v2924_v2  ;;  %v2936_v15 = vld [vmem:[#allocation6 + $0x16e0] sm:$0xff]  ;;  %v2942_v48 = vld [vmem:[#allocation6 + $0x1710] sm:$0xff] }
 0x6b9   : > { %4746 = vmatpush1.bf16.msra.mxu1 %v4745_v46  ;;  %v2910_v46 = vld [vmem:[#allocation6 + $0x1610] sm:$0xff] }
 0x6ba   : > { %4874 = vmatpush1.bf16.msra.mxu0 %v4873_v21  ;;  %4748 = vmatprep.subr.bf16.mxu1 %v4747_v56  ;;  %v2913_v21 = vld [vmem:[#allocation6 + $0x1628] sm:$0xff]  ;;  %v2919_v56 = vld [vmem:[#allocation6 + $0x1658] sm:$0xff] }
 0x6bb   : > { %4876 = vmatprep.subr.bf16.mxu0 %v4875_v63  ;;  %v4889_v63 = vpack.c.bf16 %v2910_v46, %v2904_v28  ;;  %v4763_v25 = vpack.c.bf16 %v2919_v56, %v2913_v21  ;;  %v4773_v28 = vpack.c.bf16 %v2942_v48, %v2936_v15  ;;  %v2948_v21 = vld [vmem:[#allocation6 + $0x1740] sm:$0xff]  ;;  %v2954_v56 = vld [vmem:[#allocation6 + $0x1770] sm:$0xff] }
 0x6bd   : > { %4750 = vmatpush1.bf16.msra.mxu1 %v4749_v49  ;;  %v2922_v49 = vld [vmem:[#allocation6 + $0x1670] sm:$0xff] }
 0x6be   : > { %4878 = vmatpush1.bf16.msra.mxu0 %v4877_v12  ;;  %4752 = vmatprep.subr.bf16.mxu1 %v4751_v18  ;;  %v2925_v12 = vld [vmem:[#allocation6 + $0x1688] sm:$0xff]  ;;  %v2931_v18 = vld [vmem:[#allocation6 + $0x16b8] sm:$0xff] }
 0x6bf   : > { %4880 = vmatprep.subr.bf16.mxu0 %v4879_v30  ;;  %v4893_v30 = vpack.c.bf16 %v2922_v49, %v2916_v13  ;;  %v4767_v47 = vpack.c.bf16 %v2931_v18, %v2925_v12  ;;  %v4777_v13 = vpack.c.bf16 %v2954_v56, %v2948_v21  ;;  %v2960_v12 = vld [vmem:[#allocation6 + $0x17a0] sm:$0xff]  ;;  %v2966_v18 = vld [vmem:[#allocation6 + $0x17d0] sm:$0xff] }
 0x6c1   : > { %4754 = vmatpush1.bf16.msra.mxu1 %v4753_v36  ;;  %v2934_v36 = vld [vmem:[#allocation6 + $0x16d0] sm:$0xff] }
 0x6c2   : > { %4882 = vmatpush1.bf16.msra.mxu0 %v4881_v3  ;;  %4756 = vmatprep.subr.bf16.mxu1 %v4755_v7  ;;  %v2937_v3 = vld [vmem:[#allocation6 + $0x16e8] sm:$0xff]  ;;  %v2943_v7 = vld [vmem:[#allocation6 + $0x1718] sm:$0xff] }
 0x6c3   : > { %4884 = vmatprep.subr.bf16.mxu0 %v4883_v38  ;;  %v4897_v38 = vpack.c.bf16 %v2934_v36, %v2928_v11  ;;  %v4771_v32 = vpack.c.bf16 %v2943_v7, %v2937_v3 }
 0x6c5   : > { %4758 = vmatpush1.bf16.msra.mxu1 %v4757_v58  ;;  %v2946_v58 = vld [vmem:[#allocation6 + $0x1730] sm:$0xff] }
 0x6c6   : > { %4886 = vmatpush1.bf16.msra.mxu0 %v4885_v23  ;;  %4760 = vmatprep.subr.bf16.mxu1 %v4759_v27  ;;  %v2949_v23 = vld [vmem:[#allocation6 + $0x1748] sm:$0xff]  ;;  %v2955_v27 = vld [vmem:[#allocation6 + $0x1778] sm:$0xff] }
 0x6c7   : > { %4888 = vmatprep.subr.bf16.mxu0 %v4887_v5  ;;  %v4901_v5 = vpack.c.bf16 %v2946_v58, %v2940_v44  ;;  %v4775_v46 = vpack.c.bf16 %v2955_v27, %v2949_v23  ;;  %v6480_v58 = vld [vmem:[#allocation12 + $0x11] sm:$0x3f]  ;;  %v6482_v23 = vld [vmem:[#allocation12 + $0x17] sm:$0x3f] }
 0x6c8   : > { %v2494_v27 = vrot.slane %v6480_v58, %v6187_v26  ;;  %v2984_v52 = vrot.slane %v6482_v23, %v6187_v26  ;;  %v2498_v54 = vrot.slane %v6480_v58, %v6194_v29  ;;  %v2490_v21 = vrot.slane %v6480_v58, %v5963_v43 }
 0x6c9   : > { %4762 = vmatpush1.bf16.msra.mxu1 %v4761_v6  ;;  %v2958_v6 = vld [vmem:[#allocation6 + $0x1790] sm:$0xff]  ;;  %v2980_v56 = vrot.slane %v6482_v23, %v5963_v43 }
 0x6ca   : > { %4890 = vmatpush1.bf16.msra.mxu0 %v4889_v63  ;;  %4764 = vmatprep.subr.bf16.mxu1 %v4763_v25  ;;  %v2961_v63 = vld [vmem:[#allocation6 + $0x17a8] sm:$0xff]  ;;  %v2967_v25 = vld [vmem:[#allocation6 + $0x17d8] sm:$0xff] }
 0x6cb   : > { %4892 = vmatprep.subr.bf16.mxu0 %v4891_v24  ;;  %v4905_v24 = vpack.c.bf16 %v2958_v6, %v2952_v14  ;;  %v4779_v49 = vpack.c.bf16 %v2967_v25, %v2961_v63  ;;  %v4971_v14 = vadd.f32 %v2984_v52, %v2494_v27  ;;  %v4957_v6 = vadd.f32 %v2980_v56, %v2490_v21 }
 0x6cd   : > { %4766 = vmatpush1.bf16.msra.mxu1 %v4765_v62  ;;  %v2970_v62 = vld [vmem:[#allocation6 + $0x17f0] sm:$0xff] }
 0x6ce   : > { %4894 = vmatpush1.bf16.msra.mxu0 %v4893_v30  ;;  %4768 = vmatprep.subr.bf16.mxu1 %v4767_v47  ;;  %v4781_v30 = vpack.c.bf16 %v2966_v18, %v2960_v12  ;;  %v4909_v47 = vpack.c.bf16 %v2970_v62, %v2964_v45 }
 0x6cf   : > { %4896 = vmatprep.subr.bf16.mxu0 %v4895_v17 }
 0x6d1   : > { %4770 = vmatpush1.bf16.msra.mxu1 %v4769_v0 }
 0x6d2   : > { %4898 = vmatpush1.bf16.msra.mxu0 %v4897_v38  ;;  %4772 = vmatprep.subr.bf16.mxu1 %v4771_v32 }
 0x6d3   : > { %4900 = vmatprep.subr.bf16.mxu0 %v4899_v9 }
 0x6d5   : > { %4774 = vmatpush1.bf16.msra.mxu1 %v4773_v28  ;;  %v2988_v28 = vrot.slane %v6482_v23, %v6194_v29 }
 0x6d6   : > { %4902 = vmatpush1.bf16.msra.mxu0 %v4901_v5  ;;  %4776 = vmatprep.subr.bf16.mxu1 %v4775_v46  ;;  %v2486_v5 = vrot.slane %v6480_v58, %v5960_v41  ;;  %v2976_v46 = vrot.slane %v6482_v23, %v5960_v41 }
 0x6d7   : > { %4904 = vmatprep.subr.bf16.mxu0 %v4903_v59  ;;  %v6500_v26 = vadd.f32 %v2988_v28, %v2498_v54 }
 0x6d8   : > { %v4955_v59 = vadd.f32 %v2976_v46, %v2486_v5 }
 0x6d9   : > { %4778 = vmatpush1.bf16.msra.mxu1 %v4777_v13 }
 0x6da   : > { %4906 = vmatpush1.bf16.msra.mxu0 %v4905_v24  ;;  %4780 = vmatprep.subr.bf16.mxu1 %v4779_v49 }
 0x6db   : > { %4908 = vmatprep.subr.bf16.mxu0 %v4907_v20 }
 0x6dd   : > { %4782 = vmatpush1.bf16.msra.mxu1 %v4781_v30 }
 0x6de   : > { %4910 = vmatpush1.bf16.msra.mxu0 %v4909_v47 }
 0x6e0   : > { %3068 = vmatmul.mubr.f32.vlgmr.msra.gmra.mrb[32].mxu1 %v6412_v33 }
 0x6e1   : > { %3246 = vmatmul.mubr.f32.vlgmr.msra.gmra.mrb[36].mxu0 %v6412_v33  ;;  %3073 = vmatprep.mubr.f32.mxu1 %v6417_v37 }
 0x6e2   : > { %3251 = vmatprep.mubr.f32.mxu0 %v6417_v37 }
 0x6e4   : > { %3074 = vmatmul.mubr.f32.gmra.mrb[34].mxu1 %v6422_v50 }
 0x6e5   : > { %3252 = vmatmul.mubr.f32.gmra.mrb[38].mxu0 %v6422_v50  ;;  %3079 = vmatprep.mubr.f32.mxu1 %v6427_v51 }
 0x6e6   : > { %3257 = vmatprep.mubr.f32.mxu0 %v6427_v51 }
 0x6e8   : > { %3080 = vmatmul.mubr.f32.gmra.mrb[36].mxu1 %v6432_v1 }
 0x6e9   : > { %3258 = vmatmul.mubr.f32.gmra.mrb[40].mxu0 %v6432_v1  ;;  %3085 = vmatprep.mubr.f32.mxu1 %v6437_v55 }
 0x6ea   : > { %3263 = vmatprep.mubr.f32.mxu0 %v6437_v55 }
 0x6ec   : > { %3086 = vmatmul.mubr.f32.gmra.mrb[38].mxu1 %v6442_v35 }
 0x6ed   : > { %3264 = vmatmul.mubr.f32.gmra.mrb[42].mxu0 %v6442_v35  ;;  %3519 = vmatprep.mubr.f32.mxu1 %v5596_v16 }
 0x773   : > { %v6462_v2 = vpop.f32.mrb[40].mxu1  ;;  %v3158_v60 = vpop.f32.mrb[28].mxu0 }
 0x774   : > { %v6464_v11 = vpop.f32.mrb[41].mxu1  ;;  %v3160_v17 = vpop.f32.mrb[29].mxu0  ;;  %v4972_v63 = vadd.f32 %v4971_v14, %v3158_v60 }
 0x775   : > { %v4974_v29 = vadd.f32 %v6500_v26, %v3160_v17 }
 0x776   : > { %v3920_v49 = vmul.f32 -1.442695, %v4972_v63 }
 0x777   : > { %v6466_v36 = vpop.f32.mrb[42].mxu1  ;;  %v3164_v3 = vpop.f32.mrb[30].mxu0  ;;  %v3921_v43 = vmul.f32 -1.442695, %v4974_v29 }
 0x778   : > { %v6468_v7 = vpop.f32.mrb[43].mxu1  ;;  %v3166_v19 = vpop.f32.mrb[31].mxu0  ;;  %v4976_v12 = vadd.f32 %v4971_v14, %v3164_v3 }
 0x779   : > { %v4978_v20 = vadd.f32 %v6500_v26, %v3166_v19 }
 0x77a   : > { %v3922_v52 = vmul.f32 -1.442695, %v4976_v12 }
 0x77b   : > { %v6470_v57 = vpop.f32.mrb[44].mxu1  ;;  %v3170_v0 = vpop.f32.mrb[32].mxu0  ;;  %v3923_v3 = vmul.f32 -1.442695, %v4978_v20 }
 0x77c   : > { %v6472_v38 = vpop.f32.mrb[45].mxu1  ;;  %v3172_v32 = vpop.f32.mrb[33].mxu0  ;;  %v4980_v54 = vadd.f32 %v4971_v14, %v3170_v0 }
 0x77d   : > { %v4982_v5 = vadd.f32 %v6500_v26, %v3172_v32 }
 0x77f   : > { %v6474_v15 = vpop.f32.mrb[46].mxu1  ;;  %v3176_v48 = vpop.f32.mrb[34].mxu0  ;;  %v3925_v0 = vmul.f32 -1.442695, %v4982_v5 }
 0x780   : > { %v6476_v44 = vpop.f32.mrb[47].mxu1  ;;  %v6478_v9 = vpop.f32.mrb[35].mxu0  ;;  %v4984_v12 = vadd.f32 %v4971_v14, %v3176_v48 }
 0x7b3   : > { %v3069_v25 = vpop.f32.mrb[32].mxu1 }
 0x7b4   : > { %v4956_v34 = vadd.f32 %v4955_v59, %v3069_v25  ;;  %v6503_v10 = vpop.f32.mrb[36].mxu0  ;;  %v3071_v13 = vpop.f32.mrb[33].mxu1 }
 0x7b5   : > { %v4958_v41 = vadd.f32 %v4957_v6, %v3071_v13  ;;  %v6505_v24 = vpop.f32.mrb[37].mxu0 }
 0x7b6   : > { %v3912_v18 = vmul.f32 -1.442695, %v4956_v34  ;;  %v3924_v34 = vmul.f32 -1.442695, %v4980_v54 }
 0x7b7   : > { %v3913_v45 = vmul.f32 -1.442695, %v4958_v41  ;;  %v3075_v62 = vpop.f32.mrb[34].mxu1 }
 0x7b8   : > { %5228 = vpow2.f32 %v3912_v18  ;;  %v4960_v30 = vadd.f32 %v4955_v59, %v3075_v62  ;;  %v6508_v47 = vpop.f32.mrb[38].mxu0  ;;  %v3077_v60 = vpop.f32.mrb[35].mxu1 }
 0x7b9   : > { %5230 = vpow2.f32 %v3913_v45  ;;  %v4962_v17 = vadd.f32 %v4957_v6, %v3077_v60  ;;  %v6510_v27 = vpop.f32.mrb[39].mxu0 }
 0x7ba   : > { %5232 = vpow2.f32 %v3920_v49  ;;  %v3914_v28 = vmul.f32 -1.442695, %v4960_v30 }
 0x7bb   : > { %5234 = vpow2.f32 %v3921_v43  ;;  %v3915_v19 = vmul.f32 -1.442695, %v4962_v17  ;;  %v3081_v46 = vpop.f32.mrb[36].mxu1 }
 0x7bc   : > { %5236 = vpow2.f32 %v3914_v28  ;;  %v4964_v21 = vadd.f32 %v4955_v59, %v3081_v46  ;;  %v6513_v56 = vpop.f32.mrb[40].mxu0  ;;  %v3083_v63 = vpop.f32.mrb[37].mxu1  ;;  %v3926_v28 = vmul.f32 -1.442695, %v4984_v12  ;;  %v6533_v12 = vrot.slane %v6480_v58, %v6234_v53 }
 0x7bd   : > { %5238 = vpow2.f32 %v3915_v19  ;;  %v4966_v29 = vadd.f32 %v4957_v6, %v3083_v63  ;;  %v6515_v25 = vpop.f32.mrb[41].mxu0 }
 0x7be   : > { %5240 = vpow2.f32 %v3922_v52  ;;  %v3916_v13 = vmul.f32 -1.442695, %v4964_v21 }
 0x7bf   : > { %5242 = vpow2.f32 %v3923_v3  ;;  %v3917_v41 = vmul.f32 -1.442695, %v4966_v29  ;;  %v3087_v49 = vpop.f32.mrb[38].mxu1 }
 0x7c0   : > { %5244 = vpow2.f32 %v3916_v13  ;;  %v4968_v32 = vadd.f32 %v4955_v59, %v3087_v49  ;;  %v6517_v18 = vpop.f32.mrb[42].mxu0  ;;  %v3089_v43 = vpop.f32.mrb[39].mxu1  ;;  %v6525_v13 = vrot.slane %v6482_v23, %v6234_v53 }
 0x7c1   : > { %5246 = vpow2.f32 %v3917_v41  ;;  %v4970_v20 = vadd.f32 %v4957_v6, %v3089_v43  ;;  %v6519_v45 = vpop.f32.mrb[43].mxu0  ;;  %v4986_v6 = vadd.f32 %v6500_v26, %v6478_v9  ;;  %v6529_v9 = vrot.slane %v6482_v23, %v6239_v61 }
 0x7c2   : > { %v5229_v62 = vpop.eup %5228  ;;  %5248 = vpow2.f32 %v3924_v34  ;;  %v3918_v30 = vmul.f32 -1.442695, %v4968_v32  ;;  %v3248_v23 = vadd.f32 %v6503_v10, %v6525_v13 }
 0x7c3   : > { %v5231_v60 = vpop.eup %5230  ;;  %5250 = vpow2.f32 %v3925_v0  ;;  %v3302_v17 = vadd.f32 1.0, %v5229_v62  ;;  %v3919_v52 = vmul.f32 -1.442695, %v4970_v20  ;;  %v3927_v41 = vmul.f32 -1.442695, %v4986_v6 }
 0x7c4   : > { %v5233_v54 = vpop.eup %5232  ;;  %v3303_v3 = vadd.f32 1.0, %v5231_v60  ;;  %5252 = vpow2.f32 %v3918_v30  ;;  %v6537_v62 = vrot.slane %v6480_v58, %v6239_v61  ;;  %v3250_v53 = vadd.f32 %v6505_v24, %v6529_v9 }
 0x7c5   : > { %v5235_v48 = vpop.eup %5234  ;;  %5254 = vrcp.f32 %v3302_v17  ;;  %v3358_v5 = vadd.f32 1.0, %v5233_v54 }
 0x7c6   : > { %v5237_v14 = vpop.eup %5236  ;;  %5256 = vrcp.f32 %v3303_v3  ;;  %v3359_v21 = vadd.f32 1.0, %v5235_v48  ;;  %v2758_v3 = vadd.f32 %v6462_v2, %v6533_v12  ;;  %v2760_v48 = vadd.f32 %v6464_v11, %v6537_v62 }
 0x7c7   : > { %v5239_v59 = vpop.eup %5238  ;;  %v3304_v19 = vadd.f32 1.0, %v5237_v14  ;;  %5258 = vpow2.f32 %v3919_v52  ;;  %v3256_v2 = vadd.f32 %v6510_v27, %v6529_v9  ;;  %v2764_v11 = vadd.f32 %v6466_v36, %v6533_v12 }
 0x7c8   : > { %v5241_v46 = vpop.eup %5240  ;;  %5260 = vpow2.f32 %v3926_v28  ;;  %v3305_v63 = vadd.f32 1.0, %v5239_v59  ;;  %v3262_v36 = vadd.f32 %v6515_v25, %v6529_v9 }
 0x7c9   : > { %v5243_v29 = vpop.eup %5242  ;;  %5262 = vrcp.f32 %v3304_v19  ;;  %v3360_v32 = vadd.f32 1.0, %v5241_v46 }
 0x7ca   : > { %v5245_v34 = vpop.eup %5244  ;;  %5264 = vrcp.f32 %v3305_v63  ;;  %v3361_v60 = vadd.f32 1.0, %v5243_v29 }
 0x7cb   : > { %v5247_v0 = vpop.eup %5246  ;;  %5266 = vrcp.f32 %v3358_v5  ;;  %v3306_v26 = vadd.f32 1.0, %v5245_v34  ;;  %v3254_v5 = vadd.f32 %v6508_v47, %v6525_v13  ;;  %v2766_v34 = vadd.f32 %v6468_v7, %v6537_v62 }
 0x7cc   : > { %v5249_v49 = vpop.eup %5248  ;;  %5268 = vrcp.f32 %v3359_v21  ;;  %v3307_v43 = vadd.f32 1.0, %v5247_v0 }
 0x7cd   : > { %v5251_v20 = vpop.eup %5250  ;;  %5270 = vrcp.f32 %v3306_v26  ;;  %v3362_v52 = vadd.f32 1.0, %v5249_v49  ;;  %v3260_v26 = vadd.f32 %v6513_v56, %v6525_v13 }
 0x7ce   : > { %v5253_v30 = vpop.eup %5252  ;;  %5272 = vrcp.f32 %v3307_v43  ;;  %v3363_v19 = vadd.f32 1.0, %v5251_v20  ;;  %v2770_v20 = vadd.f32 %v6470_v57, %v6533_v12  ;;  %v2776_v57 = vadd.f32 %v6474_v15, %v6533_v12 }
 0x7cf   : > { %v5255_v17 = vpop.eup %5254  ;;  %5274 = vpow2.f32 %v3927_v41  ;;  %v3308_v54 = vadd.f32 1.0, %v5253_v30  ;;  %v2778_v15 = vadd.f32 %v6476_v44, %v6537_v62 }
 0x7d0   : > { %v5257_v28 = vpop.eup %5256  ;;  %5276 = vrcp.f32 %v3360_v32  ;;  %v3382_v61 = vmul.f32 %v5255_v17, %v3248_v23 }
 0x7d1   : > { %v5259_v58 = vpop.eup %5258  ;;  %v3383_v14 = vmul.f32 %v5257_v28, %v3250_v53  ;;  %5278 = vrcp.f32 %v3308_v54 }
 0x7d2   : > { %v5261_v10 = vpop.eup %5260  ;;  %5280 = vrcp.f32 %v3361_v60  ;;  %v3390_v59 = vadd.f32 %v3382_v61, %v2758_v3  ;;  %v3309_v24 = vadd.f32 1.0, %v5259_v58  ;;  %v2772_v60 = vadd.f32 %v6472_v38, %v6537_v62 }
 0x7d3   : > { %v5263_v6 = vpop.eup %5262  ;;  %5282 = vrcp.f32 %v3362_v52  ;;  %v3391_v46 = vadd.f32 %v3383_v14, %v2760_v48  ;;  %v3364_v27 = vadd.f32 1.0, %v5261_v10  ;;  %v3266_v52 = vadd.f32 %v6517_v18, %v6525_v13 }
 0x7d4   : > { %v5265_v21 = vpop.eup %5264  ;;  %5284 = vtanh.f32 %v3390_v59  ;;  %v3384_v63 = vmul.f32 %v5263_v6, %v3254_v5  ;;  %v3268_v18 = vadd.f32 %v6519_v45, %v6529_v9 }
 0x7d5   : > { %v5267_v29 = vpop.eup %5266  ;;  %5286 = vtanh.f32 %v3391_v46  ;;  %v3385_v47 = vmul.f32 %v5265_v21, %v3256_v2 }
 0x7d6   : > { %v5269_v0 = vpop.eup %5268  ;;  %v3392_v41 = vadd.f32 %v3384_v63, %v2764_v11  ;;  %5288 = vrcp.f32 %v3309_v24  ;;  %v3406_v38 = vsub.f32 1.0, %v5267_v29  ;;  %v3422_v59 = vmul.f32 %v6412_v33, %v5267_v29  ;;  %v5332_v24 = vld [vmem:[%s6294_s11 + $0x8] sm:$0xff] }
 0x7d7   : > { %v5271_v49 = vpop.eup %5270  ;;  %5290 = vrcp.f32 %v3363_v19  ;;  %v3393_v32 = vadd.f32 %v3385_v47, %v2766_v34  ;;  %v3407_v14 = vsub.f32 1.0, %v5269_v0  ;;  %v3423_v6 = vmul.f32 %v5332_v24, %v5269_v0 }
 0x7d8   : > { %v5273_v43 = vpop.eup %5272  ;;  %5292 = vtanh.f32 %v3392_v41  ;;  %v3386_v7 = vmul.f32 %v5271_v49, %v3260_v26 }
 0x7d9   : > { %v5275_v30 = vpop.eup %5274  ;;  %5294 = vtanh.f32 %v3393_v32  ;;  %v3387_v56 = vmul.f32 %v5273_v43, %v3262_v36 }
 0x7da   : > { %v5277_v23 = vpop.eup %5276  ;;  %v3394_v17 = vadd.f32 %v3386_v7, %v2770_v20  ;;  %5296 = vrcp.f32 %v3364_v27  ;;  %v3365_v61 = vadd.f32 1.0, %v5275_v30 }
 0x7db   : > { %v5279_v53 = vpop.eup %5278  ;;  %v3395_v25 = vadd.f32 %v3387_v56, %v2772_v60  ;;  %v3408_v2 = vsub.f32 1.0, %v5277_v23  ;;  %v3424_v33 = vmul.f32 %v6422_v50, %v5277_v23 }
 0x7dc   : > { %v5281_v54 = vpop.eup %5280  ;;  %5298 = vtanh.f32 %v3394_v17  ;;  %v3388_v28 = vmul.f32 %v5279_v53, %v3266_v52 }
 0x7dd   : > { %v5283_v3 = vpop.eup %5282  ;;  %5300 = vtanh.f32 %v3395_v25  ;;  %v3409_v63 = vsub.f32 1.0, %v5281_v54  ;;  %v3425_v44 = vmul.f32 %v6417_v37, %v5281_v54 }
 0x7de   : > { %v5285_v58 = vpop.eup %5284  ;;  %v3396_v48 = vadd.f32 %v3388_v28, %v2776_v57  ;;  %v3410_v0 = vsub.f32 1.0, %v5283_v3  ;;  %v3426_v20 = vmul.f32 %v6432_v1, %v5283_v3 }
 0x7df   : > { %v5287_v10 = vpop.eup %5286  ;;  %v3414_v13 = vmul.f32 %v5285_v58, %v3406_v38  ;;  %v5334_v58 = vld [vmem:[#allocation9 + $0x8] sm:$0xff] }
 0x7e0   : > { %v5289_v5 = vpop.eup %5288  ;;  %5302 = vtanh.f32 %v3396_v48  ;;  %v3415_v12 = vmul.f32 %v5287_v10, %v3407_v14 }
 0x7e1   : > { %v5291_v19 = vpop.eup %5290  ;;  %5304 = vrcp.f32 %v3365_v61  ;;  %v3389_v46 = vmul.f32 %v5289_v5, %v3268_v18  ;;  %v3430_v21 = vadd.f32 %v3422_v59, %v3414_v13 }
 0x7e2   : > { %v5293_v11 = vpop.eup %5292  ;;  %v3431_v34 = vadd.f32 %v3423_v6, %v3415_v12  ;;  %v3411_v27 = vsub.f32 1.0, %v5291_v19  ;;  %v3427_v60 = vmul.f32 %v6427_v51, %v5291_v19  ;;  %v5333_v51 = vld [vmem:[#allocation9] sm:$0xff] }
 0x7e3   : > { %v5295_v45 = vpop.eup %5294  ;;  %v3397_v9 = vadd.f32 %v3389_v46, %v2778_v15  ;;  %v3416_v47 = vmul.f32 %v5293_v11, %v3408_v2 }
 0x7e4   : > { %v3417_v29 = vmul.f32 %v5295_v45, %v3409_v63  ;;  %v5297_v62 = vpop.eup %5296 }
 0x7e5   : > { %5306 = vtanh.f32 %v3397_v9  ;;  %v3432_v41 = vadd.f32 %v3424_v33, %v3416_v47  ;;  %v3412_v50 = vsub.f32 1.0, %v5297_v62  ;;  %v3428_v53 = vmul.f32 %v6442_v35, %v5297_v62 }
 0x7e6   : > { %v5299_v26 = vpop.eup %5298  ;;  %v3433_v49 = vadd.f32 %v3425_v44, %v3417_v29 }
 0x7e7   : > { %v5301_v32 = vpop.eup %5300  ;;  %v4913_v36 = vpack.c.bf16 %v3432_v41, %v3430_v21  ;;  %v3418_v43 = vmul.f32 %v5299_v26, %v3410_v0 }
 0x7e8   : > { %v4911_v7 = vpack.c.bf16 %v3433_v49, %v3431_v34  ;;  %v3419_v30 = vmul.f32 %v5301_v32, %v3411_v27 }
 0x7e9   : > { %v3434_v56 = vadd.f32 %v3426_v20, %v3418_v43 }
 0x7ea   : > { %v5303_v23 = vpop.eup %5302  ;;  %4912 = vmatprep.subr.bf16.mxu1 %v4911_v7  ;;  %v3435_v37 = vadd.f32 %v3427_v60, %v3419_v30 }
 0x7eb   : > { %v5305_v17 = vpop.eup %5304  ;;  %4914 = vmatpush1.bf16.msra.mxu1 %v4913_v36  ;;  %v3420_v52 = vmul.f32 %v5303_v23, %v3412_v50 }
 0x7ec   : > { %v3413_v54 = vsub.f32 1.0, %v5305_v17  ;;  %v3429_v1 = vmul.f32 %v6437_v55, %v5305_v17 }
 0x7ed   : > { %v3436_v25 = vadd.f32 %v3428_v53, %v3420_v52 }
 0x7ef   : > { %v5307_v57 = vpop.eup %5306  ;;  %v4917_v28 = vpack.c.bf16 %v3436_v25, %v3434_v56 }
 0x7f0   : > { %v3421_v61 = vmul.f32 %v5307_v57, %v3413_v54 }
 0x7f2   : > { %v3437_v3 = vadd.f32 %v3429_v1, %v3421_v61 }
 0x7f4   : > { %v4915_v38 = vpack.c.bf16 %v3437_v3, %v3435_v37 }
 0x7f6   : > { %4916 = vmatprep.subr.bf16.mxu1 %v4915_v38 }
 0x7f7   : > { %4918 = vmatpush1.bf16.msra.mxu1 %v4917_v28 }
 0x7fa   : > { %3928 = vmatmul.mubr.msk.f32.vlgmr.msra.gmra.mrb[48].mxu1 %vm3450_vm3, %v5333_v51 }
 0x7fb   : > { %3525 = vmatprep.mubr.f32.mxu1 %v5596_v16 }
 0x7fe   : > { %3929 = vmatmul.mubr.msk.f32.gmra.mrb[50].mxu1 %vm3450_vm3, %v5334_v58 }
 0x7ff   : > { %3615 = vmatprep.mubr.f32.mxu1 %v5596_v16 }
 0x8cd   : > { %v3521_v35 = vpop.f32.mrb[48].mxu1 }
 0x8ce   : > { %v3523_v48 = vpop.f32.mrb[49].mxu1  ;;  %v3522_v14 = vadd.f32 %v3521_v35, %v6347_v22 }
 0x8cf   : > { %v3524_v10 = vadd.f32 %v3523_v48, %v6347_v22 }
 0x8d0   : > { %v3532_v5 = vmax.f32 %v3522_v14, 0.0 }
 0x8d1   : > { %v3527_v55 = vpop.f32.mrb[50].mxu1  ;;  %v3533_v12 = vmax.f32 %v3524_v10, 0.0 }
 0x8d2   : > { %v3528_v18 = vadd.f32 %v3527_v55, %v6345_v42  ;;  %v3529_v13 = vpop.f32.mrb[51].mxu1 }
 0x8d3   : > { %v3530_v59 = vadd.f32 %v3529_v13, %v6345_v42 }
 0x8d4   : > { %v3534_v15 = vmax.f32 %v3528_v18, 0.0 }
 0x8d5   : > { %v3535_v24 = vmax.f32 %v3530_v59, 0.0 }
 0x8d6   : > { %v4921_v6 = vpack.c.bf16 %v3534_v15, %v3532_v5 }
 0x8d7   : > { %v4919_v19 = vpack.c.bf16 %v3535_v24, %v3533_v12 }
 0x8d9   : > { %4920 = vmatprep.subr.bf16.mxu1 %v4919_v19 }
 0x8da   : > { %4922 = vmatpush1.bf16.msra.mxu1 %v4921_v6 }
 0x8dd   : > { %3930 = vmatmul.mubr.msk.f32.vlgmr.msra.gmra.mrb[52].mxu1 %vm2190_vm1, %v6349_v4 }
 0x8de   : > { %3621 = vmatprep.mubr.f32.mxu1 %v5596_v16 }
 0x8e1   : > { %3931 = vmatmul.mubr.msk.f32.gmra.mrb[54].mxu1 %vm2190_vm1, %v6351_v8  ;;  %v5603_v8 = vmov 1966171168  }
 0x8e2   : > { %v3650_v47 = vunpack.c.l.s4 %v5603_v8 }
 0x8e4   : > { %v3651_v33 = vunpack.c.0.s8 %v3650_v47 }
 0x9b0   : > { %v3617_v22 = vpop.f32.mrb[52].mxu1 }
 0x9b1   : > { %v3618_v46 = vadd.f32 %v3617_v22, %v6353_v31  ;;  %v3619_v42 = vpop.f32.mrb[53].mxu1 }
 0x9b2   : > { %v3620_v2 = vadd.f32 %v3619_v42, %v6353_v31  ;;  %v3654_v31 = vsub.s32 %v3651_v33, %v5957_v40 }
 0x9b3   : > { %v3932_v21 = vmul.f32 -1.442695, %v3618_v46 }
 0x9b4   : > { %v3933_v11 = vmul.f32 -1.442695, %v3620_v2  ;;  %v3623_v63 = vpop.f32.mrb[54].mxu1 }
 0x9b5   : > { %5308 = vpow2.f32 %v3932_v21  ;;  %v3624_v34 = vpop.f32.mrb[55].mxu1 }
 0x9b6   : > { %5310 = vpow2.f32 %v3933_v11 }
 0x9bf   : > { %v5309_v45 = vpop.eup %5308 }
 0x9c0   : > { %v5311_v9 = vpop.eup %5310  ;;  %v3632_v4 = vadd.f32 1.0, %v5309_v45 }
 0x9c1   : > { %v3633_v16 = vadd.f32 1.0, %v5311_v9 }
 0x9c2   : > { %5312 = vrcp.f32 %v3632_v4 }
 0x9c3   : > { %5314 = vrcp.f32 %v3633_v16 }
 0x9cc   : > { %v5313_v29 = vpop.eup %5312 }
 0x9cd   : > { %v5315_v44 = vpop.eup %5314 }
 0x9ce   : > { %v3648_v62 = vcombine.low %v5313_v29, %v5315_v44 }
 0x9d0   : > { %v3655_v41 = vrot.slane %v3648_v62, %v3654_v31 }
 0x9d2   : > { %v3656_v0 = vcombine.high %v3655_v41, %v3655_v41  ;;  %v3663_v26 = vrot.slane %v3655_v41, %v3654_v31 }
 0x9d4   : > { %v3670_v49 = vrot.slane %v3656_v0, %v3654_v31  ;;  %3677 = vst.msk [vmem:[%s5942_s13] ss:$8 sm:$0x3] %vm3675_vm4, %v3663_v26 }
 0x9d6   : > { %3934 = vst.msk [vmem:[%s5942_s13 + $0x10] ss:$8 sm:$0x3] %vm3675_vm4, %v3670_v49 }
 0x9d7 PF: > { %p25_p0 = scmp.ge.s32.totalorder %s5840_s16, 4   ;;  %s6647_s17 = smov %s5571_s18 }
 0x9d8   : > { %s6648_s18 = smov %s5575_s19  ;;  %s6649_s19 = smov %s5852_s5 }
 0x9d9   : > { %s6650_s20 = smov %s5840_s16  ;;  %27 = sbr.rel (!%p25_p0) target bundleno = 10 (0xa), region = 143 }
 0x9e0   :  { %3719 = vsyncpa [#allocation3], 1 }
 0x9e1   :  { %3721 = vsyncpa [#allocation3 + $0x1], 1 }
 0x9e2   :  { %3722 = vsyncpa [#allocation5], 1 }
 0x9e3   :  { %3723 = vsyncpa [#allocation8], 1 }
 0x9e4   :  { %3724 = vsyncpa [#allocation11], 1 }

</bundles_post_ra>
